<compile_context>
chip_gen: v6e
topology: v6e:2x2x1
jax: 0.10.0
libtpu: 0.0.40
codegen_flags: <defaults>
</compile_context>

<pallas_src>
import jax
import jax.numpy as jnp
from jax.experimental import pallas as pl
from jax.experimental.pallas import tpu as pltpu


def ffn_kernel(x_ref, w1_ref, b1_ref, w2_ref, b2_ref, o_ref, acc_ref):
    # x_ref : (tm, d_model)  bf16      w1_ref: (d_model, tf) bf16   b1_ref: (1, tf) f32
    # w2_ref: (tf, d_model)  bf16      b2_ref: (1, d_model)  f32
    # o_ref : (tm, d_model)            acc_ref: (tm, d_model) f32 scratch
    k = pl.program_id(1)

    @pl.when(k == 0)
    def _init():
        acc_ref[...] = jnp.zeros_like(acc_ref)

    # First GEMM slice: (tm, d_model) @ (d_model, tf) -> (tm, tf), f32 accumulation.
    h = jnp.dot(x_ref[...], w1_ref[...], preferred_element_type=jnp.float32)
    h = jnp.maximum(h + b1_ref[...], 0.0)        # bias + ReLU (exact per d_ff slice)
    # dropout (eval mode) == identity

    # Second GEMM slice: accumulate this d_ff slice's contribution into the output tile.
    acc_ref[...] += jnp.dot(h.astype(w2_ref.dtype), w2_ref[...],
                            preferred_element_type=jnp.float32)

    @pl.when(k == pl.num_programs(1) - 1)
    def _finalize():
        o_ref[...] = (acc_ref[...] + b2_ref[...]).astype(o_ref.dtype)


def _pick_ff_tile(d_ff):
    # Prefer MXU-native multiples (256 on v6e/v7x, 128 on v5e); fall back to full extent.
    for t in (512, 256, 128):
        if d_ff % t == 0:
            return t
    return d_ff


def positionwise_ffn(x, w1, b1, w2, b2, *, tm=256, tf=None):
    """x: (batch, seq, d_model); w1: (d_model, d_ff); w2: (d_ff, d_model)."""
    batch, seq, d_model = x.shape
    d_ff = w1.shape[1]
    n = batch * seq

    if tf is None:
        tf = _pick_ff_tile(d_ff)

    # bf16 MXU operands (cast once here, not per grid step); biases stay f32.
    x2d = x.reshape(n, d_model).astype(jnp.bfloat16)
    w1b = w1.astype(jnp.bfloat16)
    w2b = w2.astype(jnp.bfloat16)
    b1_2d = b1.reshape(1, d_ff).astype(jnp.float32)
    b2_2d = b2.reshape(1, d_model).astype(jnp.float32)

    # Pad rows up to a multiple of the row tile instead of forcing a small tm.
    n_pad = pl.cdiv(n, tm) * tm
    if n_pad != n:
        x2d = jnp.pad(x2d, ((0, n_pad - n), (0, 0)))

    grid = (n_pad // tm, d_ff // tf)

    out_itemsize = jnp.dtype(x.dtype).itemsize
    cost = pl.CostEstimate(
        flops=4 * n_pad * d_model * d_ff,          # two GEMMs, 2 flops per MAC
        transcendentals=0,
        bytes_accessed=int(x2d.size * 2 + w1b.size * 2 + w2b.size * 2
                           + b1_2d.size * 4 + b2_2d.size * 4
                           + n_pad * d_model * out_itemsize),
    )

    out2d = pl.pallas_call(
        ffn_kernel,
        out_shape=jax.ShapeDtypeStruct((n_pad, d_model), x.dtype),
        grid_spec=pltpu.PrefetchScalarGridSpec(
            num_scalar_prefetch=0,
            grid=grid,
            in_specs=[
                pl.BlockSpec((tm, d_model), lambda i, k: (i, 0)),   # x rows
                pl.BlockSpec((d_model, tf), lambda i, k: (0, k)),   # W1 column slice
                pl.BlockSpec((1, tf),       lambda i, k: (0, k)),   # b1 slice
                pl.BlockSpec((tf, d_model), lambda i, k: (k, 0)),   # W2 row slice
                pl.BlockSpec((1, d_model),  lambda i, k: (0, 0)),   # b2
            ],
            out_specs=pl.BlockSpec((tm, d_model), lambda i, k: (i, 0)),
            scratch_shapes=[pltpu.VMEM((tm, d_model), jnp.float32)],
        ),
        compiler_params=pltpu.CompilerParams(
            dimension_semantics=("parallel", "arbitrary"),
            vmem_limit_bytes=48 * 1024 * 1024,
        ),
        cost_estimate=cost,
    )(x2d, w1b, b1_2d, w2b, b2_2d)

    return out2d[:n].reshape(batch, seq, d_model)


if __name__ == "__main__":
    # Small batch/seq; d_model/d_ff taken from the module's globals.
    batch, seq = 2, 8
    d_model, d_ff = 512, 2048

    key = jax.random.PRNGKey(0)
    kx, kw1, kb1, kw2, kb2 = jax.random.split(key, 5)

    x = jax.random.normal(kx, (batch, seq, d_model), dtype=jnp.float32)

    # nn.Linear-style parameters, stored pre-transposed as (in, out).
    w1 = jax.random.normal(kw1, (d_model, d_ff), dtype=jnp.float32) * (1.0 / d_model ** 0.5)
    b1 = jax.random.normal(kb1, (d_ff,), dtype=jnp.float32) * 0.01
    w2 = jax.random.normal(kw2, (d_ff, d_model), dtype=jnp.float32) * (1.0 / d_ff ** 0.5)
    b2 = jax.random.normal(kb2, (d_model,), dtype=jnp.float32) * 0.01

    out = positionwise_ffn(x, w1, b1, w2, b2)
    jax.block_until_ready(out)

    # Reference mirroring the kernel's numerics (bf16 MXU inputs, f32 accumulation).
    xr = x.reshape(-1, d_model).astype(jnp.bfloat16).astype(jnp.float32)
    w1r = w1.astype(jnp.bfloat16).astype(jnp.float32)
    w2r = w2.astype(jnp.bfloat16).astype(jnp.float32)
    h = jnp.maximum(xr @ w1r + b1, 0.0)
    ref = (h.astype(jnp.bfloat16).astype(jnp.float32) @ w2r + b2).reshape(batch, seq, d_model)
    assert jnp.allclose(out, ref, atol=1e-2, rtol=1e-2), "mismatch vs reference"

    print("KERNEL_OK")
</pallas_src>

<mosaic_0001>
module attributes {stable_mosaic.version = 11 : i64} {
  func.func @ffn_kernel(%arg0: i32, %arg1: i32, %arg2: memref<256x512xbf16, #tpu.memory_space<vmem>>, %arg3: memref<512x512xbf16, #tpu.memory_space<vmem>>, %arg4: memref<1x512xf32, #tpu.memory_space<vmem>>, %arg5: memref<512x512xbf16, #tpu.memory_space<vmem>>, %arg6: memref<1x512xf32, #tpu.memory_space<vmem>>, %arg7: memref<256x512xf32, #tpu.memory_space<vmem>>, %arg8: memref<256x512xf32, #tpu.memory_space<vmem>>) attributes {dimension_semantics = [#tpu.dimension_semantics<parallel>, #tpu.dimension_semantics<arbitrary>], iteration_bounds = array<i64: 1, 4>, scalar_prefetch = 0 : i64, scratch_operands = 1 : i64, tpu.core_type = #tpu.core_type<tc>, window_params = [{transform_indices = @transform_0, window_bounds = array<i64: 256, 512>}, {transform_indices = @transform_1, window_bounds = array<i64: 512, 512>}, {transform_indices = @transform_2, window_bounds = array<i64: 1, 512>}, {transform_indices = @transform_3, window_bounds = array<i64: 512, 512>}, {pipeline_mode = #tpu.pipeline_mode<synchronous>, transform_indices = @transform_4, window_bounds = array<i64: 1, 512>}, {transform_indices = @transform_5, window_bounds = array<i64: 256, 512>}]} {
    %c0_i32 = arith.constant 0 : i32
    %0 = arith.cmpi eq, %arg1, %c0_i32 : i32
    %1 = arith.extui %0 : i1 to i32
    %c0_i32_0 = arith.constant 0 : i32
    %2 = arith.cmpi ne, %1, %c0_i32_0 : i32
    scf.if %2 {
      %cst_15 = arith.constant 0.000000e+00 : f32
      %20 = vector.broadcast %cst_15 : f32 to vector<256x512xf32>
      %c0_16 = arith.constant 0 : index
      %c0_17 = arith.constant 0 : index
      %21 = vector.load %arg8[%c0_16, %c0_17] : memref<256x512xf32, #tpu.memory_space<vmem>>, vector<256x512xf32>
      tpu.vector_store %arg8[%c0_16, %c0_17], %20 {strides = array<i32>} : memref<256x512xf32, #tpu.memory_space<vmem>>, vector<256x512xf32>,
    } else {
    }
    %c0 = arith.constant 0 : index
    %c0_1 = arith.constant 0 : index
    %3 = vector.load %arg2[%c0, %c0_1] : memref<256x512xbf16, #tpu.memory_space<vmem>>, vector<256x512xbf16>
    %c0_2 = arith.constant 0 : index
    %c0_3 = arith.constant 0 : index
    %4 = vector.load %arg3[%c0_2, %c0_3] : memref<512x512xbf16, #tpu.memory_space<vmem>>, vector<512x512xbf16>
    %cst = arith.constant dense<0.000000e+00> : vector<256x512xf32>
    %5 = tpu.matmul %3, %4, %cst {dimension_numbers = #tpu.dot_dimension_numbers<[1], [0], [0], [1], [0, 0, 1, 1], [], []>} : vector<256x512xbf16>, vector<512x512xbf16>, vector<256x512xf32> -> vector<256x512xf32>
    %c0_4 = arith.constant 0 : index
    %c0_5 = arith.constant 0 : index
    %6 = vector.load %arg4[%c0_4, %c0_5] : memref<1x512xf32, #tpu.memory_space<vmem>>, vector<1x512xf32>
    %7 = vector.broadcast %6 : vector<1x512xf32> to vector<256x512xf32>
    %8 = arith.addf %5, %7 : vector<256x512xf32>
    %cst_6 = arith.constant 0.000000e+00 : f32
    %9 = vector.broadcast %cst_6 : f32 to vector<256x512xf32>
    %10 = arith.maximumf %8, %9 : vector<256x512xf32>
    %c0_7 = arith.constant 0 : index
    %c0_8 = arith.constant 0 : index
    %11 = vector.load %arg8[%c0_7, %c0_8] : memref<256x512xf32, #tpu.memory_space<vmem>>, vector<256x512xf32>
    %12 = arith.truncf %10 : vector<256x512xf32> to vector<256x512xbf16>
    %c0_9 = arith.constant 0 : index
    %c0_10 = arith.constant 0 : index
    %13 = vector.load %arg5[%c0_9, %c0_10] : memref<512x512xbf16, #tpu.memory_space<vmem>>, vector<512x512xbf16>
    %cst_11 = arith.constant dense<0.000000e+00> : vector<256x512xf32>
    %14 = tpu.matmul %12, %13, %cst_11 {dimension_numbers = #tpu.dot_dimension_numbers<[1], [0], [0], [1], [0, 0, 1, 1], [], []>} : vector<256x512xbf16>, vector<512x512xbf16>, vector<256x512xf32> -> vector<256x512xf32>
    %15 = arith.addf %11, %14 : vector<256x512xf32>
    %c0_12 = arith.constant 0 : index
    %c0_13 = arith.constant 0 : index
    %16 = vector.load %arg8[%c0_12, %c0_13] : memref<256x512xf32, #tpu.memory_space<vmem>>, vector<256x512xf32>
    tpu.vector_store %arg8[%c0_12, %c0_13], %15 {strides = array<i32>} : memref<256x512xf32, #tpu.memory_space<vmem>>, vector<256x512xf32>,
    %c3_i32 = arith.constant 3 : i32
    %17 = arith.cmpi eq, %arg1, %c3_i32 : i32
    %18 = arith.extui %17 : i1 to i32
    %c0_i32_14 = arith.constant 0 : i32
    %19 = arith.cmpi ne, %18, %c0_i32_14 : i32
    scf.if %19 {
      %c0_15 = arith.constant 0 : index
      %c0_16 = arith.constant 0 : index
      %20 = vector.load %arg8[%c0_15, %c0_16] : memref<256x512xf32, #tpu.memory_space<vmem>>, vector<256x512xf32>
      %c0_17 = arith.constant 0 : index
      %c0_18 = arith.constant 0 : index
      %21 = vector.load %arg6[%c0_17, %c0_18] : memref<1x512xf32, #tpu.memory_space<vmem>>, vector<1x512xf32>
      %22 = vector.broadcast %21 : vector<1x512xf32> to vector<256x512xf32>
      %23 = arith.addf %20, %22 : vector<256x512xf32>
      %c0_19 = arith.constant 0 : index
      %c0_20 = arith.constant 0 : index
      %24 = vector.load %arg7[%c0_19, %c0_20] : memref<256x512xf32, #tpu.memory_space<vmem>>, vector<256x512xf32>
      tpu.vector_store %arg7[%c0_19, %c0_20], %23 {strides = array<i32>} : memref<256x512xf32, #tpu.memory_space<vmem>>, vector<256x512xf32>,
    } else {
    }
    return
  }
  func.func @transform_0(%arg0: i32, %arg1: i32) -> (i32, i32) {
    %c0_i32 = arith.constant 0 : i32
    %c0_i32_0 = arith.constant 0 : i32
    return %arg0, %c0_i32 : i32, i32
  }
  func.func @transform_1(%arg0: i32, %arg1: i32) -> (i32, i32) {
    %c0_i32 = arith.constant 0 : i32
    %c0_i32_0 = arith.constant 0 : i32
    return %c0_i32, %arg1 : i32, i32
  }
  func.func @transform_2(%arg0: i32, %arg1: i32) -> (i32, i32) {
    %c0_i32 = arith.constant 0 : i32
    %c0_i32_0 = arith.constant 0 : i32
    return %c0_i32, %arg1 : i32, i32
  }
  func.func @transform_3(%arg0: i32, %arg1: i32) -> (i32, i32) {
    %c0_i32 = arith.constant 0 : i32
    %c0_i32_0 = arith.constant 0 : i32
    return %arg1, %c0_i32 : i32, i32
  }
  func.func @transform_4(%arg0: i32, %arg1: i32) -> (i32, i32) {
    %c0_i32 = arith.constant 0 : i32
    %c0_i32_0 = arith.constant 0 : i32
    %c0_i32_1 = arith.constant 0 : i32
    return %c0_i32, %c0_i32_0 : i32, i32
  }
  func.func @transform_5(%arg0: i32, %arg1: i32) -> (i32, i32) {
    %c0_i32 = arith.constant 0 : i32
    %c0_i32_0 = arith.constant 0 : i32
    return %arg0, %c0_i32 : i32, i32
  }
}

</mosaic_0001>

<bundles_post_ra>
// kernel: tpu_custom_call.1
= control target key start
LH: loop header
LB: loop body
LE: loop exit
PB: predicated region body
PF: predicated region fallthrough
CT: control target
= control target key end

     0   :  { %s8443_s0 = inlined_call_operand.hbm [shape: bf16[256,512], index: 0, kind: input, shape index: {}]   ;;  %s8444_s1 = inlined_call_operand.hbm [shape: bf16[512,2048], index: 1, kind: input, shape index: {}]   ;;  %s8445_s2 = inlined_call_operand.hbm [shape: f32[1,2048], index: 2, kind: input, shape index: {}]   ;;  %s8446_s3 = inlined_call_operand.hbm [shape: bf16[2048,512], index: 3, kind: input, shape index: {}]   ;;  %s8447_s4 = inlined_call_operand.hbm [shape: f32[1,512], index: 4, kind: input, shape index: {}]   ;;  %s8448_s5 = inlined_call_operand.hbm [shape: f32[256,512], index: 5, kind: output, shape index: {}]  }
   0x1   :  { %8486 = sst [smem:[#allocation48_spill]] %s8444_s1 }
   0x2   :  { %8487 = sst [smem:[#allocation49_spill]] %s8447_s4 }
   0x3   :  { %10 = vsyncpa [#allocation4], 0 }
   0x4   :  { %11 = vsyncpa [#allocation7], 0 }
   0x5   :  { %13 = vsyncpa [#allocation7 + $0x1], 0 }
   0x6   :  { %14 = vsyncpa [#allocation10], 0 }
   0x7   :  { %16 = vsyncpa [#allocation10 + $0x1], 0 }
   0x8   :  { %17 = vsyncpa [#allocation5], 0  ;;  %s6311_s18 = smov 0   ;;  %s6313_s19 = smov 0  }
   0x9   :  { %s6315_s20 = smov 0   ;;  %s6317_s21 = smov 0  }
   0xa   :  { %s6319_s22 = smov 0   ;;  %s6321_s23 = smov 0  }
   0xb LB: > { %s6340_s24 = sadd.s32 4294967295, %s6267_s23   ;;  %s68_s25 = sadd.s32 1, %s6255_s20  ;;  %s6267_s23 = sphi %s6321_s23, %s23_s23   ;;  %s6263_s22 = sphi %s6319_s22, %s8603_s22   ;;  %s6259_s21 = sphi %s6317_s21, %s8602_s21   ;;  %s6255_s20 = sphi %s6315_s20, %s8601_s20   ;;  %s6251_s19 = sphi %s6313_s19, %s8600_s19   ;;  %s6247_s18 = sphi %s6311_s18, %s8599_s18  }
   0xc   : > { %p75_p0 = scmp.ne.s32.totalorder %s6255_s20, %s6251_s19  ;;  %p76_p1 = scmp.eq.s32.totalorder %s6267_s23, 0 }
   0xd   : > { %p81_p2 = scmp.ne.s32.totalorder %s6251_s19, %s6247_s18  ;;  %p8449_p3 = scmp.eq.s32.totalorder %s6340_s24, 0 }
   0xe   : > { %p77_p4 = por %p76_p1, %p75_p0  ;;  %p5110_p5 = scmp.ge.s32.totalorder %s6267_s23, 1 }
   0xf   : > { %p6351_p6 = por %p8449_p3, %p81_p2  ;;  %p191_p7 = scmp.lt.s32.totalorder %s6267_s23, 5 }
  0x10   : > { %s6269_s28 = smov [#allocation11]   ;;  %p5497_p10 = scmp.lt.s32.totalorder %s6267_s23, 4 }
  0x11   : > { %p6356_p8 = pnand %p5110_p5, %p191_p7  ;;  %s221_s29 = sshll.u32 %s6269_s28, 4  ;;  %s222_s29 = int_to_ptr.vmem [resolvable:$true] %s221_s29 }
  0x12   : > { %p6369_p12 = pnand %p5497_p10, %p77_p4  ;;  %s6052_s7 = scalar_lea.vmem %s222_s29, 64 }
  0x13   : > { %p5478_p9 = pneg %p6356_p8  ;;  %p6053_p0 = scmp.ne.s32.totalorder %s222_s29, %s6052_s7 }
  0x14   : > { %p6060_p5 = scmp.lt.s32.totalorder %s222_s29, %s222_s29  ;;  %p6061_p7 = scmp.lt.s32.totalorder %s6052_s7, %s6052_s7 }
  0x15   : > { %p6365_p11 = pnand %p5478_p9, %p8449_p3 }
  0x16   : > { %p6062_p9 = por %p6061_p7, %p6060_p5 }
  0x17   : > { %p6043_p13 = pneg %p6365_p11 }
  0x19   : > { %p6055_p1 = pnand %p6053_p0, %p6043_p13 }
  0x1b   : > { %p6056_p2 = pneg %p6055_p1 }
  0x1d   : > { %p6063_p3 = pnand %p6062_p9, %p6056_p2 }
  0x1f   : > { %6066 = shalt.err (!%p6063_p3)
}
  0x20   : > { %s8492_s4 = sld [smem:[#allocation49_spill]]  ;;  %s32_s10 = sadd.s32 1, %s6263_s22 }
  0x21   : > { %s8450_s11 = sand.u32 1, %s6267_s23   ;;  %p33_p4 = scmp.ge.s32.totalorder %s32_s10, 4 }
  0x22   : > { %s234_s12 = sand.u32 1, %s6255_s20   ;;  %s5456_s13 = sshll.u32 %s6263_s22, 8 }
  0x23   : > { %s8605_s10 = smov (%p33_p4, %s32_s10), 0  ;;  %s6391_s14 = sshll.u32 %s234_s12, 10 }
  0x24   : > { %8493 = sst [smem:[#allocation18_spill]] %s8605_s10  ;;  %s65_s18 = ssub.s32 %s6263_s22, %s8605_s10 }
  0x25   : > { %s8494_s1 = sld [smem:[#allocation48_spill]]  ;;  %p66_p3 = scmp.eq.s32.totalorder %s65_s18, 0 }
  0x26   : > { %5484 = dma.hbm_to_vmem [thread:$0]  (!%p6365_p11), %s8492_s4, 64, %s222_s29, [#allocation10]  }
  0x27   : > { %s236_s28 = scalar_lea.vmem [#allocation6], %s6391_s14  ;;  %s6408_s8 = scalar_lea.sflag [#allocation7], %s8450_s11 }
  0x28   : > { %s243_s29 = sshll.u32 %s236_s28, 4  ;;  %p6069_p10 = pneg %p6369_p12  ;;  %s244_s29 = int_to_ptr.vmem [resolvable:$true] %s243_s29 }
  0x29   : > { %s6404_s7 = scalar_select %p66_p3, %s6255_s20, %s68_s25  }
  0x2a   : > { %s6080_s9 = scalar_lea.vmem %s244_s29, 16384 }
  0x2b   : > { %s6396_s17 = scalar_lea.hbm %s8494_s1, %s5456_s13  ;;  %p6081_p0 = scmp.ne.s32.totalorder %s244_s29, %s6080_s9 }
  0x2c   : > { %s6270_s13 = smov [#allocation6]  }
  0x2d   : > { %p6083_p1 = pnand %p6081_p0, %p6069_p10  ;;  %s6085_s15 = sshll.u32 %s6270_s13, 4  ;;  %s6086_s15 = int_to_ptr.vmem [resolvable:$false] %s6085_s15 }
  0x2e   : > { %s6087_s16 = scalar_lea.vmem %s6086_s15, 32768  ;;  %p6088_p5 = scmp.lt.s32.totalorder %s244_s29, %s6086_s15 }
  0x2f   : > { %p6084_p2 = pneg %p6083_p1  ;;  %p6089_p7 = scmp.lt.s32.totalorder %s6087_s16, %s6080_s9 }
  0x31   : > { %p6090_p9 = por %p6089_p7, %p6088_p5 }
  0x33   : > { %p6091_p4 = pnand %p6090_p9, %p6084_p2 }
  0x35   : > { %6094 = shalt.err (!%p6091_p4)
}
  0x36   : > { %s6271_s25 = smov 1024   ;;  %s6272_s18 = smov 256  }
  0x37   : > { %s6273_s28 = smov 16   ;;  %s6274_s13 = smov [#allocation3]  }
  0x38   : > { %5488 = dma.hbm_to_vmem [thread:$0]  (!%p6369_p12), %s6396_s17, 16384, %s244_s29, %s6408_s8, %s6271_s25, %s6272_s18, %s6273_s28  }
  0x39   : > { %s207_s11 = sshll.u32 %s6274_s13, 4  ;;  %s5117_s9 = sshll.u32 %s234_s12, 2  ;;  %s208_s11 = int_to_ptr.vmem [resolvable:$true] %s207_s11 }
  0x3a   : > { %s6106_s15 = scalar_lea.vmem %s208_s11, 8192  ;;  %p6114_p2 = scmp.lt.s32.totalorder %s208_s11, %s208_s11 }
  0x3b   : > { %p6107_p3 = scmp.ne.s32.totalorder %s208_s11, %s6106_s15  ;;  %p6115_p5 = scmp.lt.s32.totalorder %s6106_s15, %s6106_s15 }
  0x3d   : > { %p6109_p0 = pnand %p6107_p3, %p6043_p13  ;;  %p6116_p7 = por %p6115_p5, %p6114_p2 }
  0x3f   : > { %p6110_p1 = pneg %p6109_p0 }
  0x41   : > { %p6117_p9 = pnand %p6116_p7, %p6110_p1 }
  0x43   : > { %6120 = shalt.err (!%p6117_p9)
}
  0x44   : > { %5481 = dma.hbm_to_vmem [thread:$0]  (!%p6365_p11), %s8443_s0, 8192, %s208_s11, [#allocation4], %s6272_s18, %s6272_s18, %s6273_s28  }
  0x45   : > { %s5457_s12 = sshll.u32 %s6263_s22, 6  ;;  %s257_s15 = scalar_lea.vmem [#allocation8], %s5117_s9 }
  0x46   : > { %s263_s13 = scalar_lea.hbm %s8445_s2, %s5457_s12  ;;  %s265_s1 = sshll.u32 %s257_s15, 4  ;;  %s266_s1 = int_to_ptr.vmem [resolvable:$true] %s265_s1 }
  0x47   : > { %s6134_s4 = scalar_lea.vmem %s266_s1, 64  ;;  %s6275_s30 = smov [#allocation8]  }
  0x48   : > { %p6135_p13 = scmp.ne.s32.totalorder %s266_s1, %s6134_s4  ;;  %s6139_s10 = sshll.u32 %s6275_s30, 4  ;;  %s6140_s10 = int_to_ptr.vmem [resolvable:$false] %s6139_s10 }
  0x49   : > { %s6141_s17 = scalar_lea.vmem %s6140_s10, 128  ;;  %p6142_p0 = scmp.lt.s32.totalorder %s266_s1, %s6140_s10 }
  0x4a   : > { %p6137_p4 = pnand %p6135_p13, %p6069_p10  ;;  %p6143_p11 = scmp.lt.s32.totalorder %s6141_s17, %s6134_s4 }
  0x4c   : > { %p6138_p3 = pneg %p6137_p4  ;;  %p6144_p1 = por %p6143_p11, %p6142_p0 }
  0x4e   : > { %p6145_p2 = pnand %p6144_p1, %p6138_p3 }
  0x50   : > { %6148 = shalt.err (!%p6145_p2)
}
  0x51   : > { %5491 = dma.hbm_to_vmem [thread:$0]  (!%p6369_p12), %s263_s13, 64, %s266_s1, %s6408_s8  }
  0x52   : > { %s5459_s11 = sshll.u32 %s6263_s22, 14  ;;  %s276_s16 = scalar_lea.vmem [#allocation9], %s6391_s14 }
  0x53   : > { %s283_s12 = scalar_lea.hbm %s8446_s3, %s5459_s11  ;;  %s284_s25 = sshll.u32 %s276_s16, 4  ;;  %s285_s25 = int_to_ptr.vmem [resolvable:$true] %s284_s25 }
  0x54   : > { %s8495_s4 = sand.u32 1, %s6267_s23   ;;  %s6162_s15 = scalar_lea.vmem %s285_s25, 16384 }
  0x55   : > { %s273_s10 = scalar_lea.sflag [#allocation10], %s8495_s4  ;;  %p6163_p5 = scmp.ne.s32.totalorder %s285_s25, %s6162_s15 }
  0x56   : > { %s6276_s30 = smov [#allocation9]  }
  0x57   : > { %p6165_p7 = pnand %p6163_p5, %p6069_p10  ;;  %s6167_s17 = sshll.u32 %s6276_s30, 4  ;;  %s6168_s17 = int_to_ptr.vmem [resolvable:$false] %s6167_s17 }
  0x58   : > { %s6169_s1 = scalar_lea.vmem %s6168_s17, 32768  ;;  %p6170_p13 = scmp.lt.s32.totalorder %s285_s25, %s6168_s17 }
  0x59   : > { %p6166_p9 = pneg %p6165_p7  ;;  %p6171_p4 = scmp.lt.s32.totalorder %s6169_s1, %s6162_s15 }
  0x5b   : > { %p6172_p3 = por %p6171_p4, %p6170_p13 }
  0x5d   : > { %p6173_p0 = pnand %p6172_p3, %p6166_p9 }
  0x5f   : > { %6176 = shalt.err (!%p6173_p0)
}
  0x60   : > { %5494 = dma.hbm_to_vmem [thread:$0]  (!%p6369_p12), %s283_s12, 16384, %s285_s25, %s273_s10, %s6272_s18, %s6272_s18, %s6273_s28  }
  0x61   : > { %296 = sbr.rel (%p6356_p8) target bundleno = 1127 (0x467), region = 40 }
  0x66   : > { %p8496_p10 = scmp.eq.s32.totalorder %s6340_s24, 0 }
  0x68   : > { %6226 = dma.done.wait (%p8496_p10), [#allocation4], 8192   ;;  %p8497_p11 = pmov %p8496_p10 }
  0x69   : > { %s302_s14 = sand.u32 1, %s6340_s24   ;;  %s304_s8 = sand.u32 1, %s6251_s19  }
  0x6a   : > { %6228 = vsyncadd (%p8497_p11), [#allocation4], 4294959104  ;;  %s5126_s13 = sshll.u32 %s304_s8, 10  ;;  %s303_s6 = scalar_lea.sflag [#allocation7], %s302_s14 }
  0x6b   : > { %s6467_s11 = scalar_lea.vmem [#allocation6], %s5126_s13 }
  0x6c   : > { %6230 = dma.done.wait (%p6351_p6), %s303_s6, 16448  }
  0x6d   : > { %6232 = vsyncadd (%p6351_p6), %s303_s6, 4294950848  ;;  %s6473_s27 = sshll.u32 %s304_s8, 2  ;;  %s321_s28 = scalar_lea.sflag [#allocation10], %s302_s14 }
  0x6e   : > { %s315_s18 = scalar_lea.vmem [#allocation8], %s6473_s27  ;;  %s6476_s9 = scalar_lea.vmem [#allocation9], %s5126_s13 }
  0x6f   : > { %6234 = dma.done.wait (%p6351_p6), %s321_s28, 16384  }
  0x70   : > { %6236 = vsyncadd (%p6351_p6), %s321_s28, 4294950912  ;;  %p8498_p8 = pmov %p8496_p10 }
  0x72   : > { %6238 = dma.done.wait (%p8498_p8), [#allocation10], 64   ;;  %p8499_p12 = pmov %p8498_p8 }
  0x73   : > { %p5130_p1 = scmp.ne.s32.totalorder %s6259_s21, 0 }
  0x74   : > { %6240 = vsyncadd (%p8499_p12), [#allocation10], 4294967232 }
  0x75   : > { %368 = sbr.rel (%p5130_p1) target bundleno = 187 (0xbb), region = 64 }
  0x7a   : > { %v6277_v0 = vmov 0.0  }
  0x7b   : > { %369 = vst [vmem:[#allocation2 + $0x2b0] sm:$0xff] %v6277_v0  ;;  %370 = vst [vmem:[#allocation2 + $0x3b0] sm:$0xff] %v6277_v0 }
  0x7c   : > { %371 = vst [vmem:[#allocation2 + $0xd8] sm:$0xff] %v6277_v0  ;;  %372 = vst [vmem:[#allocation2 + $0x18] sm:$0xff] %v6277_v0 }
  0x7d   : > { %373 = vst [vmem:[#allocation2 + $0x50] sm:$0xff] %v6277_v0  ;;  %374 = vst [vmem:[#allocation2 + $0x368] sm:$0xff] %v6277_v0 }
  0x7e   : > { %375 = vst [vmem:[#allocation2 + $0x330] sm:$0xff] %v6277_v0  ;;  %376 = vst [vmem:[#allocation2 + $0x48] sm:$0xff] %v6277_v0 }
  0x7f   : > { %377 = vst [vmem:[#allocation2 + $0x380] sm:$0xff] %v6277_v0  ;;  %378 = vst [vmem:[#allocation2 + $0x110] sm:$0xff] %v6277_v0 }
  0x80   : > { %379 = vst [vmem:[#allocation2 + $0x118] sm:$0xff] %v6277_v0  ;;  %380 = vst [vmem:[#allocation2 + $0x98] sm:$0xff] %v6277_v0 }
  0x81   : > { %381 = vst [vmem:[#allocation2 + $0x320] sm:$0xff] %v6277_v0  ;;  %382 = vst [vmem:[#allocation2 + $0x150] sm:$0xff] %v6277_v0 }
  0x82   : > { %383 = vst [vmem:[#allocation2 + $0x108] sm:$0xff] %v6277_v0  ;;  %384 = vst [vmem:[#allocation2 + $0x60] sm:$0xff] %v6277_v0 }
  0x83   : > { %385 = vst [vmem:[#allocation2 + $0x2e0] sm:$0xff] %v6277_v0  ;;  %386 = vst [vmem:[#allocation2 + $0x388] sm:$0xff] %v6277_v0 }
  0x84   : > { %387 = vst [vmem:[#allocation2 + $0x338] sm:$0xff] %v6277_v0  ;;  %388 = vst [vmem:[#allocation2 + $0x340] sm:$0xff] %v6277_v0 }
  0x85   : > { %389 = vst [vmem:[#allocation2 + $0x80] sm:$0xff] %v6277_v0  ;;  %390 = vst [vmem:[#allocation2 + $0x1a8] sm:$0xff] %v6277_v0 }
  0x86   : > { %391 = vst [vmem:[#allocation2 + $0x1b8] sm:$0xff] %v6277_v0  ;;  %392 = vst [vmem:[#allocation2 + $0x168] sm:$0xff] %v6277_v0 }
  0x87   : > { %393 = vst [vmem:[#allocation2 + $0x3e8] sm:$0xff] %v6277_v0  ;;  %394 = vst [vmem:[#allocation2 + $0x2f8] sm:$0xff] %v6277_v0 }
  0x88   : > { %395 = vst [vmem:[#allocation2 + $0x290] sm:$0xff] %v6277_v0  ;;  %396 = vst [vmem:[#allocation2 + $0x28] sm:$0xff] %v6277_v0 }
  0x89   : > { %397 = vst [vmem:[#allocation2 + $0x138] sm:$0xff] %v6277_v0  ;;  %398 = vst [vmem:[#allocation2 + $0xc0] sm:$0xff] %v6277_v0 }
  0x8a   : > { %399 = vst [vmem:[#allocation2 + $0x1c0] sm:$0xff] %v6277_v0  ;;  %400 = vst [vmem:[#allocation2 + $0x280] sm:$0xff] %v6277_v0 }
  0x8b   : > { %401 = vst [vmem:[#allocation2 + $0x100] sm:$0xff] %v6277_v0  ;;  %402 = vst [vmem:[#allocation2 + $0x3c0] sm:$0xff] %v6277_v0 }
  0x8c   : > { %403 = vst [vmem:[#allocation2 + $0x158] sm:$0xff] %v6277_v0  ;;  %404 = vst [vmem:[#allocation2 + $0x3e0] sm:$0xff] %v6277_v0 }
  0x8d   : > { %405 = vst [vmem:[#allocation2 + $0x218] sm:$0xff] %v6277_v0  ;;  %406 = vst [vmem:[#allocation2 + $0x3f8] sm:$0xff] %v6277_v0 }
  0x8e   : > { %407 = vst [vmem:[#allocation2 + $0x8] sm:$0xff] %v6277_v0  ;;  %408 = vst [vmem:[#allocation2 + $0x128] sm:$0xff] %v6277_v0 }
  0x8f   : > { %409 = vst [vmem:[#allocation2 + $0x2a0] sm:$0xff] %v6277_v0  ;;  %410 = vst [vmem:[#allocation2 + $0x3f0] sm:$0xff] %v6277_v0 }
  0x90   : > { %411 = vst [vmem:[#allocation2 + $0xa0] sm:$0xff] %v6277_v0  ;;  %412 = vst [vmem:[#allocation2 + $0x2c0] sm:$0xff] %v6277_v0 }
  0x91   : > { %413 = vst [vmem:[#allocation2 + $0xb0] sm:$0xff] %v6277_v0  ;;  %414 = vst [vmem:[#allocation2 + $0x1e0] sm:$0xff] %v6277_v0 }
  0x92   : > { %415 = vst [vmem:[#allocation2 + $0x1f0] sm:$0xff] %v6277_v0  ;;  %416 = vst [vmem:[#allocation2 + $0x10] sm:$0xff] %v6277_v0 }
  0x93   : > { %417 = vst [vmem:[#allocation2 + $0x230] sm:$0xff] %v6277_v0  ;;  %418 = vst [vmem:[#allocation2 + $0x240] sm:$0xff] %v6277_v0 }
  0x94   : > { %419 = vst [vmem:[#allocation2 + $0x90] sm:$0xff] %v6277_v0  ;;  %420 = vst [vmem:[#allocation2 + $0x3a0] sm:$0xff] %v6277_v0 }
  0x95   : > { %421 = vst [vmem:[#allocation2 + $0x208] sm:$0xff] %v6277_v0  ;;  %422 = vst [vmem:[#allocation2 + $0xd0] sm:$0xff] %v6277_v0 }
  0x96   : > { %423 = vst [vmem:[#allocation2 + $0x88] sm:$0xff] %v6277_v0  ;;  %424 = vst [vmem:[#allocation2 + $0x2f0] sm:$0xff] %v6277_v0 }
  0x97   : > { %425 = vst [vmem:[#allocation2 + $0x358] sm:$0xff] %v6277_v0  ;;  %426 = vst [vmem:[#allocation2 + $0x268] sm:$0xff] %v6277_v0 }
  0x98   : > { %427 = vst [vmem:[#allocation2 + $0x350] sm:$0xff] %v6277_v0  ;;  %428 = vst [vmem:[#allocation2 + $0x188] sm:$0xff] %v6277_v0 }
  0x99   : > { %429 = vst [vmem:[#allocation2 + $0x1d8] sm:$0xff] %v6277_v0  ;;  %430 = vst [vmem:[#allocation2 + $0x30] sm:$0xff] %v6277_v0 }
  0x9a   : > { %431 = vst [vmem:[#allocation2 + $0x140] sm:$0xff] %v6277_v0  ;;  %432 = vst [vmem:[#allocation2 + $0x2a8] sm:$0xff] %v6277_v0 }
  0x9b   : > { %433 = vst [vmem:[#allocation2 + $0x130] sm:$0xff] %v6277_v0  ;;  %434 = vst [vmem:[#allocation2 + $0x200] sm:$0xff] %v6277_v0 }
  0x9c   : > { %435 = vst [vmem:[#allocation2 + $0x318] sm:$0xff] %v6277_v0  ;;  %436 = vst [vmem:[#allocation2 + $0x220] sm:$0xff] %v6277_v0 }
  0x9d   : > { %437 = vst [vmem:[#allocation2 + $0x70] sm:$0xff] %v6277_v0  ;;  %438 = vst [vmem:[#allocation2 + $0x300] sm:$0xff] %v6277_v0 }
  0x9e   : > { %439 = vst [vmem:[#allocation2 + $0xe0] sm:$0xff] %v6277_v0  ;;  %440 = vst [vmem:[#allocation2 + $0x178] sm:$0xff] %v6277_v0 }
  0x9f   : > { %441 = vst [vmem:[#allocation2 + $0x328] sm:$0xff] %v6277_v0  ;;  %442 = vst [vmem:[#allocation2 + $0x260] sm:$0xff] %v6277_v0 }
  0xa0   : > { %443 = vst [vmem:[#allocation2 + $0x3b8] sm:$0xff] %v6277_v0  ;;  %444 = vst [vmem:[#allocation2 + $0x2b8] sm:$0xff] %v6277_v0 }
  0xa1   : > { %445 = vst [vmem:[#allocation2 + $0x248] sm:$0xff] %v6277_v0  ;;  %446 = vst [vmem:[#allocation2 + $0x40] sm:$0xff] %v6277_v0 }
  0xa2   : > { %447 = vst [vmem:[#allocation2 + $0x20] sm:$0xff] %v6277_v0  ;;  %448 = vst [vmem:[#allocation2 + $0xe8] sm:$0xff] %v6277_v0 }
  0xa3   : > { %449 = vst [vmem:[#allocation2 + $0x288] sm:$0xff] %v6277_v0  ;;  %450 = vst [vmem:[#allocation2 + $0x3a8] sm:$0xff] %v6277_v0 }
  0xa4   : > { %451 = vst [vmem:[#allocation2 + $0x3c8] sm:$0xff] %v6277_v0  ;;  %452 = vst [vmem:[#allocation2 + $0x160] sm:$0xff] %v6277_v0 }
  0xa5   : > { %453 = vst [vmem:[#allocation2 + $0x2c8] sm:$0xff] %v6277_v0  ;;  %454 = vst [vmem:[#allocation2 + $0x210] sm:$0xff] %v6277_v0 }
  0xa6   : > { %455 = vst [vmem:[#allocation2 + $0x3d8] sm:$0xff] %v6277_v0  ;;  %456 = vst [vmem:[#allocation2 + $0x1e8] sm:$0xff] %v6277_v0 }
  0xa7   : > { %457 = vst [vmem:[#allocation2 + $0x1b0] sm:$0xff] %v6277_v0  ;;  %458 = vst [vmem:[#allocation2 + $0x1c8] sm:$0xff] %v6277_v0 }
  0xa8   : > { %459 = vst [vmem:[#allocation2 + $0x2d0] sm:$0xff] %v6277_v0  ;;  %460 = vst [vmem:[#allocation2 + $0x1d0] sm:$0xff] %v6277_v0 }
  0xa9   : > { %461 = vst [vmem:[#allocation2 + $0x58] sm:$0xff] %v6277_v0  ;;  %462 = vst [vmem:[#allocation2 + $0x120] sm:$0xff] %v6277_v0 }
  0xaa   : > { %463 = vst [vmem:[#allocation2 + $0x198] sm:$0xff] %v6277_v0  ;;  %464 = vst [vmem:[#allocation2 + $0x2e8] sm:$0xff] %v6277_v0 }
  0xab   : > { %465 = vst [vmem:[#allocation2 + $0x1f8] sm:$0xff] %v6277_v0  ;;  %466 = vst [vmem:[#allocation2 + $0x238] sm:$0xff] %v6277_v0 }
  0xac   : > { %467 = vst [vmem:[#allocation2 + $0x398] sm:$0xff] %v6277_v0  ;;  %468 = vst [vmem:[#allocation2 + $0x390] sm:$0xff] %v6277_v0 }
  0xad   : > { %469 = vst [vmem:[#allocation2 + $0x1a0] sm:$0xff] %v6277_v0  ;;  %470 = vst [vmem:[#allocation2 + $0xa8] sm:$0xff] %v6277_v0 }
  0xae   : > { %471 = vst [vmem:[#allocation2 + $0x258] sm:$0xff] %v6277_v0  ;;  %472 = vst [vmem:[#allocation2 + $0x2d8] sm:$0xff] %v6277_v0 }
  0xaf   : > { %473 = vst [vmem:[#allocation2 + $0xf0] sm:$0xff] %v6277_v0  ;;  %474 = vst [vmem:[#allocation2 + $0x180] sm:$0xff] %v6277_v0 }
  0xb0   : > { %475 = vst [vmem:[#allocation2 + $0x170] sm:$0xff] %v6277_v0  ;;  %476 = vst [vmem:[#allocation2 + $0x3d0] sm:$0xff] %v6277_v0 }
  0xb1   : > { %477 = vst [vmem:[#allocation2 + $0x250] sm:$0xff] %v6277_v0  ;;  %478 = vst [vmem:[#allocation2 + $0x378] sm:$0xff] %v6277_v0 }
  0xb2   : > { %479 = vst [vmem:[#allocation2 + $0xb8] sm:$0xff] %v6277_v0  ;;  %480 = vst [vmem:[#allocation2 + $0x38] sm:$0xff] %v6277_v0 }
  0xb3   : > { %481 = vst [vmem:[#allocation2 + $0x78] sm:$0xff] %v6277_v0  ;;  %482 = vst [vmem:[#allocation2 + $0x308] sm:$0xff] %v6277_v0 }
  0xb4   : > { %483 = vst [vmem:[#allocation2 + $0x370] sm:$0xff] %v6277_v0  ;;  %484 = vst [vmem:[#allocation2 + $0xc8] sm:$0xff] %v6277_v0 }
  0xb5   : > { %485 = vst [vmem:[#allocation2 + $0x278] sm:$0xff] %v6277_v0  ;;  %486 = vst [vmem:[#allocation2 + $0x360] sm:$0xff] %v6277_v0 }
  0xb6   : > { %487 = vst [vmem:[#allocation2 + $0x228] sm:$0xff] %v6277_v0  ;;  %488 = vst [vmem:[#allocation2 + $0x348] sm:$0xff] %v6277_v0 }
  0xb7   : > { %489 = vst [vmem:[#allocation2 + $0x148] sm:$0xff] %v6277_v0  ;;  %490 = vst [vmem:[#allocation2 + $0xf8] sm:$0xff] %v6277_v0 }
  0xb8   : > { %491 = vst [vmem:[#allocation2 + $0x68] sm:$0xff] %v6277_v0  ;;  %492 = vst [vmem:[#allocation2] sm:$0xff] %v6277_v0 }
  0xb9   : > { %493 = vst [vmem:[#allocation2 + $0x298] sm:$0xff] %v6277_v0  ;;  %494 = vst [vmem:[#allocation2 + $0x270] sm:$0xff] %v6277_v0 }
  0xba   : > { %495 = vst [vmem:[#allocation2 + $0x310] sm:$0xff] %v6277_v0  ;;  %496 = vst [vmem:[#allocation2 + $0x190] sm:$0xff] %v6277_v0 }
  0xbb PF: > { %v5559_v1 = vld [vmem:[%s6467_s11 + $0xe4] ss:$16 sps:$4 sm:$0xff]   ;;  %v5563_v3 = vld [vmem:[%s6467_s11 + $0xe0] ss:$16 sps:$4 sm:$0xff]   ;;  %v5660_v52 = vld [vmem:[#allocation3 + $0xc] ss:$16 sps:$4 sm:$0xff]  }
  0xbc   : > { %v5561_v2 = vld [vmem:[%s6467_s11 + $0x2e4] ss:$16 sps:$4 sm:$0xff]   ;;  %1671 = vmatprep.subr.bf16.mxu0 %v5559_v1  ;;  %v5564_v4 = vld [vmem:[%s6467_s11 + $0x2e0] ss:$16 sps:$4 sm:$0xff]   ;;  %1896 = vmatprep.mubr.bf16.mxu1 %v5660_v52  ;;  %v5748_v52 = vld [vmem:[%s6467_s11 + $0x208] ss:$16 sps:$4 sm:$0xff]  }
  0xbd   : > { %1864 = vmatprep.subr.bf16.mxu1 %v5561_v2  ;;  %v5565_v5 = vld [vmem:[%s6467_s11 + $0xc4] ss:$16 sps:$4 sm:$0xff]   ;;  %1672 = vmatpush1.bf16.msra.mxu0 %v5563_v3  ;;  %v5569_v7 = vld [vmem:[%s6467_s11 + $0xc0] ss:$16 sps:$4 sm:$0xff]   ;;  %v5663_v3 = vld [vmem:[%s6467_s11 + $0xec] ss:$16 sps:$4 sm:$0xff]  }
  0xbe   : > { %1865 = vmatpush1.bf16.msra.mxu1 %v5564_v4  ;;  %v5567_v6 = vld [vmem:[%s6467_s11 + $0x2c4] ss:$16 sps:$4 sm:$0xff]   ;;  %1673 = vmatprep.subr.bf16.mxu0 %v5565_v5  ;;  %v5570_v8 = vld [vmem:[%s6467_s11 + $0x2c0] ss:$16 sps:$4 sm:$0xff]   ;;  %v5666_v4 = vld [vmem:[%s6467_s11 + $0x2ec] ss:$16 sps:$4 sm:$0xff]  }
  0xbf   : > { %1866 = vmatprep.subr.bf16.mxu1 %v5567_v6  ;;  %v5571_v9 = vld [vmem:[%s6467_s11 + $0xa4] ss:$16 sps:$4 sm:$0xff]   ;;  %v5575_v11 = vld [vmem:[%s6467_s11 + $0xa0] ss:$16 sps:$4 sm:$0xff]   ;;  %v6683_v6 = vld [vmem:[#allocation3 + $0x8] ss:$16 sps:$4 sm:$0xff]  }
  0xc0   : > { %v5573_v10 = vld [vmem:[%s6467_s11 + $0x2a4] ss:$16 sps:$4 sm:$0xff]   ;;  %v5576_v12 = vld [vmem:[%s6467_s11 + $0x2a0] ss:$16 sps:$4 sm:$0xff]   ;;  %p5451_p6 = scmp.ne.s32.totalorder %s6259_s21, 3 }
  0xc1   : > { %1674 = vmatpush1.bf16.msra.mxu0 %v5569_v7  ;;  %v5577_v13 = vld [vmem:[%s6467_s11 + $0x84] ss:$16 sps:$4 sm:$0xff]   ;;  %v5581_v15 = vld [vmem:[%s6467_s11 + $0x80] ss:$16 sps:$4 sm:$0xff]   ;;  %v5661_v7 = vld [vmem:[%s6467_s11 + $0xe8] ss:$16 sps:$4 sm:$0xff]  }
  0xc2   : > { %1867 = vmatpush1.bf16.msra.mxu1 %v5570_v8  ;;  %1675 = vmatprep.subr.bf16.mxu0 %v5571_v9  ;;  %v5579_v14 = vld [vmem:[%s6467_s11 + $0x284] ss:$16 sps:$4 sm:$0xff]   ;;  %v5582_v16 = vld [vmem:[%s6467_s11 + $0x280] ss:$16 sps:$4 sm:$0xff]   ;;  %v5664_v8 = vld [vmem:[%s6467_s11 + $0x2e8] ss:$16 sps:$4 sm:$0xff]  }
  0xc3   : > { %1868 = vmatprep.subr.bf16.mxu1 %v5573_v10  ;;  %v5583_v17 = vld [vmem:[%s6467_s11 + $0x64] ss:$16 sps:$4 sm:$0xff]   ;;  %v5587_v19 = vld [vmem:[%s6467_s11 + $0x60] ss:$16 sps:$4 sm:$0xff]   ;;  %v6689_v10 = vld [vmem:[#allocation3 + $0x2c] ss:$16 sps:$4 sm:$0xff]  }
  0xc4   : > { %v5585_v18 = vld [vmem:[%s6467_s11 + $0x264] ss:$16 sps:$4 sm:$0xff]   ;;  %v5588_v20 = vld [vmem:[%s6467_s11 + $0x260] ss:$16 sps:$4 sm:$0xff]  }
  0xc5   : > { %1676 = vmatpush1.bf16.msra.mxu0 %v5575_v11  ;;  %v5589_v21 = vld [vmem:[%s6467_s11 + $0x44] ss:$16 sps:$4 sm:$0xff]   ;;  %v5593_v23 = vld [vmem:[%s6467_s11 + $0x40] ss:$16 sps:$4 sm:$0xff]   ;;  %v5675_v11 = vld [vmem:[%s6467_s11 + $0xcc] ss:$16 sps:$4 sm:$0xff]  }
  0xc6   : > { %1869 = vmatpush1.bf16.msra.mxu1 %v5576_v12  ;;  %1677 = vmatprep.subr.bf16.mxu0 %v5577_v13  ;;  %v5591_v22 = vld [vmem:[%s6467_s11 + $0x244] ss:$16 sps:$4 sm:$0xff]   ;;  %v5594_v24 = vld [vmem:[%s6467_s11 + $0x240] ss:$16 sps:$4 sm:$0xff]   ;;  %v5678_v12 = vld [vmem:[%s6467_s11 + $0x2cc] ss:$16 sps:$4 sm:$0xff]  }
  0xc7   : > { %1870 = vmatprep.subr.bf16.mxu1 %v5579_v14  ;;  %v5595_v25 = vld [vmem:[%s6467_s11 + $0x24] ss:$16 sps:$4 sm:$0xff]   ;;  %v5599_v27 = vld [vmem:[%s6467_s11 + $0x20] ss:$16 sps:$4 sm:$0xff]   ;;  %v5673_v13 = vld [vmem:[%s6467_s11 + $0xc8] ss:$16 sps:$4 sm:$0xff]  }
  0xc8   : > { %v5597_v26 = vld [vmem:[%s6467_s11 + $0x224] ss:$16 sps:$4 sm:$0xff]   ;;  %v5600_v28 = vld [vmem:[%s6467_s11 + $0x220] ss:$16 sps:$4 sm:$0xff]   ;;  %v5676_v14 = vld [vmem:[%s6467_s11 + $0x2c8] ss:$16 sps:$4 sm:$0xff]  }
  0xc9   : > { %1678 = vmatpush1.bf16.msra.mxu0 %v5581_v15  ;;  %v5601_v29 = vld [vmem:[%s6467_s11 + $0x4] ss:$16 sps:$4 sm:$0xff]   ;;  %v5605_v31 = vld [vmem:[%s6467_s11] ss:$16 sps:$4 sm:$0xff]   ;;  %v5687_v15 = vld [vmem:[%s6467_s11 + $0xac] ss:$16 sps:$4 sm:$0xff]  }
  0xca   : > { %1871 = vmatpush1.bf16.msra.mxu1 %v5582_v16  ;;  %1679 = vmatprep.subr.bf16.mxu0 %v5583_v17  ;;  %v5603_v30 = vld [vmem:[%s6467_s11 + $0x204] ss:$16 sps:$4 sm:$0xff]   ;;  %v5606_v32 = vld [vmem:[%s6467_s11 + $0x200] ss:$16 sps:$4 sm:$0xff]   ;;  %v5690_v16 = vld [vmem:[%s6467_s11 + $0x2ac] ss:$16 sps:$4 sm:$0xff]  }
  0xcb   : > { %1872 = vmatprep.subr.bf16.mxu1 %v5585_v18  ;;  %v5607_v33 = vld [vmem:[%s6467_s11 + $0x1e4] ss:$16 sps:$4 sm:$0xff]   ;;  %v5611_v35 = vld [vmem:[%s6467_s11 + $0x1e0] ss:$16 sps:$4 sm:$0xff]   ;;  %v6703_v18 = vld [vmem:[#allocation3 + $0x28] ss:$16 sps:$4 sm:$0xff]  }
  0xcc   : > { %v5609_v34 = vld [vmem:[%s6467_s11 + $0x3e4] ss:$16 sps:$4 sm:$0xff]   ;;  %v5612_v36 = vld [vmem:[%s6467_s11 + $0x3e0] ss:$16 sps:$4 sm:$0xff]  }
  0xcd   : > { %1680 = vmatpush1.bf16.msra.mxu0 %v5587_v19  ;;  %v5613_v37 = vld [vmem:[%s6467_s11 + $0x1c4] ss:$16 sps:$4 sm:$0xff]   ;;  %v5617_v39 = vld [vmem:[%s6467_s11 + $0x1c0] ss:$16 sps:$4 sm:$0xff]  }
  0xce   : > { %1873 = vmatpush1.bf16.msra.mxu1 %v5588_v20  ;;  %1681 = vmatprep.subr.bf16.mxu0 %v5589_v21  ;;  %v5615_v38 = vld [vmem:[%s6467_s11 + $0x3c4] ss:$16 sps:$4 sm:$0xff]   ;;  %v5618_v40 = vld [vmem:[%s6467_s11 + $0x3c0] ss:$16 sps:$4 sm:$0xff]   ;;  %v6707_v20 = vld [vmem:[#allocation3 + $0x4c] ss:$16 sps:$4 sm:$0xff]  }
  0xcf   : > { %1874 = vmatprep.subr.bf16.mxu1 %v5591_v22  ;;  %v5619_v41 = vld [vmem:[%s6467_s11 + $0x1a4] ss:$16 sps:$4 sm:$0xff]   ;;  %v5623_v43 = vld [vmem:[%s6467_s11 + $0x1a0] ss:$16 sps:$4 sm:$0xff]   ;;  %v5685_v21 = vld [vmem:[%s6467_s11 + $0xa8] ss:$16 sps:$4 sm:$0xff]  }
  0xd0   : > { %v5621_v42 = vld [vmem:[%s6467_s11 + $0x3a4] ss:$16 sps:$4 sm:$0xff]   ;;  %v5624_v44 = vld [vmem:[%s6467_s11 + $0x3a0] ss:$16 sps:$4 sm:$0xff]   ;;  %v5688_v22 = vld [vmem:[%s6467_s11 + $0x2a8] ss:$16 sps:$4 sm:$0xff]  }
  0xd1   : > { %1682 = vmatpush1.bf16.msra.mxu0 %v5593_v23  ;;  %v5625_v45 = vld [vmem:[%s6467_s11 + $0x184] ss:$16 sps:$4 sm:$0xff]   ;;  %v5629_v47 = vld [vmem:[%s6467_s11 + $0x180] ss:$16 sps:$4 sm:$0xff]   ;;  %v5699_v23 = vld [vmem:[%s6467_s11 + $0x8c] ss:$16 sps:$4 sm:$0xff]  }
  0xd2   : > { %1875 = vmatpush1.bf16.msra.mxu1 %v5594_v24  ;;  %1683 = vmatprep.subr.bf16.mxu0 %v5595_v25  ;;  %v5627_v46 = vld [vmem:[%s6467_s11 + $0x384] ss:$16 sps:$4 sm:$0xff]   ;;  %v5630_v48 = vld [vmem:[%s6467_s11 + $0x380] ss:$16 sps:$4 sm:$0xff]   ;;  %v5702_v24 = vld [vmem:[%s6467_s11 + $0x28c] ss:$16 sps:$4 sm:$0xff]  }
  0xd3   : > { %1876 = vmatprep.subr.bf16.mxu1 %v5597_v26  ;;  %v5631_v49 = vld [vmem:[%s6467_s11 + $0x164] ss:$16 sps:$4 sm:$0xff]   ;;  %v5635_v53 = vld [vmem:[%s6467_s11 + $0x160] ss:$16 sps:$4 sm:$0xff]   ;;  %v5697_v25 = vld [vmem:[%s6467_s11 + $0x88] ss:$16 sps:$4 sm:$0xff]  }
  0xd4   : > { %v5657_v50 = vld [vmem:[#allocation3 + $0x4] ss:$16 sps:$4 sm:$0xff]   ;;  %v5636_v54 = vld [vmem:[%s6467_s11 + $0x360] ss:$16 sps:$4 sm:$0xff]  }
  0xd5   : > { %1684 = vmatpush1.bf16.msra.mxu0 %v5599_v27  ;;  %v5633_v51 = vld [vmem:[%s6467_s11 + $0x364] ss:$16 sps:$4 sm:$0xff]   ;;  %1703 = vmatprep.mubr.bf16.mxu0 %v5657_v50  ;;  %v5641_v57 = vld [vmem:[%s6467_s11 + $0x140] ss:$16 sps:$4 sm:$0xff]   ;;  %v6720_v27 = vld [vmem:[#allocation3 + $0x48] ss:$16 sps:$4 sm:$0xff]  }
  0xd6   : > { %1877 = vmatpush1.bf16.msra.mxu1 %v5600_v28  ;;  %1685 = vmatprep.subr.bf16.mxu0 %v5601_v29  ;;  %v5637_v55 = vld [vmem:[%s6467_s11 + $0x144] ss:$16 sps:$4 sm:$0xff]   ;;  %v5642_v58 = vld [vmem:[%s6467_s11 + $0x340] ss:$16 sps:$4 sm:$0xff]   ;;  %v5700_v28 = vld [vmem:[%s6467_s11 + $0x288] ss:$16 sps:$4 sm:$0xff]  }
  0xd7   : > { %1878 = vmatprep.subr.bf16.mxu1 %v5603_v30  ;;  %v5639_v56 = vld [vmem:[%s6467_s11 + $0x344] ss:$16 sps:$4 sm:$0xff]   ;;  %v5647_v61 = vld [vmem:[%s6467_s11 + $0x120] ss:$16 sps:$4 sm:$0xff]   ;;  %v5711_v29 = vld [vmem:[%s6467_s11 + $0x6c] ss:$16 sps:$4 sm:$0xff]  }
  0xd8   : > { %v5643_v59 = vld [vmem:[%s6467_s11 + $0x124] ss:$16 sps:$4 sm:$0xff]   ;;  %v5648_v62 = vld [vmem:[%s6467_s11 + $0x320] ss:$16 sps:$4 sm:$0xff]   ;;  %v5714_v30 = vld [vmem:[%s6467_s11 + $0x26c] ss:$16 sps:$4 sm:$0xff]  }
  0xd9   : > { %1686 = vmatpush1.bf16.msra.mxu0 %v5605_v31  ;;  %v5645_v60 = vld [vmem:[%s6467_s11 + $0x324] ss:$16 sps:$4 sm:$0xff]   ;;  %v5653_v1 = vld [vmem:[%s6467_s11 + $0x100] ss:$16 sps:$4 sm:$0xff]  }
  0xda   : > { %1879 = vmatpush1.bf16.msra.mxu1 %v5606_v32  ;;  %1687 = vmatprep.subr.bf16.mxu0 %v5607_v33  ;;  %v5649_v63 = vld [vmem:[%s6467_s11 + $0x104] ss:$16 sps:$4 sm:$0xff]   ;;  %v5654_v2 = vld [vmem:[%s6467_s11 + $0x300] ss:$16 sps:$4 sm:$0xff]   ;;  %v6727_v32 = vld [vmem:[#allocation3 + $0x6c] ss:$16 sps:$4 sm:$0xff]  }
  0xdb   : > { %1880 = vmatprep.subr.bf16.mxu1 %v5609_v34  ;;  %v5651_v0 = vld [vmem:[%s6467_s11 + $0x304] ss:$16 sps:$4 sm:$0xff]   ;;  %v6681_v5 = vld [vmem:[#allocation3] ss:$16 sps:$4 sm:$0xff]   ;;  %v5709_v33 = vld [vmem:[%s6467_s11 + $0x68] ss:$16 sps:$4 sm:$0xff]  }
  0xdc   : > { %v6687_v9 = vld [vmem:[#allocation3 + $0x24] ss:$16 sps:$4 sm:$0xff]   ;;  %v6701_v17 = vld [vmem:[#allocation3 + $0x20] ss:$16 sps:$4 sm:$0xff]   ;;  %v5712_v34 = vld [vmem:[%s6467_s11 + $0x268] ss:$16 sps:$4 sm:$0xff]  }
  0xdd   : > { %1688 = vmatpush2.bf16.msra.mxu0 %v5611_v35  ;;  %v6705_v19 = vld [vmem:[#allocation3 + $0x44] ss:$16 sps:$4 sm:$0xff]   ;;  %v6718_v26 = vld [vmem:[#allocation3 + $0x40] ss:$16 sps:$4 sm:$0xff]   ;;  %v5723_v35 = vld [vmem:[%s6467_s11 + $0x4c] ss:$16 sps:$4 sm:$0xff]  }
  0xde   : > { %1881 = vmatpush2.bf16.msra.mxu1 %v5612_v36  ;;  %1689 = vmatprep.subr.bf16.mxu0 %v5613_v37  ;;  %v6725_v31 = vld [vmem:[#allocation3 + $0x64] ss:$16 sps:$4 sm:$0xff]   ;;  %v5726_v36 = vld [vmem:[%s6467_s11 + $0x24c] ss:$16 sps:$4 sm:$0xff]   ;;  %v5721_v37 = vld [vmem:[%s6467_s11 + $0x48] ss:$16 sps:$4 sm:$0xff]  }
  0xdf   : > { %1882 = vmatprep.subr.bf16.mxu1 %v5615_v38  ;;  %v5724_v38 = vld [vmem:[%s6467_s11 + $0x248] ss:$16 sps:$4 sm:$0xff]   ;;  %v6758_v50 = vld [vmem:[#allocation3 + $0x80] ss:$16 sps:$4 sm:$0xff]  }
  0xe1   : > { %1690 = vmatpush2.bf16.msra.mxu0 %v5617_v39  ;;  %v6739_v39 = vld [vmem:[#allocation3 + $0x60] ss:$16 sps:$4 sm:$0xff]  }
  0xe2   : > { %1883 = vmatpush2.bf16.msra.mxu1 %v5618_v40  ;;  %1691 = vmatprep.subr.bf16.mxu0 %v5619_v41  ;;  %v5735_v40 = vld [vmem:[%s6467_s11 + $0x2c] ss:$16 sps:$4 sm:$0xff]  }
  0xe3   : > { %1884 = vmatprep.subr.bf16.mxu1 %v5621_v42  ;;  %v5738_v41 = vld [vmem:[%s6467_s11 + $0x22c] ss:$16 sps:$4 sm:$0xff]   ;;  %v6743_v42 = vld [vmem:[#allocation3 + $0x68] ss:$16 sps:$4 sm:$0xff]  }
  0xe5   : > { %1692 = vmatpush2.bf16.msra.mxu0 %v5623_v43  ;;  %v6745_v43 = vld [vmem:[#allocation3 + $0x84] ss:$16 sps:$4 sm:$0xff]  }
  0xe6   : > { %1885 = vmatpush2.bf16.msra.mxu1 %v5624_v44  ;;  %1693 = vmatprep.subr.bf16.mxu0 %v5625_v45  ;;  %v6747_v44 = vld [vmem:[#allocation3 + $0x8c] ss:$16 sps:$4 sm:$0xff]   ;;  %v5733_v45 = vld [vmem:[%s6467_s11 + $0x28] ss:$16 sps:$4 sm:$0xff]  }
  0xe7   : > { %1886 = vmatprep.subr.bf16.mxu1 %v5627_v46  ;;  %v5736_v46 = vld [vmem:[%s6467_s11 + $0x228] ss:$16 sps:$4 sm:$0xff]  }
  0xe9   : > { %1694 = vmatpush2.bf16.msra.mxu0 %v5629_v47  ;;  %v5747_v47 = vld [vmem:[%s6467_s11 + $0xc] ss:$16 sps:$4 sm:$0xff]  }
  0xea   : > { %1887 = vmatpush2.bf16.msra.mxu1 %v5630_v48  ;;  %1695 = vmatprep.subr.bf16.mxu0 %v5631_v49  ;;  %v5750_v48 = vld [vmem:[%s6467_s11 + $0x20c] ss:$16 sps:$4 sm:$0xff]   ;;  %v5745_v49 = vld [vmem:[%s6467_s11 + $0x8] ss:$16 sps:$4 sm:$0xff]  }
  0xeb   : > { %1888 = vmatprep.subr.bf16.mxu1 %v5633_v51  ;;  %v6760_v51 = vld [vmem:[#allocation3 + $0x88] ss:$16 sps:$4 sm:$0xff]  }
  0xed   : > { %1696 = vmatpush2.bf16.msra.mxu0 %v5635_v53  ;;  %v5759_v53 = vld [vmem:[%s6467_s11 + $0x1ec] ss:$16 sps:$4 sm:$0xff]  }
  0xee   : > { %1889 = vmatpush2.bf16.msra.mxu1 %v5636_v54  ;;  %1697 = vmatprep.subr.bf16.mxu0 %v5637_v55  ;;  %v5762_v54 = vld [vmem:[%s6467_s11 + $0x3ec] ss:$16 sps:$4 sm:$0xff]   ;;  %v6765_v55 = vld [vmem:[#allocation3 + $0xa4] ss:$16 sps:$4 sm:$0xff]  }
  0xef   : > { %1890 = vmatprep.subr.bf16.mxu1 %v5639_v56  ;;  %v6767_v56 = vld [vmem:[#allocation3 + $0xac] ss:$16 sps:$4 sm:$0xff]  }
  0xf1   : > { %1698 = vmatpush2.bf16.msra.mxu0 %v5641_v57  ;;  %v5757_v57 = vld [vmem:[%s6467_s11 + $0x1e8] ss:$16 sps:$4 sm:$0xff]  }
  0xf2   : > { %1891 = vmatpush2.bf16.msra.mxu1 %v5642_v58  ;;  %1699 = vmatprep.subr.bf16.mxu0 %v5643_v59  ;;  %v5760_v58 = vld [vmem:[%s6467_s11 + $0x3e8] ss:$16 sps:$4 sm:$0xff]   ;;  %v5771_v59 = vld [vmem:[%s6467_s11 + $0x1cc] ss:$16 sps:$4 sm:$0xff]  }
  0xf3   : > { %1892 = vmatprep.subr.bf16.mxu1 %v5645_v60  ;;  %v5774_v60 = vld [vmem:[%s6467_s11 + $0x3cc] ss:$16 sps:$4 sm:$0xff]  }
  0xf5   : > { %1700 = vmatpush2.bf16.msra.mxu0 %v5647_v61  ;;  %v5769_v61 = vld [vmem:[%s6467_s11 + $0x1c8] ss:$16 sps:$4 sm:$0xff]  }
  0xf6   : > { %1893 = vmatpush2.bf16.msra.mxu1 %v5648_v62  ;;  %1701 = vmatprep.subr.bf16.mxu0 %v5649_v63  ;;  %v5772_v62 = vld [vmem:[%s6467_s11 + $0x3c8] ss:$16 sps:$4 sm:$0xff]   ;;  %v6779_v63 = vld [vmem:[#allocation3 + $0xa0] ss:$16 sps:$4 sm:$0xff]  }
  0xf7   : > { %1894 = vmatprep.subr.bf16.mxu1 %v5651_v0  ;;  %v5783_v0 = vld [vmem:[%s6467_s11 + $0x1ac] ss:$16 sps:$4 sm:$0xff]  }
  0xf9   : > { %1702 = vmatpush2.bf16.msra.mxu0 %v5653_v1  ;;  %v5786_v1 = vld [vmem:[%s6467_s11 + $0x3ac] ss:$16 sps:$4 sm:$0xff]  }
  0xfa   : > { %1895 = vmatpush2.bf16.msra.mxu1 %v5654_v2  ;;  %2057 = vmatprep.subr.bf16.mxu0 %v5663_v3  ;;  %v6783_v2 = vld [vmem:[#allocation3 + $0xa8] ss:$16 sps:$4 sm:$0xff]   ;;  %v6785_v3 = vld [vmem:[#allocation3 + $0xc4] ss:$16 sps:$4 sm:$0xff]  }
  0xfb   : > { %2250 = vmatprep.subr.bf16.mxu1 %v5666_v4  ;;  %v6787_v4 = vld [vmem:[#allocation3 + $0xcc] ss:$16 sps:$4 sm:$0xff]  }
  0xfc   : > { %1704 = vmatmul.mubr.bf16.vlgmr.msra.gmra.mxu0 %v6681_v5 }
  0xfd   : > { %1897 = vmatmul.mubr.bf16.vlgmr.msra.gmra.mxu1 %v6683_v6  ;;  %2058 = vmatpush1.bf16.msra.mxu0 %v5661_v7  ;;  %v5781_v7 = vld [vmem:[%s6467_s11 + $0x1a8] ss:$16 sps:$4 sm:$0xff]  }
  0xfe   : > { %2251 = vmatpush1.bf16.msra.mxu1 %v5664_v8  ;;  %1713 = vmatprep.mubr.bf16.mxu0 %v6687_v9  ;;  %v5784_v8 = vld [vmem:[%s6467_s11 + $0x3a8] ss:$16 sps:$4 sm:$0xff]  }
  0xff   : > { %1906 = vmatprep.mubr.bf16.mxu1 %v6689_v10  ;;  %2059 = vmatprep.subr.bf16.mxu0 %v5675_v11  ;;  %v5795_v11 = vld [vmem:[%s6467_s11 + $0x18c] ss:$16 sps:$4 sm:$0xff]  }
 0x100   : > { %2252 = vmatprep.subr.bf16.mxu1 %v5678_v12  ;;  %v5798_v12 = vld [vmem:[%s6467_s11 + $0x38c] ss:$16 sps:$4 sm:$0xff]  }
 0x101   : > { %2060 = vmatpush1.bf16.msra.mxu0 %v5673_v13  ;;  %v5793_v13 = vld [vmem:[%s6467_s11 + $0x188] ss:$16 sps:$4 sm:$0xff]  }
 0x102   : > { %2253 = vmatpush1.bf16.msra.mxu1 %v5676_v14  ;;  %2061 = vmatprep.subr.bf16.mxu0 %v5687_v15  ;;  %v6798_v14 = vld [vmem:[#allocation3 + $0xc0] ss:$16 sps:$4 sm:$0xff]   ;;  %v6800_v15 = vld [vmem:[#allocation3 + $0xc8] ss:$16 sps:$4 sm:$0xff]  }
 0x103   : > { %2254 = vmatprep.subr.bf16.mxu1 %v5690_v16  ;;  %v5796_v16 = vld [vmem:[%s6467_s11 + $0x388] ss:$16 sps:$4 sm:$0xff]  }
 0x104   : > { %1714 = vmatmul.mubr.bf16.gmra.mxu0 %v6701_v17 }
 0x105   : > { %1907 = vmatmul.mubr.bf16.gmra.mxu1 %v6703_v18  ;;  %1723 = vmatprep.mubr.bf16.mxu0 %v6705_v19 }
 0x106   : > { %1916 = vmatprep.mubr.bf16.mxu1 %v6707_v20  ;;  %2062 = vmatpush1.bf16.msra.mxu0 %v5685_v21  ;;  %v6803_v21 = vld [vmem:[#allocation3 + $0xe4] ss:$16 sps:$4 sm:$0xff]  }
 0x107   : > { %2255 = vmatpush1.bf16.msra.mxu1 %v5688_v22  ;;  %2063 = vmatprep.subr.bf16.mxu0 %v5699_v23  ;;  %v5807_v22 = vld [vmem:[%s6467_s11 + $0x16c] ss:$16 sps:$4 sm:$0xff]  }
 0x108   : > { %2256 = vmatprep.subr.bf16.mxu1 %v5702_v24  ;;  %v6806_v23 = vld [vmem:[#allocation3 + $0xec] ss:$16 sps:$4 sm:$0xff]  }
 0x109   : > { %v5810_v24 = vld [vmem:[%s6467_s11 + $0x36c] ss:$16 sps:$4 sm:$0xff]  }
 0x10a   : > { %2064 = vmatpush1.bf16.msra.mxu0 %v5697_v25  ;;  %v5805_v25 = vld [vmem:[%s6467_s11 + $0x168] ss:$16 sps:$4 sm:$0xff]  }
 0x10b   : > { %2257 = vmatpush1.bf16.msra.mxu1 %v5700_v28  ;;  %2065 = vmatprep.subr.bf16.mxu0 %v5711_v29  ;;  %v5808_v28 = vld [vmem:[%s6467_s11 + $0x368] ss:$16 sps:$4 sm:$0xff]  }
 0x10c   : > { %2258 = vmatprep.subr.bf16.mxu1 %v5714_v30  ;;  %1724 = vmatmul.mubr.bf16.gmra.mxu0 %v6718_v26  ;;  %v5817_v29 = vld [vmem:[%s6467_s11 + $0x148] ss:$16 sps:$4 sm:$0xff]   ;;  %v5819_v30 = vld [vmem:[%s6467_s11 + $0x14c] ss:$16 sps:$4 sm:$0xff]  }
 0x10d   : > { %1917 = vmatmul.mubr.bf16.gmra.mxu1 %v6720_v27  ;;  %1733 = vmatprep.mubr.bf16.mxu0 %v6725_v31 }
 0x10e   : > { %1926 = vmatprep.mubr.bf16.mxu1 %v6727_v32  ;;  %2066 = vmatpush1.bf16.msra.mxu0 %v5709_v33  ;;  %v5820_v33 = vld [vmem:[%s6467_s11 + $0x348] ss:$16 sps:$4 sm:$0xff]  }
 0x10f   : > { %2259 = vmatpush1.bf16.msra.mxu1 %v5712_v34  ;;  %2067 = vmatprep.subr.bf16.mxu0 %v5723_v35  ;;  %v5822_v34 = vld [vmem:[%s6467_s11 + $0x34c] ss:$16 sps:$4 sm:$0xff]   ;;  %v6819_v35 = vld [vmem:[#allocation3 + $0xe0] ss:$16 sps:$4 sm:$0xff]  }
 0x110   : > { %2260 = vmatprep.subr.bf16.mxu1 %v5726_v36  ;;  %v6821_v36 = vld [vmem:[#allocation3 + $0xe8] ss:$16 sps:$4 sm:$0xff]  }
 0x112   : > { %2068 = vmatpush1.bf16.msra.mxu0 %v5721_v37  ;;  %v6823_v37 = vld [vmem:[#allocation3 + $0x104] ss:$16 sps:$4 sm:$0xff]  }
 0x113   : > { %2261 = vmatpush1.bf16.msra.mxu1 %v5724_v38  ;;  %2069 = vmatprep.subr.bf16.mxu0 %v5735_v40  ;;  %v6825_v38 = vld [vmem:[#allocation3 + $0x10c] ss:$16 sps:$4 sm:$0xff]   ;;  %v5829_v40 = vld [vmem:[%s6467_s11 + $0x128] ss:$16 sps:$4 sm:$0xff]  }
 0x114   : > { %2262 = vmatprep.subr.bf16.mxu1 %v5738_v41  ;;  %1734 = vmatmul.mubr.bf16.gmra.mxu0 %v6739_v39  ;;  %v5831_v41 = vld [vmem:[%s6467_s11 + $0x12c] ss:$16 sps:$4 sm:$0xff]  }
 0x115   : > { %1927 = vmatmul.mubr.bf16.gmra.mxu1 %v6743_v42  ;;  %1743 = vmatprep.mubr.bf16.mxu0 %v6745_v43 }
 0x116   : > { %1936 = vmatprep.mubr.bf16.mxu1 %v6747_v44  ;;  %2070 = vmatpush1.bf16.msra.mxu0 %v5733_v45  ;;  %v5832_v45 = vld [vmem:[%s6467_s11 + $0x328] ss:$16 sps:$4 sm:$0xff]  }
 0x117   : > { %2263 = vmatpush1.bf16.msra.mxu1 %v5736_v46  ;;  %2071 = vmatprep.subr.bf16.mxu0 %v5747_v47  ;;  %v5834_v46 = vld [vmem:[%s6467_s11 + $0x32c] ss:$16 sps:$4 sm:$0xff]   ;;  %v6835_v47 = vld [vmem:[#allocation3 + $0x100] ss:$16 sps:$4 sm:$0xff]  }
 0x118   : > { %2264 = vmatprep.subr.bf16.mxu1 %v5750_v48  ;;  %v6837_v48 = vld [vmem:[#allocation3 + $0x108] ss:$16 sps:$4 sm:$0xff]  }
 0x11a   : > { %2072 = vmatpush1.bf16.msra.mxu0 %v5745_v49  ;;  %v6839_v49 = vld [vmem:[#allocation3 + $0x124] ss:$16 sps:$4 sm:$0xff]  }
 0x11b   : > { %2265 = vmatpush1.bf16.msra.mxu1 %v5748_v52  ;;  %2073 = vmatprep.subr.bf16.mxu0 %v5759_v53  ;;  %v5841_v52 = vld [vmem:[%s6467_s11 + $0x108] ss:$16 sps:$4 sm:$0xff]   ;;  %v5843_v53 = vld [vmem:[%s6467_s11 + $0x10c] ss:$16 sps:$4 sm:$0xff]  }
 0x11c   : > { %2266 = vmatprep.subr.bf16.mxu1 %v5762_v54  ;;  %1744 = vmatmul.mubr.bf16.gmra.mxu0 %v6758_v50  ;;  %v5844_v54 = vld [vmem:[%s6467_s11 + $0x308] ss:$16 sps:$4 sm:$0xff]  }
 0x11d   : > { %1937 = vmatmul.mubr.bf16.gmra.mxu1 %v6760_v51  ;;  %1753 = vmatprep.mubr.bf16.mxu0 %v6765_v55 }
 0x11e   : > { %1946 = vmatprep.mubr.bf16.mxu1 %v6767_v56  ;;  %2074 = vmatpush2.bf16.msra.mxu0 %v5757_v57  ;;  %v5846_v57 = vld [vmem:[%s6467_s11 + $0x30c] ss:$16 sps:$4 sm:$0xff]  }
 0x11f   : > { %2267 = vmatpush2.bf16.msra.mxu1 %v5760_v58  ;;  %2075 = vmatprep.subr.bf16.mxu0 %v5771_v59  ;;  %v6845_v58 = vld [vmem:[#allocation3 + $0x12c] ss:$16 sps:$4 sm:$0xff]  }
 0x120   : > { %2268 = vmatprep.subr.bf16.mxu1 %v5774_v60  ;;  %v5849_v59 = vld [vmem:[%s6476_s9 + $0xe4] ss:$16 sps:$4 sm:$0xff]   ;;  %v6852_v60 = vld [vmem:[#allocation3 + $0x120] ss:$16 sps:$4 sm:$0xff]  }
 0x122   : > { %2076 = vmatpush2.bf16.msra.mxu0 %v5769_v61  ;;  %v6854_v61 = vld [vmem:[#allocation3 + $0x128] ss:$16 sps:$4 sm:$0xff]  }
 0x123   : > { %2269 = vmatpush2.bf16.msra.mxu1 %v5772_v62  ;;  %2077 = vmatprep.subr.bf16.mxu0 %v5783_v0  ;;  %v6856_v62 = vld [vmem:[#allocation3 + $0x144] ss:$16 sps:$4 sm:$0xff]   ;;  %v6858_v0 = vld [vmem:[#allocation3 + $0x14c] ss:$16 sps:$4 sm:$0xff]  }
 0x124   : > { %2270 = vmatprep.subr.bf16.mxu1 %v5786_v1  ;;  %1754 = vmatmul.mubr.bf16.gmra.mxu0 %v6779_v63  ;;  %v6864_v1 = vld [vmem:[#allocation3 + $0x140] ss:$16 sps:$4 sm:$0xff]  }
 0x125   : > { %1947 = vmatmul.mubr.bf16.gmra.mxu1 %v6783_v2  ;;  %1763 = vmatprep.mubr.bf16.mxu0 %v6785_v3 }
 0x126   : > { %1956 = vmatprep.mubr.bf16.mxu1 %v6787_v4  ;;  %2078 = vmatpush2.bf16.msra.mxu0 %v5781_v7  ;;  %v6866_v7 = vld [vmem:[#allocation3 + $0x148] ss:$16 sps:$4 sm:$0xff]  }
 0x127   : > { %2271 = vmatpush2.bf16.msra.mxu1 %v5784_v8  ;;  %2079 = vmatprep.subr.bf16.mxu0 %v5795_v11  ;;  %v6868_v8 = vld [vmem:[#allocation3 + $0x164] ss:$16 sps:$4 sm:$0xff]   ;;  %v6870_v11 = vld [vmem:[#allocation3 + $0x16c] ss:$16 sps:$4 sm:$0xff]  }
 0x128   : > { %2272 = vmatprep.subr.bf16.mxu1 %v5798_v12  ;;  %v6876_v12 = vld [vmem:[#allocation3 + $0x160] ss:$16 sps:$4 sm:$0xff]  }
 0x12a   : > { %2080 = vmatpush2.bf16.msra.mxu0 %v5793_v13  ;;  %v6878_v13 = vld [vmem:[#allocation3 + $0x168] ss:$16 sps:$4 sm:$0xff]  }
 0x12b   : > { %2273 = vmatpush2.bf16.msra.mxu1 %v5796_v16  ;;  %2081 = vmatprep.subr.bf16.mxu0 %v5807_v22  ;;  %v6880_v16 = vld [vmem:[#allocation3 + $0x184] ss:$16 sps:$4 sm:$0xff]   ;;  %v6882_v22 = vld [vmem:[#allocation3 + $0x18c] ss:$16 sps:$4 sm:$0xff]  }
 0x12c   : > { %2274 = vmatprep.subr.bf16.mxu1 %v5810_v24  ;;  %1764 = vmatmul.mubr.bf16.gmra.mxu0 %v6798_v14  ;;  %v5864_v24 = vld [vmem:[%s6476_s9 + $0x2e4] ss:$16 sps:$4 sm:$0xff]  }
 0x12d   : > { %1957 = vmatmul.mubr.bf16.gmra.mxu1 %v6800_v15  ;;  %1773 = vmatprep.mubr.bf16.mxu0 %v6803_v21 }
 0x12e   : > { %1966 = vmatprep.mubr.bf16.mxu1 %v6806_v23  ;;  %2082 = vmatpush2.bf16.msra.mxu0 %v5805_v25  ;;  %v6889_v25 = vld [vmem:[#allocation3 + $0x180] ss:$16 sps:$4 sm:$0xff]  }
 0x12f   : > { %2275 = vmatpush2.bf16.msra.mxu1 %v5808_v28  ;;  %2083 = vmatprep.subr.bf16.mxu0 %v5819_v30  ;;  %v6891_v28 = vld [vmem:[#allocation3 + $0x188] ss:$16 sps:$4 sm:$0xff]   ;;  %v6895_v30 = vld [vmem:[#allocation3 + $0x1ac] ss:$16 sps:$4 sm:$0xff]  }
 0x130   : > { %2276 = vmatprep.subr.bf16.mxu1 %v5822_v34  ;;  %v6903_v34 = vld [vmem:[#allocation3 + $0x1a8] ss:$16 sps:$4 sm:$0xff]  }
 0x132   : > { %2084 = vmatpush2.bf16.msra.mxu0 %v5817_v29  ;;  %v6893_v29 = vld [vmem:[#allocation3 + $0x1a4] ss:$16 sps:$4 sm:$0xff]  }
 0x133   : > { %2277 = vmatpush2.bf16.msra.mxu1 %v5820_v33  ;;  %2085 = vmatprep.subr.bf16.mxu0 %v5831_v41  ;;  %v6901_v33 = vld [vmem:[#allocation3 + $0x1a0] ss:$16 sps:$4 sm:$0xff]   ;;  %v6907_v41 = vld [vmem:[#allocation3 + $0x1cc] ss:$16 sps:$4 sm:$0xff]  }
 0x134   : > { %1774 = vmatmul.mubr.bf16.gmra.mxu0 %v6819_v35  ;;  %2278 = vmatprep.subr.bf16.mxu1 %v5834_v46  ;;  %v6915_v46 = vld [vmem:[#allocation3 + $0x1c8] ss:$16 sps:$4 sm:$0xff]  }
 0x135   : > { %1967 = vmatmul.mubr.bf16.gmra.mxu1 %v6821_v36  ;;  %1783 = vmatprep.mubr.bf16.mxu0 %v6823_v37  ;;  %8501 = vst [vmem:[#allocation20_spill] sm:$0xff] %v6915_v46 }
 0x136   : > { %1976 = vmatprep.mubr.bf16.mxu1 %v6825_v38  ;;  %2086 = vmatpush2.bf16.msra.mxu0 %v5829_v40  ;;  %v6905_v40 = vld [vmem:[#allocation3 + $0x1c4] ss:$16 sps:$4 sm:$0xff]  }
 0x137   : > { %2279 = vmatpush2.bf16.msra.mxu1 %v5832_v45  ;;  %2087 = vmatprep.subr.bf16.mxu0 %v5843_v53  ;;  %v6913_v45 = vld [vmem:[#allocation3 + $0x1c0] ss:$16 sps:$4 sm:$0xff]   ;;  %v6919_v53 = vld [vmem:[#allocation3 + $0x1ec] ss:$16 sps:$4 sm:$0xff]  }
 0x138   : > { %2280 = vmatprep.subr.bf16.mxu1 %v5846_v57  ;;  %8500 = vst [vmem:[#allocation19_spill] sm:$0xff] %v6913_v45  ;;  %8503 = vst [vmem:[#allocation22_spill] sm:$0xff] %v6919_v53  ;;  %v6927_v57 = vld [vmem:[#allocation3 + $0x1e8] ss:$16 sps:$4 sm:$0xff]  }
 0x139   : > { %8505 = vst [vmem:[#allocation24_spill] sm:$0xff] %v6927_v57 }
 0x13a   : > { %2088 = vmatpush2.bf16.msra.mxu0 %v5841_v52  ;;  %v6917_v52 = vld [vmem:[#allocation3 + $0x1e4] ss:$16 sps:$4 sm:$0xff]  }
 0x13b   : > { %2281 = vmatpush2.bf16.msra.mxu1 %v5844_v54  ;;  %3531 = vmatprep.subr.bf16.mxu0 %v5849_v59  ;;  %8502 = vst [vmem:[#allocation21_spill] sm:$0xff] %v6917_v52  ;;  %v6925_v54 = vld [vmem:[#allocation3 + $0x1e0] ss:$16 sps:$4 sm:$0xff]   ;;  %v6039_v59 = vld [vmem:[#allocation3 + $0x4] ss:$16 sps:$4 sm:$0xff]  }
 0x13c   : > { %1784 = vmatmul.mubr.bf16.gmra.mxu0 %v6835_v47  ;;  %3724 = vmatprep.subr.bf16.mxu1 %v5864_v24  ;;  %8504 = vst [vmem:[#allocation23_spill] sm:$0xff] %v6925_v54  ;;  %v6040_v24 = vld [vmem:[#allocation3 + $0xc] ss:$16 sps:$4 sm:$0xff]  }
 0x13d   : > { %1977 = vmatmul.mubr.bf16.gmra.mxu1 %v6837_v48  ;;  %1793 = vmatprep.mubr.bf16.mxu0 %v6839_v49 }
 0x13e   : > { %1986 = vmatprep.mubr.bf16.mxu1 %v6845_v58 }
 0x144   : > { %1794 = vmatmul.mubr.bf16.gmra.mxu0 %v6852_v60 }
 0x145   : > { %1987 = vmatmul.mubr.bf16.gmra.mxu1 %v6854_v61  ;;  %1803 = vmatprep.mubr.bf16.mxu0 %v6856_v62 }
 0x146   : > { %1996 = vmatprep.mubr.bf16.mxu1 %v6858_v0 }
 0x14c   : > { %1804 = vmatmul.mubr.bf16.gmra.mxu0 %v6864_v1 }
 0x14d   : > { %1997 = vmatmul.mubr.bf16.gmra.mxu1 %v6866_v7  ;;  %1813 = vmatprep.mubr.bf16.mxu0 %v6868_v8 }
 0x14e   : > { %2006 = vmatprep.mubr.bf16.mxu1 %v6870_v11 }
 0x154   : > { %1814 = vmatmul.mubr.bf16.gmra.mxu0 %v6876_v12 }
 0x155   : > { %2007 = vmatmul.mubr.bf16.gmra.mxu1 %v6878_v13  ;;  %1823 = vmatprep.mubr.bf16.mxu0 %v6880_v16 }
 0x156   : > { %2016 = vmatprep.mubr.bf16.mxu1 %v6882_v22 }
 0x15c   : > { %1824 = vmatmul.mubr.bf16.gmra.mxu0 %v6889_v25 }
 0x15d   : > { %2017 = vmatmul.mubr.bf16.gmra.mxu1 %v6891_v28  ;;  %1833 = vmatprep.mubr.bf16.mxu0 %v6893_v29 }
 0x15e   : > { %2026 = vmatprep.mubr.bf16.mxu1 %v6895_v30 }
 0x164   : > { %1834 = vmatmul.mubr.bf16.gmra.mxu0 %v6901_v33 }
 0x165   : > { %2027 = vmatmul.mubr.bf16.gmra.mxu1 %v6903_v34  ;;  %1843 = vmatprep.mubr.bf16.mxu0 %v6905_v40 }
 0x166   : > { %2036 = vmatprep.mubr.bf16.mxu1 %v6907_v41 }
 0x16c   : > { %1844 = vmatmul.mubr.bf16.gmra.mxu0 %v6913_v45  ;;  %v5873_v45 = vld [vmem:[%s6476_s9 + $0x2c4] ss:$16 sps:$4 sm:$0xff]  }
 0x16d   : > { %2037 = vmatmul.mubr.bf16.gmra.mxu1 %v6915_v46  ;;  %1853 = vmatprep.mubr.bf16.mxu0 %v6917_v52  ;;  %v5847_v46 = vld [vmem:[%s6476_s9 + $0xe0] ss:$16 sps:$4 sm:$0xff]  }
 0x16e   : > { %2046 = vmatprep.mubr.bf16.mxu1 %v6919_v53  ;;  %v5862_v52 = vld [vmem:[%s6476_s9 + $0x2e0] ss:$16 sps:$4 sm:$0xff]   ;;  %v5852_v53 = vld [vmem:[%s6476_s9 + $0xc4] ss:$16 sps:$4 sm:$0xff]  }
 0x174   : > { %1854 = vmatmul.mubr.bf16.gmra.mxu0 %v6925_v54  ;;  %v5882_v54 = vld [vmem:[%s6476_s9 + $0x2a4] ss:$16 sps:$4 sm:$0xff]  }
 0x175   : > { %2047 = vmatmul.mubr.bf16.gmra.mxu1 %v6927_v57  ;;  %2089 = vmatprep.mubr.bf16.mxu0 %v6039_v59  ;;  %v5850_v59 = vld [vmem:[%s6476_s9 + $0xc0] ss:$16 sps:$4 sm:$0xff]   ;;  %v5855_v57 = vld [vmem:[%s6476_s9 + $0xa4] ss:$16 sps:$4 sm:$0xff]  }
 0x176   : > { %2282 = vmatprep.mubr.bf16.mxu1 %v6040_v24  ;;  %v5871_v24 = vld [vmem:[%s6476_s9 + $0x2c0] ss:$16 sps:$4 sm:$0xff]  }
 0x17c   : > { %2090 = vmatmul.mubr.bf16.vlgmr.msra.gmra.mxu0 %v6681_v5  ;;  %v5853_v5 = vld [vmem:[%s6476_s9 + $0xa0] ss:$16 sps:$4 sm:$0xff]  }
 0x17d   : > { %2283 = vmatmul.mubr.bf16.vlgmr.msra.gmra.mxu1 %v6683_v6  ;;  %2099 = vmatprep.mubr.bf16.mxu0 %v6687_v9  ;;  %v5880_v6 = vld [vmem:[%s6476_s9 + $0x2a0] ss:$16 sps:$4 sm:$0xff]   ;;  %v5858_v9 = vld [vmem:[%s6476_s9 + $0x84] ss:$16 sps:$4 sm:$0xff]  }
 0x17e   : > { %2292 = vmatprep.mubr.bf16.mxu1 %v6689_v10  ;;  %3532 = vmatpush1.bf16.msra.mxu0 %v5847_v46  ;;  %v5891_v10 = vld [vmem:[%s6476_s9 + $0x284] ss:$16 sps:$4 sm:$0xff]   ;;  %v5889_v46 = vld [vmem:[%s6476_s9 + $0x280] ss:$16 sps:$4 sm:$0xff]  }
 0x17f   : > { %3725 = vmatpush1.bf16.msra.mxu1 %v5862_v52  ;;  %3533 = vmatprep.subr.bf16.mxu0 %v5852_v53  ;;  %v5861_v52 = vld [vmem:[%s6476_s9 + $0x64] ss:$16 sps:$4 sm:$0xff]  }
 0x180   : > { %3726 = vmatprep.subr.bf16.mxu1 %v5873_v45  ;;  %v5856_v45 = vld [vmem:[%s6476_s9 + $0x80] ss:$16 sps:$4 sm:$0xff]   ;;  %v5900_v53 = vld [vmem:[%s6476_s9 + $0x264] ss:$16 sps:$4 sm:$0xff]  }
 0x182   : > { %3534 = vmatpush1.bf16.msra.mxu0 %v5850_v59  ;;  %v5870_v59 = vld [vmem:[%s6476_s9 + $0x24] ss:$16 sps:$4 sm:$0xff]  }
 0x183   : > { %3727 = vmatpush1.bf16.msra.mxu1 %v5871_v24  ;;  %3535 = vmatprep.subr.bf16.mxu0 %v5855_v57  ;;  %v5907_v57 = vld [vmem:[%s6476_s9 + $0x240] ss:$16 sps:$4 sm:$0xff]   ;;  %v5915_v24 = vld [vmem:[%s6476_s9 + $0x224] ss:$16 sps:$4 sm:$0xff]  }
 0x184   : > { %3728 = vmatprep.subr.bf16.mxu1 %v5882_v54  ;;  %2100 = vmatmul.mubr.bf16.gmra.mxu0 %v6701_v17  ;;  %v5859_v17 = vld [vmem:[%s6476_s9 + $0x60] ss:$16 sps:$4 sm:$0xff]  }
 0x185   : > { %2293 = vmatmul.mubr.bf16.gmra.mxu1 %v6703_v18  ;;  %2109 = vmatprep.mubr.bf16.mxu0 %v6705_v19  ;;  %v5898_v18 = vld [vmem:[%s6476_s9 + $0x260] ss:$16 sps:$4 sm:$0xff]   ;;  %v5867_v19 = vld [vmem:[%s6476_s9 + $0x44] ss:$16 sps:$4 sm:$0xff]  }
 0x186   : > { %2302 = vmatprep.mubr.bf16.mxu1 %v6707_v20  ;;  %3536 = vmatpush1.bf16.msra.mxu0 %v5853_v5  ;;  %v5909_v20 = vld [vmem:[%s6476_s9 + $0x244] ss:$16 sps:$4 sm:$0xff]   ;;  %v5865_v54 = vld [vmem:[%s6476_s9 + $0x40] ss:$16 sps:$4 sm:$0xff]  }
 0x187   : > { %3729 = vmatpush1.bf16.msra.mxu1 %v5880_v6  ;;  %3537 = vmatprep.subr.bf16.mxu0 %v5858_v9  ;;  %v5874_v5 = vld [vmem:[%s6476_s9] ss:$16 sps:$4 sm:$0xff]   ;;  %v5879_v9 = vld [vmem:[%s6476_s9 + $0x1e4] ss:$16 sps:$4 sm:$0xff]  }
 0x188   : > { %3730 = vmatprep.subr.bf16.mxu1 %v5891_v10  ;;  %v5916_v6 = vld [vmem:[%s6476_s9 + $0x200] ss:$16 sps:$4 sm:$0xff]   ;;  %v5921_v10 = vld [vmem:[%s6476_s9 + $0x3e4] ss:$16 sps:$4 sm:$0xff]  }
 0x18a   : > { %3538 = vmatpush1.bf16.msra.mxu0 %v5856_v45  ;;  %v5883_v45 = vld [vmem:[%s6476_s9 + $0x1c0] ss:$16 sps:$4 sm:$0xff]  }
 0x18b   : > { %3731 = vmatpush1.bf16.msra.mxu1 %v5889_v46  ;;  %3539 = vmatprep.subr.bf16.mxu0 %v5861_v52  ;;  %v5922_v46 = vld [vmem:[%s6476_s9 + $0x3c0] ss:$16 sps:$4 sm:$0xff]   ;;  %v5888_v52 = vld [vmem:[%s6476_s9 + $0x1a4] ss:$16 sps:$4 sm:$0xff]  }
 0x18c   : > { %3732 = vmatprep.subr.bf16.mxu1 %v5900_v53  ;;  %2110 = vmatmul.mubr.bf16.gmra.mxu0 %v6718_v26  ;;  %v5868_v26 = vld [vmem:[%s6476_s9 + $0x20] ss:$16 sps:$4 sm:$0xff]   ;;  %v5927_v53 = vld [vmem:[%s6476_s9 + $0x3a4] ss:$16 sps:$4 sm:$0xff]  }
 0x18d   : > { %2303 = vmatmul.mubr.bf16.gmra.mxu1 %v6720_v27  ;;  %2119 = vmatprep.mubr.bf16.mxu0 %v6725_v31  ;;  %v5913_v27 = vld [vmem:[%s6476_s9 + $0x220] ss:$16 sps:$4 sm:$0xff]   ;;  %v5876_v31 = vld [vmem:[%s6476_s9 + $0x4] ss:$16 sps:$4 sm:$0xff]  }
 0x18e   : > { %2312 = vmatprep.mubr.bf16.mxu1 %v6727_v32  ;;  %3540 = vmatpush1.bf16.msra.mxu0 %v5859_v17  ;;  %v5918_v32 = vld [vmem:[%s6476_s9 + $0x204] ss:$16 sps:$4 sm:$0xff]  }
 0x18f   : > { %3733 = vmatpush1.bf16.msra.mxu1 %v5898_v18  ;;  %3541 = vmatprep.subr.bf16.mxu0 %v5867_v19  ;;  %v5897_v17 = vld [vmem:[%s6476_s9 + $0x164] ss:$16 sps:$4 sm:$0xff]   ;;  %v5895_v19 = vld [vmem:[%s6476_s9 + $0x160] ss:$16 sps:$4 sm:$0xff]  }
 0x190   : > { %3734 = vmatprep.subr.bf16.mxu1 %v5909_v20  ;;  %v5930_v18 = vld [vmem:[%s6476_s9 + $0x384] ss:$16 sps:$4 sm:$0xff]   ;;  %v5928_v20 = vld [vmem:[%s6476_s9 + $0x380] ss:$16 sps:$4 sm:$0xff]  }
 0x192   : > { %3542 = vmatpush1.bf16.msra.mxu0 %v5865_v54  ;;  %v5904_v54 = vld [vmem:[%s6476_s9 + $0x120] ss:$16 sps:$4 sm:$0xff]  }
 0x193   : > { %3735 = vmatpush1.bf16.msra.mxu1 %v5907_v57  ;;  %3543 = vmatprep.subr.bf16.mxu0 %v5870_v59  ;;  %v5931_v57 = vld [vmem:[%s6476_s9 + $0x360] ss:$16 sps:$4 sm:$0xff]   ;;  %v5942_v59 = vld [vmem:[%s6476_s9 + $0xec] ss:$16 sps:$4 sm:$0xff]  }
 0x194   : > { %3736 = vmatprep.subr.bf16.mxu1 %v5915_v24  ;;  %2120 = vmatmul.mubr.bf16.gmra.mxu0 %v6739_v39  ;;  %v5877_v39 = vld [vmem:[%s6476_s9 + $0x1e0] ss:$16 sps:$4 sm:$0xff]  }
 0x195   : > { %2313 = vmatmul.mubr.bf16.gmra.mxu1 %v6743_v42  ;;  %2129 = vmatprep.mubr.bf16.mxu0 %v6745_v43  ;;  %v5919_v42 = vld [vmem:[%s6476_s9 + $0x3e0] ss:$16 sps:$4 sm:$0xff]   ;;  %v5885_v43 = vld [vmem:[%s6476_s9 + $0x1c4] ss:$16 sps:$4 sm:$0xff]  }
 0x196   : > { %2322 = vmatprep.mubr.bf16.mxu1 %v6747_v44  ;;  %3544 = vmatpush1.bf16.msra.mxu0 %v5868_v26  ;;  %v5924_v44 = vld [vmem:[%s6476_s9 + $0x3c4] ss:$16 sps:$4 sm:$0xff]  }
 0x197   : > { %3737 = vmatpush1.bf16.msra.mxu1 %v5913_v27  ;;  %3545 = vmatprep.subr.bf16.mxu0 %v5876_v31  ;;  %v5939_v27 = vld [vmem:[%s6476_s9 + $0x324] ss:$16 sps:$4 sm:$0xff]  }
 0x198   : > { %3738 = vmatprep.subr.bf16.mxu1 %v5918_v32 }
 0x19a   : > { %3546 = vmatpush1.bf16.msra.mxu0 %v5874_v5 }
 0x19b   : > { %3739 = vmatpush1.bf16.msra.mxu1 %v5916_v6  ;;  %3547 = vmatprep.subr.bf16.mxu0 %v5879_v9  ;;  %v5948_v6 = vld [vmem:[%s6476_s9 + $0x304] ss:$16 sps:$4 sm:$0xff]   ;;  %v5946_v9 = vld [vmem:[%s6476_s9 + $0x300] ss:$16 sps:$4 sm:$0xff]  }
 0x19c   : > { %3740 = vmatprep.subr.bf16.mxu1 %v5921_v10  ;;  %2130 = vmatmul.mubr.bf16.gmra.mxu0 %v6758_v50  ;;  %v5886_v50 = vld [vmem:[%s6476_s9 + $0x1a0] ss:$16 sps:$4 sm:$0xff]  }
 0x19d   : > { %2323 = vmatmul.mubr.bf16.gmra.mxu1 %v6760_v51  ;;  %2139 = vmatprep.mubr.bf16.mxu0 %v6765_v55  ;;  %v5925_v51 = vld [vmem:[%s6476_s9 + $0x3a0] ss:$16 sps:$4 sm:$0xff]   ;;  %v5894_v55 = vld [vmem:[%s6476_s9 + $0x184] ss:$16 sps:$4 sm:$0xff]  }
 0x19e   : > { %2332 = vmatprep.mubr.bf16.mxu1 %v6767_v56  ;;  %3548 = vmatpush2.bf16.msra.mxu0 %v5877_v39  ;;  %v5892_v56 = vld [vmem:[%s6476_s9 + $0x180] ss:$16 sps:$4 sm:$0xff]  }
 0x19f   : > { %3741 = vmatpush2.bf16.msra.mxu1 %v5919_v42  ;;  %3549 = vmatprep.subr.bf16.mxu0 %v5885_v43 }
 0x1a0   : > { %3742 = vmatprep.subr.bf16.mxu1 %v5924_v44 }
 0x1a2   : > { %3550 = vmatpush2.bf16.msra.mxu0 %v5883_v45 }
 0x1a3   : > { %3743 = vmatpush2.bf16.msra.mxu1 %v5922_v46  ;;  %3551 = vmatprep.subr.bf16.mxu0 %v5888_v52  ;;  %v5960_v46 = vld [vmem:[%s6476_s9 + $0x2ec] ss:$16 sps:$4 sm:$0xff]  }
 0x1a4   : > { %3744 = vmatprep.subr.bf16.mxu1 %v5927_v53  ;;  %2140 = vmatmul.mubr.bf16.gmra.mxu0 %v6779_v63  ;;  %v5903_v63 = vld [vmem:[%s6476_s9 + $0x144] ss:$16 sps:$4 sm:$0xff]  }
 0x1a5   : > { %2333 = vmatmul.mubr.bf16.gmra.mxu1 %v6783_v2  ;;  %2149 = vmatprep.mubr.bf16.mxu0 %v6785_v3  ;;  %v5901_v2 = vld [vmem:[%s6476_s9 + $0x140] ss:$16 sps:$4 sm:$0xff]   ;;  %v5906_v3 = vld [vmem:[%s6476_s9 + $0x124] ss:$16 sps:$4 sm:$0xff]  }
 0x1a6   : > { %2342 = vmatprep.mubr.bf16.mxu1 %v6787_v4  ;;  %3552 = vmatpush2.bf16.msra.mxu0 %v5886_v50  ;;  %v5933_v4 = vld [vmem:[%s6476_s9 + $0x364] ss:$16 sps:$4 sm:$0xff]  }
 0x1a7   : > { %3745 = vmatpush2.bf16.msra.mxu1 %v5925_v51  ;;  %3553 = vmatprep.subr.bf16.mxu0 %v5894_v55 }
 0x1a8   : > { %3746 = vmatprep.subr.bf16.mxu1 %v5930_v18 }
 0x1aa   : > { %3554 = vmatpush2.bf16.msra.mxu0 %v5892_v56 }
 0x1ab   : > { %3555 = vmatprep.subr.bf16.mxu0 %v5897_v17  ;;  %3747 = vmatpush2.bf16.msra.mxu1 %v5928_v20 }
 0x1ac   : > { %2150 = vmatmul.mubr.bf16.gmra.mxu0 %v6798_v14  ;;  %v5912_v14 = vld [vmem:[%s6476_s9 + $0x104] ss:$16 sps:$4 sm:$0xff]   ;;  %3748 = vmatprep.subr.bf16.mxu1 %v5933_v4 }
 0x1ad   : > { %2343 = vmatmul.mubr.bf16.gmra.mxu1 %v6800_v15  ;;  %2159 = vmatprep.mubr.bf16.mxu0 %v6803_v21  ;;  %v5910_v15 = vld [vmem:[%s6476_s9 + $0x100] ss:$16 sps:$4 sm:$0xff]   ;;  %v5936_v21 = vld [vmem:[%s6476_s9 + $0x344] ss:$16 sps:$4 sm:$0xff]  }
 0x1ae   : > { %2352 = vmatprep.mubr.bf16.mxu1 %v6806_v23  ;;  %3556 = vmatpush2.bf16.msra.mxu0 %v5895_v19  ;;  %v5934_v23 = vld [vmem:[%s6476_s9 + $0x340] ss:$16 sps:$4 sm:$0xff]  }
 0x1af   : > { %3557 = vmatprep.subr.bf16.mxu0 %v5903_v63  ;;  %3749 = vmatpush2.bf16.msra.mxu1 %v5931_v57 }
 0x1b0   : > { %3750 = vmatprep.subr.bf16.mxu1 %v5936_v21 }
 0x1b2   : > { %3558 = vmatpush2.bf16.msra.mxu0 %v5901_v2 }
 0x1b3   : > { %3559 = vmatprep.subr.bf16.mxu0 %v5906_v3  ;;  %3751 = vmatpush2.bf16.msra.mxu1 %v5934_v23 }
 0x1b4   : > { %2160 = vmatmul.mubr.bf16.gmra.mxu0 %v6819_v35  ;;  %3752 = vmatprep.subr.bf16.mxu1 %v5939_v27 }
 0x1b5   : > { %2353 = vmatmul.mubr.bf16.gmra.mxu1 %v6821_v36  ;;  %2169 = vmatprep.mubr.bf16.mxu0 %v6823_v37 }
 0x1b6   : > { %2362 = vmatprep.mubr.bf16.mxu1 %v6825_v38  ;;  %3560 = vmatpush2.bf16.msra.mxu0 %v5904_v54 }
 0x1b7   : > { %3561 = vmatprep.subr.bf16.mxu0 %v5912_v14 }
 0x1ba   : > { %3562 = vmatpush2.bf16.msra.mxu0 %v5910_v15 }
 0x1bb   : > { %3917 = vmatprep.subr.bf16.mxu0 %v5942_v59 }
 0x1bc   : > { %v7022_v24 = vpop.f32.mrf.mxu0  ;;  %2170 = vmatmul.mubr.bf16.gmra.mxu0 %v6835_v47 }
 0x1bd   : > { %v7024_v35 = vpop.f32.mrf.mxu1  ;;  %2363 = vmatmul.mubr.bf16.gmra.mxu1 %v6837_v48  ;;  %2179 = vmatprep.mubr.bf16.mxu0 %v6839_v49  ;;  %v5937_v49 = vld [vmem:[%s6476_s9 + $0x320] ss:$16 sps:$4 sm:$0xff]  }
 0x1be   : > { %2372 = vmatprep.mubr.bf16.mxu1 %v6845_v58  ;;  %v7030_v36 = vpop.f32.mrf.mxu0  ;;  %3753 = vmatpush2.bf16.msra.mxu1 %v5937_v49  ;;  %v8510_v49 = vld [vmem:[#allocation20_spill] sm:$0xff] }
 0x1bf   : > { %v7032_v37 = vpop.f32.mrf.mxu1  ;;  %3754 = vmatprep.subr.bf16.mxu1 %v5948_v6  ;;  %v8511_v6 = vld [vmem:[#allocation21_spill] sm:$0xff] }
 0x1c0   : > { %v7034_v38 = vpop.f32.mrf.mxu0 }
 0x1c1   : > { %v7036_v26 = vpop.f32.mrf.mxu1 }
 0x1c2   : > { %v7039_v47 = vpop.f32.mrf.mxu0  ;;  %3755 = vmatpush2.bf16.msra.mxu1 %v5946_v9  ;;  %v8512_v9 = vld [vmem:[#allocation22_spill] sm:$0xff] }
 0x1c3   : > { %v7041_v48 = vpop.f32.mrf.mxu1  ;;  %4110 = vmatprep.subr.bf16.mxu1 %v5960_v46 }
 0x1c4   : > { %v7044_v58 = vpop.f32.mrf.mxu0  ;;  %2180 = vmatmul.mubr.bf16.gmra.mxu0 %v6852_v60 }
 0x1c5   : > { %v7046_v31 = vpop.f32.mrf.mxu1  ;;  %2373 = vmatmul.mubr.bf16.gmra.mxu1 %v6854_v61  ;;  %2189 = vmatprep.mubr.bf16.mxu0 %v6856_v62 }
 0x1c6   : > { %2382 = vmatprep.mubr.bf16.mxu1 %v6858_v0  ;;  %v7052_v32 = vpop.f32.mrf.mxu0 }
 0x1c7   : > { %v7054_v5 = vpop.f32.mrf.mxu1 }
 0x1c8   : > { %v7058_v10 = vpop.f32.mrf.mxu0 }
 0x1c9   : > { %v7060_v39 = vpop.f32.mrf.mxu1 }
 0x1ca   : > { %v7062_v60 = vpop.f32.mrf.mxu0 }
 0x1cb   : > { %v7064_v61 = vpop.f32.mrf.mxu1 }
 0x1cc   : > { %v7066_v62 = vpop.f32.mrf.mxu0  ;;  %2190 = vmatmul.mubr.bf16.gmra.mxu0 %v6864_v1 }
 0x1cd   : > { %v7068_v0 = vpop.f32.mrf.mxu1  ;;  %2383 = vmatmul.mubr.bf16.gmra.mxu1 %v6866_v7  ;;  %2199 = vmatprep.mubr.bf16.mxu0 %v6868_v8 }
 0x1ce   : > { %2392 = vmatprep.mubr.bf16.mxu1 %v6870_v11  ;;  %v7074_v42 = vpop.f32.mrf.mxu0 }
 0x1cf   : > { %v7076_v43 = vpop.f32.mrf.mxu1 }
 0x1d0   : > { %v7078_v44 = vpop.f32.mrf.mxu0 }
 0x1d1   : > { %v7080_v45 = vpop.f32.mrf.mxu1 }
 0x1d2   : > { %v7083_v52 = vpop.f32.mrf.mxu0 }
 0x1d3   : > { %v7085_v53 = vpop.f32.mrf.mxu1 }
 0x1d4   : > { %v7087_v1 = vpop.f32.mrf.mxu0  ;;  %2200 = vmatmul.mubr.bf16.gmra.mxu0 %v6876_v12  ;;  %v691_v12 = vlaneseq }
 0x1d5   : > { %v7089_v7 = vpop.f32.mrf.mxu1  ;;  %2393 = vmatmul.mubr.bf16.gmra.mxu1 %v6878_v13  ;;  %2209 = vmatprep.mubr.bf16.mxu0 %v6880_v16 }
 0x1d6   : > { %2402 = vmatprep.mubr.bf16.mxu1 %v6882_v22  ;;  %v7095_v8 = vpop.f32.mrf.mxu0  ;;  %v7119_v18 = vshrl.u32 %v691_v12, 7 }
 0x1d7   : > { %v7097_v11 = vpop.f32.mrf.mxu1 }
 0x1d8   : > { %v7099_v50 = vpop.f32.mrf.mxu0  ;;  %8506 = vst [vmem:[#allocation25_spill] sm:$0xff] %v7119_v18  ;;  %v8458_v63 = vsub.s32 1, %v7119_v18 }
 0x1d9   : > { %v7101_v51 = vpop.f32.mrf.mxu1 }
 0x1da   : > { %v7103_v55 = vpop.f32.mrf.mxu0 }
 0x1db   : > { %v7105_v56 = vpop.f32.mrf.mxu1 }
 0x1dc   : > { %v7107_v17 = vpop.f32.mrf.mxu0  ;;  %2210 = vmatmul.mubr.bf16.gmra.mxu0 %v6889_v25 }
 0x1dd   : > { %v7109_v13 = vpop.f32.mrf.mxu1  ;;  %2403 = vmatmul.mubr.bf16.gmra.mxu1 %v6891_v28  ;;  %2219 = vmatprep.mubr.bf16.mxu0 %v6893_v29  ;;  %v7132_v28 = vld [vmem:[%s315_s18] sm:$0xf] }
 0x1de   : > { %2412 = vmatprep.mubr.bf16.mxu1 %v6895_v30  ;;  %v7115_v16 = vpop.f32.mrf.mxu0  ;;  %8507 = vst [vmem:[#allocation26_spill] sm:$0xff] %v7132_v28  ;;  %v7143_v3 = vrot.slane %v7132_v28, %v8458_v63 }
 0x1df   : > { %v7117_v22 = vpop.f32.mrf.mxu1 }
 0x1e0   : > { %v7121_v19 = vpop.f32.mrf.mxu0  ;;  %v1712_v57 = vadd.f32 %v7039_v47, %v7143_v3  ;;  %v1708_v15 = vadd.f32 %v7030_v36, %v7143_v3  ;;  %v8509_v47 = vld [vmem:[#allocation19_spill] sm:$0xff]  ;;  %v1722_v63 = vadd.f32 %v7062_v60, %v7143_v3 }
 0x1e1   : > { %v7123_v20 = vpop.f32.mrf.mxu1 }
 0x1e2   : > { %v7126_v2 = vpop.f32.mrf.mxu0  ;;  %v1901_v36 = vadd.f32 %v7032_v37, %v1708_v15 }
 0x1e3   : > { %v7128_v25 = vpop.f32.mrf.mxu1 }
 0x1e4   : > { %v7134_v29 = vpop.f32.mrf.mxu0  ;;  %2220 = vmatmul.mubr.bf16.gmra.mxu0 %v6901_v33  ;;  %v8459_v33 = vsub.s32 0, %v7119_v18  ;;  %v2444_v15 = vmax.f32 %v1901_v36, 0.0  ;;  %v8515_v36 = vld [vmem:[#allocation23_spill] sm:$0xff] }
 0x1e5   : > { %v7136_v30 = vpop.f32.mrf.mxu1  ;;  %2413 = vmatmul.mubr.bf16.gmra.mxu1 %v6903_v34  ;;  %2229 = vmatprep.mubr.bf16.mxu0 %v6905_v40 }
 0x1e6   : > { %2422 = vmatprep.mubr.bf16.mxu1 %v6907_v41  ;;  %v7147_v4 = vpop.f32.mrf.mxu0  ;;  %v1905_v41 = vadd.f32 %v7041_v48, %v1712_v57  ;;  %v7168_v23 = vrot.slane %v7132_v28, %v8459_v33 }
 0x1e7   : > { %v7149_v54 = vpop.f32.mrf.mxu1 }
 0x1e8   : > { %v7154_v14 = vpop.f32.mrf.mxu0  ;;  %v1710_v48 = vadd.f32 %v7034_v38, %v7168_v23  ;;  %v2448_v57 = vmax.f32 %v1905_v41, 0.0  ;;  %v1915_v41 = vadd.f32 %v7064_v61, %v1722_v63  ;;  %v1720_v61 = vadd.f32 %v7058_v10, %v7168_v23 }
 0x1e9   : > { %v7156_v34 = vpop.f32.mrf.mxu1  ;;  %v1728_v10 = vadd.f32 %v7074_v42, %v7143_v3 }
 0x1ea   : > { %v7160_v21 = vpop.f32.mrf.mxu0  ;;  %v1903_v38 = vadd.f32 %v7036_v26, %v1710_v48  ;;  %v7201_v60 = vpack.c.bf16 %v2448_v57, %v2444_v15  ;;  %v2456_v48 = vmax.f32 %v1915_v41, 0.0  ;;  %v1732_v57 = vadd.f32 %v7083_v52, %v7143_v3 }
 0x1eb   : > { %v7162_v40 = vpop.f32.mrf.mxu1  ;;  %v1913_v41 = vadd.f32 %v7060_v39, %v1720_v61  ;;  %v1921_v39 = vadd.f32 %v7076_v43, %v1728_v10  ;;  %v1742_v43 = vadd.f32 %v7103_v55, %v7143_v3 }
 0x1ec   : > { %v7170_v59 = vpop.f32.mrf.mxu0  ;;  %2230 = vmatmul.mubr.bf16.gmra.mxu0 %v8509_v47  ;;  %v1706_v47 = vadd.f32 %v7022_v24, %v7168_v23  ;;  %8513 = vst [vmem:[#allocation19_spill] sm:$0xff] %v7201_v60 }
 0x1ed   : > { %v7172_v27 = vpop.f32.mrf.mxu1  ;;  %2423 = vmatmul.mubr.bf16.gmra.mxu1 %v8510_v49  ;;  %2239 = vmatprep.mubr.bf16.mxu0 %v8511_v6  ;;  %v1718_v6 = vadd.f32 %v7052_v32, %v7143_v3  ;;  %v2447_v32 = vmax.f32 %v1903_v38, 0.0  ;;  %v5940_v38 = vld [vmem:[%s6476_s9 + $0xe8] ss:$16 sps:$4 sm:$0xff]   ;;  %v2455_v61 = vmax.f32 %v1913_v41, 0.0  ;;  %v1738_v41 = vadd.f32 %v7095_v8, %v7143_v3 }
 0x1ee   : > { %8508 = vst [vmem:[#allocation27_spill] sm:$0xff] %v7172_v27  ;;  %2432 = vmatprep.mubr.bf16.mxu1 %v8512_v9  ;;  %v7181_v46 = vpop.f32.mrf.mxu0  ;;  %v1899_v24 = vadd.f32 %v7024_v35, %v1706_v47  ;;  %v8516_v27 = vld [vmem:[#allocation24_spill] sm:$0xff] }
 0x1ef   : > { %v7183_v12 = vpop.f32.mrf.mxu1  ;;  %v1911_v26 = vadd.f32 %v7054_v5, %v1718_v6 }
 0x1f0   : > { %v7189_v49 = vpop.f32.mrf.mxu0  ;;  %v2443_v47 = vmax.f32 %v1899_v24, 0.0  ;;  %v5945_v24 = vld [vmem:[%s6476_s9 + $0xcc] ss:$16 sps:$4 sm:$0xff]  }
 0x1f1   : > { %v7191_v37 = vpop.f32.mrf.mxu1  ;;  %v2452_v6 = vmax.f32 %v1911_v26, 0.0 }
 0x1f2   : > { %v7196_v9 = vpop.f32.mrf.mxu0 }
 0x1f3   : > { %v7198_v33 = vpop.f32.mrf.mxu1 }
 0x1f4   : > { %v7204_v28 = vpop.f32.mrf.mxu0  ;;  %2240 = vmatmul.mubr.bf16.gmra.mxu0 %v8515_v36  ;;  %v7229_v36 = vpack.c.bf16 %v2447_v32, %v2443_v47  ;;  %v5943_v32 = vld [vmem:[%s6476_s9 + $0xc8] ss:$16 sps:$4 sm:$0xff]  }
 0x1f5   : > { %v7206_v18 = vpop.f32.mrf.mxu1  ;;  %2433 = vmatmul.mubr.bf16.gmra.mxu1 %v8516_v27  ;;  %3563 = vmatprep.mubr.bf16.mxu0 %v7201_v60  ;;  %v1716_v27 = vadd.f32 %v7044_v58, %v7168_v23  ;;  %v1925_v58 = vadd.f32 %v7085_v53, %v1732_v57  ;;  %v1730_v53 = vadd.f32 %v7078_v44, %v7168_v23  ;;  %v5951_v57 = vld [vmem:[%s6476_s9 + $0xac] ss:$16 sps:$4 sm:$0xff]   ;;  %v2460_v44 = vmax.f32 %v1921_v39, 0.0 }
 0x1f6   : > { %8514 = vst [vmem:[#allocation20_spill] sm:$0xff] %v7206_v18  ;;  %v7214_v63 = vpop.f32.mrf.mxu0  ;;  %8518 = vst [vmem:[#allocation22_spill] sm:$0xff] %v7229_v36  ;;  %v7238_v18 = vpack.c.bf16 %v2456_v48, %v2452_v6  ;;  %v1726_v6 = vadd.f32 %v7066_v62, %v7168_v23  ;;  %v5954_v62 = vld [vmem:[%s6476_s9 + $0x8c] ss:$16 sps:$4 sm:$0xff]  }
 0x1f7   : > { %v7216_v35 = vpop.f32.mrf.mxu1  ;;  %v1909_v26 = vadd.f32 %v7046_v31, %v1716_v27  ;;  %v2464_v47 = vmax.f32 %v1925_v58, 0.0  ;;  %v1923_v58 = vadd.f32 %v7080_v45, %v1730_v53  ;;  %v1931_v45 = vadd.f32 %v7097_v11, %v1738_v41 }
 0x1f8   : > { %v7222_v5 = vpop.f32.mrf.mxu0  ;;  %8519 = vst [vmem:[#allocation23_spill] sm:$0xff] %v7238_v18  ;;  %v1919_v8 = vadd.f32 %v7068_v0, %v1726_v6  ;;  %v1752_v11 = vadd.f32 %v7126_v2, %v7143_v3  ;;  %v1736_v6 = vadd.f32 %v7087_v1, %v7168_v23  ;;  %v5963_v1 = vld [vmem:[%s6476_s9 + $0x4c] ss:$16 sps:$4 sm:$0xff]  }
 0x1f9   : > { %v7224_v15 = vpop.f32.mrf.mxu1  ;;  %v2451_v27 = vmax.f32 %v1909_v26, 0.0  ;;  %v7276_v39 = vpack.c.bf16 %v2464_v47, %v2460_v44  ;;  %v2463_v53 = vmax.f32 %v1923_v58, 0.0  ;;  %v5957_v47 = vld [vmem:[%s6476_s9 + $0x6c] ss:$16 sps:$4 sm:$0xff]   ;;  %v5955_v58 = vld [vmem:[%s6476_s9 + $0x68] ss:$16 sps:$4 sm:$0xff]  }
 0x1fa   : > { %8517 = vst [vmem:[#allocation21_spill] sm:$0xff] %v7224_v15  ;;  %v7232_v60 = vpop.f32.mrf.mxu0 }
 0x1fb   : > { %v7234_v52 = vpop.f32.mrf.mxu1  ;;  %8522 = vst [vmem:[#allocation29_spill] sm:$0xff] %v7276_v39 }
 0x1fc   : > { %v7241_v15 = vpop.f32.mrf.mxu0  ;;  %3564 = vmatmul.mubr.bf16.vlgmr.msra.gmra.mxu0 %v7229_v36  ;;  %v1935_v36 = vadd.f32 %v7105_v56, %v1742_v43  ;;  %v1740_v56 = vadd.f32 %v7099_v50, %v7168_v23  ;;  %v2468_v50 = vmax.f32 %v1931_v45, 0.0 }
 0x1fd   : > { %v7243_v42 = vpop.f32.mrf.mxu1  ;;  %3573 = vmatprep.mubr.bf16.mxu0 %v7238_v18  ;;  %3918 = vmatpush1.bf16.msra.mxu0 %v5940_v38  ;;  %v7267_v18 = vpack.c.bf16 %v2455_v61, %v2451_v27  ;;  %v5952_v61 = vld [vmem:[%s6476_s9 + $0x88] ss:$16 sps:$4 sm:$0xff]   ;;  %v2459_v27 = vmax.f32 %v1919_v8, 0.0 }
 0x1fe   : > { %8520 = vst [vmem:[#allocation24_spill] sm:$0xff] %v7243_v42  ;;  %v7251_v48 = vpop.f32.mrf.mxu0  ;;  %3919 = vmatprep.subr.bf16.mxu0 %v5945_v24  ;;  %v5949_v24 = vld [vmem:[%s6476_s9 + $0xa8] ss:$16 sps:$4 sm:$0xff]   ;;  %v2472_v43 = vmax.f32 %v1935_v36, 0.0  ;;  %v1933_v36 = vadd.f32 %v7101_v51, %v1740_v56 }
 0x1ff   : > { %v7253_v31 = vpop.f32.mrf.mxu1  ;;  %8521 = vst [vmem:[#allocation28_spill] sm:$0xff] %v7267_v18 }
 0x200   : > { %v7260_v10 = vpop.f32.mrf.mxu0  ;;  %v7314_v45 = vpack.c.bf16 %v2472_v43, %v2468_v50  ;;  %v2471_v56 = vmax.f32 %v1933_v36, 0.0  ;;  %v5966_v43 = vld [vmem:[%s6476_s9 + $0x2c] ss:$16 sps:$4 sm:$0xff]   ;;  %v5964_v36 = vld [vmem:[%s6476_s9 + $0x28] ss:$16 sps:$4 sm:$0xff]  }
 0x201   : > { %v7262_v38 = vpop.f32.mrf.mxu1  ;;  %3920 = vmatpush1.bf16.msra.mxu0 %v5943_v32 }
 0x202   : > { %v7270_v55 = vpop.f32.mrf.mxu0  ;;  %3921 = vmatprep.subr.bf16.mxu0 %v5951_v57  ;;  %8524 = vst [vmem:[#allocation31_spill] sm:$0xff] %v7314_v45 }
 0x203   : > { %v7272_v26 = vpop.f32.mrf.mxu1 }
 0x204   : > { %v7279_v32 = vpop.f32.mrf.mxu0  ;;  %3574 = vmatmul.mubr.bf16.gmra.mxu0 %v7267_v18 }
 0x205   : > { %v7281_v42 = vpop.f32.mrf.mxu1  ;;  %3583 = vmatprep.mubr.bf16.mxu0 %v7276_v39  ;;  %3922 = vmatpush1.bf16.msra.mxu0 %v5949_v24  ;;  %v1748_v24 = vadd.f32 %v7115_v16, %v7143_v3  ;;  %v1945_v39 = vadd.f32 %v7128_v25, %v1752_v11  ;;  %v1929_v16 = vadd.f32 %v7089_v7, %v1736_v6 }
 0x206   : > { %v7289_v57 = vpop.f32.mrf.mxu0  ;;  %3923 = vmatprep.subr.bf16.mxu0 %v5954_v62  ;;  %v7305_v62 = vpack.c.bf16 %v2463_v53, %v2459_v27  ;;  %v5961_v53 = vld [vmem:[%s6476_s9 + $0x48] ss:$16 sps:$4 sm:$0xff]   ;;  %v1750_v25 = vadd.f32 %v7121_v19, %v7168_v23  ;;  %v1746_v6 = vadd.f32 %v7107_v17, %v7168_v23  ;;  %v5972_v17 = vld [vmem:[%s6476_s9 + $0xc] ss:$16 sps:$4 sm:$0xff]  }
 0x207   : > { %v7291_v0 = vpop.f32.mrf.mxu1  ;;  %v1941_v51 = vadd.f32 %v7117_v22, %v1748_v24  ;;  %v2480_v11 = vmax.f32 %v1945_v39, 0.0  ;;  %v1762_v22 = vadd.f32 %v7160_v21, %v7143_v3  ;;  %v2467_v27 = vmax.f32 %v1929_v16, 0.0 }
 0x208   : > { %v7298_v44 = vpop.f32.mrf.mxu0  ;;  %8523 = vst [vmem:[#allocation30_spill] sm:$0xff] %v7305_v62  ;;  %v1943_v39 = vadd.f32 %v7123_v20, %v1750_v25 }
 0x209   : > { %v7300_v41 = vpop.f32.mrf.mxu1  ;;  %3924 = vmatpush1.bf16.msra.mxu0 %v5952_v61  ;;  %v2476_v19 = vmax.f32 %v1941_v51, 0.0 }
 0x20a   : > { %v7308_v2 = vpop.f32.mrf.mxu0  ;;  %3925 = vmatprep.subr.bf16.mxu0 %v5957_v47  ;;  %v2479_v25 = vmax.f32 %v1943_v39, 0.0  ;;  %v5973_v39 = vld [vmem:[%s6476_s9 + $0x1e8] ss:$16 sps:$4 sm:$0xff]  }
 0x20b   : > { %v7310_v8 = vpop.f32.mrf.mxu1  ;;  %v7352_v51 = vpack.c.bf16 %v2480_v11, %v2476_v19  ;;  %v5975_v11 = vld [vmem:[%s6476_s9 + $0x1ec] ss:$16 sps:$4 sm:$0xff]  }
 0x20c   : > { %v7317_v61 = vpop.f32.mrf.mxu0  ;;  %3584 = vmatmul.mubr.bf16.gmra.mxu0 %v7305_v62 }
 0x20d   : > { %v7319_v18 = vpop.f32.mrf.mxu1  ;;  %3593 = vmatprep.mubr.bf16.mxu0 %v7314_v45  ;;  %3926 = vmatpush1.bf16.msra.mxu0 %v5955_v58  ;;  %v1758_v58 = vadd.f32 %v7147_v4, %v7143_v3  ;;  %v1955_v45 = vadd.f32 %v7162_v40, %v1762_v22  ;;  %8526 = vst [vmem:[#allocation33_spill] sm:$0xff] %v7352_v51 }
 0x20e   : > { %v7327_v47 = vpop.f32.mrf.mxu0  ;;  %3927 = vmatprep.subr.bf16.mxu0 %v5963_v1  ;;  %v7343_v1 = vpack.c.bf16 %v2471_v56, %v2467_v27  ;;  %v1939_v4 = vadd.f32 %v7109_v13, %v1746_v6  ;;  %v5970_v56 = vld [vmem:[%s6476_s9 + $0x8] ss:$16 sps:$4 sm:$0xff]   ;;  %v1760_v40 = vadd.f32 %v7154_v14, %v7168_v23  ;;  %v1756_v6 = vadd.f32 %v7134_v29, %v7168_v23  ;;  %v5981_v29 = vld [vmem:[%s6476_s9 + $0x1cc] ss:$16 sps:$4 sm:$0xff]  }
 0x20f   : > { %v7329_v7 = vpop.f32.mrf.mxu1  ;;  %v1951_v20 = vadd.f32 %v7149_v54, %v1758_v58  ;;  %v2488_v22 = vmax.f32 %v1955_v45, 0.0  ;;  %v1772_v54 = vadd.f32 %v7196_v9, %v7143_v3 }
 0x210   : > { %v7336_v50 = vpop.f32.mrf.mxu0  ;;  %8525 = vst [vmem:[#allocation32_spill] sm:$0xff] %v7343_v1  ;;  %v2475_v27 = vmax.f32 %v1939_v4, 0.0  ;;  %v1953_v45 = vadd.f32 %v7156_v34, %v1760_v40 }
 0x211   : > { %v7338_v24 = vpop.f32.mrf.mxu1  ;;  %3928 = vmatpush1.bf16.msra.mxu0 %v5961_v53  ;;  %v2484_v14 = vmax.f32 %v1951_v20, 0.0 }
 0x212   : > { %v7346_v21 = vpop.f32.mrf.mxu0  ;;  %3929 = vmatprep.subr.bf16.mxu0 %v5966_v43  ;;  %v2487_v40 = vmax.f32 %v1953_v45, 0.0  ;;  %v5982_v45 = vld [vmem:[%s6476_s9 + $0x1a8] ss:$16 sps:$4 sm:$0xff]  }
 0x213   : > { %v7348_v16 = vpop.f32.mrf.mxu1  ;;  %v7390_v20 = vpack.c.bf16 %v2488_v22, %v2484_v14  ;;  %v5984_v22 = vld [vmem:[%s6476_s9 + $0x1ac] ss:$16 sps:$4 sm:$0xff]  }
 0x214   : > { %v7355_v53 = vpop.f32.mrf.mxu0  ;;  %3594 = vmatmul.mubr.bf16.gmra.mxu0 %v7343_v1 }
 0x215   : > { %v7357_v62 = vpop.f32.mrf.mxu1  ;;  %3603 = vmatprep.mubr.bf16.mxu0 %v7352_v51  ;;  %3930 = vmatpush1.bf16.msra.mxu0 %v5964_v36  ;;  %v1768_v36 = vadd.f32 %v7181_v46, %v7143_v3  ;;  %v1965_v51 = vadd.f32 %v7198_v33, %v1772_v54  ;;  %8528 = vst [vmem:[#allocation35_spill] sm:$0xff] %v7390_v20 }
 0x216   : > { %v7365_v43 = vpop.f32.mrf.mxu0  ;;  %3931 = vmatprep.subr.bf16.mxu0 %v5972_v17  ;;  %v7381_v17 = vpack.c.bf16 %v2479_v25, %v2475_v27  ;;  %v1949_v46 = vadd.f32 %v7136_v30, %v1756_v6  ;;  %v5979_v25 = vld [vmem:[%s6476_s9 + $0x1c8] ss:$16 sps:$4 sm:$0xff]   ;;  %v1770_v33 = vadd.f32 %v7189_v49, %v7168_v23  ;;  %v1766_v6 = vadd.f32 %v7170_v59, %v7168_v23  ;;  %v5990_v59 = vld [vmem:[%s6476_s9 + $0x18c] ss:$16 sps:$4 sm:$0xff]  }
 0x217   : > { %v7367_v13 = vpop.f32.mrf.mxu1  ;;  %v1961_v34 = vadd.f32 %v7183_v12, %v1768_v36  ;;  %v2496_v54 = vmax.f32 %v1965_v51, 0.0  ;;  %v1782_v12 = vadd.f32 %v7232_v60, %v7143_v3 }
 0x218   : > { %v7374_v19 = vpop.f32.mrf.mxu0  ;;  %8527 = vst [vmem:[#allocation34_spill] sm:$0xff] %v7381_v17  ;;  %v2483_v27 = vmax.f32 %v1949_v46, 0.0  ;;  %v1963_v51 = vadd.f32 %v7191_v37, %v1770_v33 }
 0x219   : > { %v7376_v58 = vpop.f32.mrf.mxu1  ;;  %3932 = vmatpush1.bf16.msra.mxu0 %v5970_v56  ;;  %v2492_v49 = vmax.f32 %v1961_v34, 0.0 }
 0x21a   : > { %v7384_v9 = vpop.f32.mrf.mxu0  ;;  %3933 = vmatprep.subr.bf16.mxu0 %v5975_v11  ;;  %v2495_v33 = vmax.f32 %v1963_v51, 0.0  ;;  %v5991_v51 = vld [vmem:[%s6476_s9 + $0x168] ss:$16 sps:$4 sm:$0xff]  }
 0x21b   : > { %v7386_v4 = vpop.f32.mrf.mxu1  ;;  %v7428_v34 = vpack.c.bf16 %v2496_v54, %v2492_v49  ;;  %v5993_v54 = vld [vmem:[%s6476_s9 + $0x16c] ss:$16 sps:$4 sm:$0xff]  }
 0x21c   : > { %v7393_v56 = vpop.f32.mrf.mxu0  ;;  %3604 = vmatmul.mubr.bf16.gmra.mxu0 %v7381_v17  ;;  %v8532_v17 = vld [vmem:[#allocation27_spill] sm:$0xff] }
 0x21d   : > { %v7395_v1 = vpop.f32.mrf.mxu1  ;;  %3613 = vmatprep.mubr.bf16.mxu0 %v7390_v20  ;;  %3934 = vmatpush2.bf16.msra.mxu0 %v5973_v39  ;;  %v1778_v39 = vadd.f32 %v7214_v63, %v7143_v3  ;;  %v1975_v20 = vadd.f32 %v7234_v52, %v1782_v12  ;;  %8531 = vst [vmem:[#allocation38_spill] sm:$0xff] %v7428_v34 }
 0x21e   : > { %8529 = vst [vmem:[#allocation36_spill] sm:$0xff] %v7395_v1  ;;  %v7403_v11 = vpop.f32.mrf.mxu0  ;;  %3935 = vmatprep.subr.bf16.mxu0 %v5981_v29  ;;  %v7419_v29 = vpack.c.bf16 %v2487_v40, %v2483_v27  ;;  %v1959_v63 = vadd.f32 %v8532_v17, %v1766_v6  ;;  %v5988_v40 = vld [vmem:[%s6476_s9 + $0x188] ss:$16 sps:$4 sm:$0xff]   ;;  %v1780_v52 = vadd.f32 %v7222_v5, %v7168_v23 }
 0x21f   : > { %v7405_v30 = vpop.f32.mrf.mxu1  ;;  %v1971_v37 = vadd.f32 %v7216_v35, %v1778_v39  ;;  %v2504_v12 = vmax.f32 %v1975_v20, 0.0  ;;  %v1792_v35 = vadd.f32 %v7270_v55, %v7143_v3  ;;  %v1776_v6 = vadd.f32 %v7204_v28, %v7168_v23  ;;  %v8536_v20 = vld [vmem:[#allocation21_spill] sm:$0xff]  ;;  %v5999_v28 = vld [vmem:[%s6476_s9 + $0x14c] ss:$16 sps:$4 sm:$0xff]  }
 0x220   : > { %v7412_v14 = vpop.f32.mrf.mxu0  ;;  %8530 = vst [vmem:[#allocation37_spill] sm:$0xff] %v7419_v29  ;;  %v2491_v27 = vmax.f32 %v1959_v63, 0.0 }
 0x221   : > { %v7414_v36 = vpop.f32.mrf.mxu1  ;;  %3936 = vmatpush2.bf16.msra.mxu0 %v5979_v25  ;;  %v2500_v5 = vmax.f32 %v1971_v37, 0.0 }
 0x222   : > { %v7422_v60 = vpop.f32.mrf.mxu0  ;;  %3937 = vmatprep.subr.bf16.mxu0 %v5984_v22 }
 0x223   : > { %v7424_v46 = vpop.f32.mrf.mxu1  ;;  %v7466_v37 = vpack.c.bf16 %v2504_v12, %v2500_v5  ;;  %v1786_v5 = vadd.f32 %v7241_v15, %v7168_v23  ;;  %v6008_v15 = vld [vmem:[%s6476_s9 + $0x10c] ss:$16 sps:$4 sm:$0xff]  }
 0x224   : > { %v7431_v25 = vpop.f32.mrf.mxu0  ;;  %3614 = vmatmul.mubr.bf16.gmra.mxu0 %v7419_v29  ;;  %v1985_v29 = vadd.f32 %v7272_v26, %v1792_v35  ;;  %v1790_v26 = vadd.f32 %v7260_v10, %v7168_v23 }
 0x225   : > { %v7433_v1 = vpop.f32.mrf.mxu1  ;;  %3623 = vmatprep.mubr.bf16.mxu0 %v7428_v34  ;;  %3938 = vmatpush2.bf16.msra.mxu0 %v5982_v45  ;;  %v1788_v45 = vadd.f32 %v7251_v48, %v7143_v3  ;;  %v1973_v34 = vadd.f32 %v8536_v20, %v1780_v52  ;;  %8537 = vst [vmem:[#allocation21_spill] sm:$0xff] %v7466_v37  ;;  %v5997_v52 = vld [vmem:[%s6476_s9 + $0x148] ss:$16 sps:$4 sm:$0xff]  }
 0x226   : > { %8533 = vst [vmem:[#allocation27_spill] sm:$0xff] %v7433_v1  ;;  %v7441_v22 = vpop.f32.mrf.mxu0  ;;  %3939 = vmatprep.subr.bf16.mxu0 %v5990_v59  ;;  %v7457_v59 = vpack.c.bf16 %v2495_v33, %v2491_v27  ;;  %v6002_v27 = vld [vmem:[%s6476_s9 + $0x12c] ss:$16 sps:$4 sm:$0xff]   ;;  %v6000_v20 = vld [vmem:[%s6476_s9 + $0x128] ss:$16 sps:$4 sm:$0xff]  }
 0x227   : > { %v7443_v17 = vpop.f32.mrf.mxu1  ;;  %v1981_v33 = vadd.f32 %v7253_v31, %v1788_v45  ;;  %v1802_v31 = vadd.f32 %v7308_v2, %v7143_v3 }
 0x228   : > { %v7450_v49 = vpop.f32.mrf.mxu0  ;;  %8535 = vst [vmem:[#allocation40_spill] sm:$0xff] %v7457_v59 }
 0x229   : > { %v7452_v39 = vpop.f32.mrf.mxu1  ;;  %3940 = vmatpush2.bf16.msra.mxu0 %v5988_v40  ;;  %v2508_v10 = vmax.f32 %v1981_v33, 0.0  ;;  %v8542_v33 = vld [vmem:[#allocation24_spill] sm:$0xff] }
 0x22a   : > { %8534 = vst [vmem:[#allocation39_spill] sm:$0xff] %v7452_v39  ;;  %v7460_v55 = vpop.f32.mrf.mxu0  ;;  %3941 = vmatprep.subr.bf16.mxu0 %v5993_v54  ;;  %v8538_v39 = vld [vmem:[#allocation20_spill] sm:$0xff]  ;;  %v2503_v54 = vmax.f32 %v1973_v34, 0.0 }
 0x22b   : > { %v7462_v63 = vpop.f32.mrf.mxu1  ;;  %v1969_v48 = vadd.f32 %v8538_v39, %v1776_v6  ;;  %v2512_v6 = vmax.f32 %v1985_v29, 0.0  ;;  %v1983_v29 = vadd.f32 %v7262_v38, %v1790_v26 }
 0x22c   : > { %v7469_v40 = vpop.f32.mrf.mxu0  ;;  %3624 = vmatmul.mubr.bf16.gmra.mxu0 %v7457_v59 }
 0x22d   : > { %v7471_v1 = vpop.f32.mrf.mxu1  ;;  %3633 = vmatprep.mubr.bf16.mxu0 %v7466_v37  ;;  %3942 = vmatpush2.bf16.msra.mxu0 %v5991_v51  ;;  %v2499_v39 = vmax.f32 %v1969_v48, 0.0  ;;  %v1798_v51 = vadd.f32 %v7289_v57, %v7143_v3  ;;  %v1995_v37 = vadd.f32 %v7310_v8, %v1802_v31  ;;  %v7504_v59 = vpack.c.bf16 %v2512_v6, %v2508_v10 }
 0x22e   : > { %8539 = vst [vmem:[#allocation20_spill] sm:$0xff] %v7471_v1  ;;  %v7479_v12 = vpop.f32.mrf.mxu0  ;;  %3943 = vmatprep.subr.bf16.mxu0 %v5999_v28  ;;  %v1979_v1 = vadd.f32 %v8542_v33, %v1786_v5  ;;  %v2511_v26 = vmax.f32 %v1983_v29, 0.0  ;;  %v1800_v8 = vadd.f32 %v7298_v44, %v7168_v23  ;;  %v8545_v5 = vld [vmem:[#allocation25_spill] sm:$0xff] }
 0x22f   : > { %v7481_v35 = vpop.f32.mrf.mxu1  ;;  %v7495_v28 = vpack.c.bf16 %v2503_v54, %v2499_v39  ;;  %8541 = vst [vmem:[#allocation42_spill] sm:$0xff] %v7504_v59  ;;  %v1991_v38 = vadd.f32 %v7291_v0, %v1798_v51  ;;  %v6006_v54 = vld [vmem:[%s6476_s9 + $0x108] ss:$16 sps:$4 sm:$0xff]   ;;  %v2520_v39 = vmax.f32 %v1995_v37, 0.0  ;;  %v1796_v51 = vadd.f32 %v7279_v32, %v7168_v23 }
 0x230   : > { %v7488_v45 = vpop.f32.mrf.mxu0  ;;  %v2507_v0 = vmax.f32 %v1979_v1, 0.0  ;;  %v1993_v37 = vadd.f32 %v7300_v41, %v1800_v8 }
 0x231   : > { %v7490_v34 = vpop.f32.mrf.mxu1  ;;  %3944 = vmatpush2.bf16.msra.mxu0 %v5997_v52  ;;  %8540 = vst [vmem:[#allocation41_spill] sm:$0xff] %v7495_v28  ;;  %v2516_v33 = vmax.f32 %v1991_v38, 0.0  ;;  %v1989_v38 = vadd.f32 %v7281_v42, %v1796_v51  ;;  %v1806_v51 = vadd.f32 %v7317_v61, %v7168_v23 }
 0x232   : > { %v7498_v2 = vpop.f32.mrf.mxu0  ;;  %3945 = vmatprep.subr.bf16.mxu0 %v6002_v27  ;;  %v1812_v27 = vadd.f32 %v7346_v21, %v7143_v3  ;;  %v8482_v21 = vsub.s32 2, %v8545_v5  ;;  %v2519_v8 = vmax.f32 %v1993_v37, 0.0 }
 0x233   : > { %v7500_v48 = vpop.f32.mrf.mxu1  ;;  %v7541_v10 = vpack.c.bf16 %v2520_v39, %v2516_v33 }
 0x234   : > { %v7507_v57 = vpop.f32.mrf.mxu0  ;;  %3634 = vmatmul.mubr.bf16.gmra.mxu0 %v7495_v28  ;;  %v2005_v1 = vadd.f32 %v7348_v16, %v1812_v27  ;;  %v8551_v28 = vld [vmem:[#allocation26_spill] sm:$0xff]  ;;  %v1810_v27 = vadd.f32 %v7336_v50, %v7168_v23  ;;  %v1818_v50 = vadd.f32 %v7365_v43, %v7143_v3 }
 0x235   : > { %8543 = vst [vmem:[#allocation24_spill] sm:$0xff] %v7507_v57  ;;  %v7509_v52 = vpop.f32.mrf.mxu1  ;;  %3643 = vmatprep.mubr.bf16.mxu0 %v7504_v59  ;;  %3946 = vmatpush2.bf16.msra.mxu0 %v6000_v20  ;;  %v1808_v20 = vadd.f32 %v7327_v47, %v7143_v3  ;;  %v7533_v59 = vpack.c.bf16 %v2511_v26, %v2507_v0  ;;  %8549 = vst [vmem:[#allocation47_spill] sm:$0xff] %v7541_v10  ;;  %v8550_v47 = vsub.s32 3, %v8545_v5 }
 0x236   : > { %8544 = vst [vmem:[#allocation43_spill] sm:$0xff] %v7509_v52  ;;  %v7519_v6 = vpop.f32.mrf.mxu0  ;;  %3947 = vmatprep.subr.bf16.mxu0 %v6008_v15  ;;  %v7553_v41 = vrot.slane %v8551_v28, %v8482_v21  ;;  %v2528_v39 = vmax.f32 %v2005_v1, 0.0 }
 0x237   : > { %v7521_v31 = vpop.f32.mrf.mxu1  ;;  %8548 = vst [vmem:[#allocation46_spill] sm:$0xff] %v7533_v59  ;;  %v7546_v52 = vrot.slane %v8551_v28, %v8550_v47  ;;  %v2515_v28 = vmax.f32 %v1989_v38, 0.0 }
 0x238   : > { %v7528_v29 = vpop.f32.mrf.mxu0 }
 0x239   : > { %8546 = vst [vmem:[#allocation44_spill] sm:$0xff] %v7528_v29  ;;  %v7530_v44 = vpop.f32.mrf.mxu1  ;;  %3948 = vmatpush2.bf16.msra.mxu0 %v6006_v54  ;;  %v2001_v54 = vadd.f32 %v7329_v7, %v1808_v20  ;;  %v1822_v7 = vadd.f32 %v7384_v9, %v7143_v3  ;;  %v7568_v21 = vpack.c.bf16 %v2519_v8, %v2515_v28 }
 0x23a   : > { %8547 = vst [vmem:[#allocation45_spill] sm:$0xff] %v7530_v44  ;;  %v7537_v15 = vpop.f32.mrf.mxu0  ;;  %v2003_v9 = vadd.f32 %v7338_v24, %v1810_v27  ;;  %v1999_v44 = vadd.f32 %v7319_v18, %v1806_v51  ;;  %v1816_v24 = vadd.f32 %v7355_v53, %v7168_v23  ;;  %v2011_v8 = vadd.f32 %v7367_v13, %v1818_v50 }
 0x23b   : > { %v7539_v32 = vpop.f32.mrf.mxu1  ;;  %v2524_v20 = vmax.f32 %v2001_v54, 0.0  ;;  %v2015_v61 = vadd.f32 %v7386_v4, %v1822_v7  ;;  %v1832_v18 = vadd.f32 %v7422_v60, %v7143_v3  ;;  %v1828_v51 = vadd.f32 %v7403_v11, %v7143_v3 }
 0x23c   : > { %v2091_v16 = vpop.f32.mrf.mxu0  ;;  %3644 = vmatmul.mubr.bf16.gmra.mxu0 %v7533_v59  ;;  %v2527_v4 = vmax.f32 %v2003_v9, 0.0  ;;  %v2523_v13 = vmax.f32 %v1999_v44, 0.0  ;;  %v2009_v60 = vadd.f32 %v7357_v62, %v1816_v24 }
 0x23d   : > { %v2284_v26 = vpop.f32.mrf.mxu1  ;;  %3653 = vmatprep.mubr.bf16.mxu0 %v7541_v10  ;;  %v2092_v33 = vadd.f32 %v2091_v16, %v7553_v41  ;;  %v7571_v38 = vpack.c.bf16 %v2528_v39, %v2524_v20  ;;  %v1820_v39 = vadd.f32 %v7374_v19, %v7168_v23  ;;  %v2536_v7 = vmax.f32 %v2015_v61, 0.0 }
 0x23e   : > { %v2093_v0 = vpop.f32.mrf.mxu0  ;;  %v7594_v9 = vpack.c.bf16 %v2527_v4, %v2523_v13  ;;  %v2025_v11 = vadd.f32 %v7424_v46, %v1832_v18  ;;  %v2531_v4 = vmax.f32 %v2009_v60, 0.0  ;;  %v5967_v18 = vld [vmem:[%s6476_s9 + $0x2c8] ss:$16 sps:$4 sm:$0xff]  }
 0x23f   : > { %v2286_v42 = vpop.f32.mrf.mxu1  ;;  %v2094_v5 = vadd.f32 %v2093_v0, %v7546_v52  ;;  %v2285_v57 = vadd.f32 %v2284_v26, %v2092_v33  ;;  %v2013_v44 = vadd.f32 %v7376_v58, %v1820_v39 }
 0x240   : > { %v2095_v47 = vpop.f32.mrf.mxu0 }
 0x241   : > { %v2288_v37 = vpop.f32.mrf.mxu1  ;;  %v2096_v1 = vadd.f32 %v2095_v47, %v7553_v41  ;;  %v2287_v54 = vadd.f32 %v2286_v42, %v2094_v5  ;;  %v2445_v20 = vmax.f32 %v2285_v57, 0.0 }
 0x242   : > { %v2097_v10 = vpop.f32.mrf.mxu0 }
 0x243   : > { %v2290_v0 = vpop.f32.mrf.mxu1  ;;  %v2289_v59 = vadd.f32 %v2288_v37, %v2096_v1  ;;  %v2098_v16 = vadd.f32 %v2097_v10, %v7546_v52  ;;  %v2446_v5 = vmax.f32 %v2287_v54, 0.0  ;;  %v5958_v1 = vld [vmem:[%s6476_s9 + $0x2e8] ss:$16 sps:$4 sm:$0xff]   ;;  %v5969_v54 = vld [vmem:[%s6476_s9 + $0x2cc] ss:$16 sps:$4 sm:$0xff]  }
 0x244   : > { %v2101_v43 = vpop.f32.mrf.mxu0  ;;  %3654 = vmatmul.mubr.bf16.gmra.mxu0 %v7568_v21 }
 0x245   : > { %v2294_v29 = vpop.f32.mrf.mxu1  ;;  %v2291_v27 = vadd.f32 %v2290_v0, %v2098_v16  ;;  %3663 = vmatprep.mubr.bf16.mxu0 %v7571_v38  ;;  %v2449_v10 = vmax.f32 %v2289_v59, 0.0  ;;  %v2102_v19 = vadd.f32 %v2101_v43, %v7553_v41  ;;  %v2532_v59 = vmax.f32 %v2011_v8, 0.0 }
 0x246   : > { %v2103_v26 = vpop.f32.mrf.mxu0  ;;  %v2021_v8 = vadd.f32 %v7405_v30, %v1828_v51 }
 0x247   : > { %v2296_v42 = vpop.f32.mrf.mxu1  ;;  %v2450_v28 = vmax.f32 %v2291_v27, 0.0  ;;  %v2104_v53 = vadd.f32 %v2103_v26, %v7546_v52  ;;  %v7598_v0 = vpack.c.bf16 %v2449_v10, %v2445_v20  ;;  %v7603_v24 = vpack.c.bf16 %v2536_v7, %v2532_v59 }
 0x248   : > { %v2105_v33 = vpop.f32.mrf.mxu0  ;;  %v2295_v27 = vadd.f32 %v2294_v29, %v2102_v19  ;;  %v2535_v10 = vmax.f32 %v2013_v44, 0.0  ;;  %v1830_v26 = vadd.f32 %v7412_v14, %v7168_v23  ;;  %v1826_v20 = vadd.f32 %v7393_v56, %v7168_v23 }
 0x249   : > { %v2298_v47 = vpop.f32.mrf.mxu1  ;;  %v2106_v37 = vadd.f32 %v2105_v33, %v7553_v41  ;;  %v7591_v50 = vpack.c.bf16 %v2450_v28, %v2446_v5  ;;  %v2297_v16 = vadd.f32 %v2296_v42, %v2104_v53  ;;  %v2544_v42 = vmax.f32 %v2025_v11, 0.0  ;;  %v5978_v5 = vld [vmem:[%s6476_s9 + $0x2ac] ss:$16 sps:$4 sm:$0xff]  }
 0x24a   : > { %v2107_v57 = vpop.f32.mrf.mxu0  ;;  %v1842_v28 = vadd.f32 %v7460_v55, %v7143_v3  ;;  %v2540_v19 = vmax.f32 %v2021_v8, 0.0  ;;  %v2453_v33 = vmax.f32 %v2295_v27, 0.0  ;;  %v1838_v59 = vadd.f32 %v7441_v22, %v7143_v3  ;;  %v8552_v27 = vld [vmem:[#allocation36_spill] sm:$0xff] }
 0x24b   : > { %v2300_v61 = vpop.f32.mrf.mxu1  ;;  %v2299_v62 = vadd.f32 %v2298_v47, %v2106_v37  ;;  %v2108_v43 = vadd.f32 %v2107_v57, %v7546_v52  ;;  %3756 = vmatprep.mubr.bf16.mxu1 %v7591_v50  ;;  %v2454_v53 = vmax.f32 %v2297_v16, 0.0  ;;  %v7625_v44 = vpack.c.bf16 %v2535_v10, %v2531_v4  ;;  %v5987_v16 = vld [vmem:[%s6476_s9 + $0x28c] ss:$16 sps:$4 sm:$0xff]  }
 0x24c   : > { %v2111_v58 = vpop.f32.mrf.mxu0  ;;  %3664 = vmatmul.mubr.bf16.gmra.mxu0 %v7594_v9  ;;  %3757 = vmatmul.mubr.bf16.vlgmr.msra.gmra.mxu1 %v7598_v0  ;;  %v2023_v56 = vadd.f32 %v7414_v36, %v1830_v26  ;;  %v2035_v22 = vadd.f32 %v7462_v63, %v1842_v28  ;;  %v1836_v63 = vadd.f32 %v7431_v25, %v7168_v23  ;;  %v5985_v26 = vld [vmem:[%s6476_s9 + $0x288] ss:$16 sps:$4 sm:$0xff]   ;;  %v5996_v28 = vld [vmem:[%s6476_s9 + $0x26c] ss:$16 sps:$4 sm:$0xff]  }
 0x24d   : > { %v2304_v46 = vpop.f32.mrf.mxu1  ;;  %v2301_v39 = vadd.f32 %v2300_v61, %v2108_v43  ;;  %3673 = vmatprep.mubr.bf16.mxu0 %v7603_v24  ;;  %4111 = vmatpush1.bf16.msra.mxu1 %v5958_v1  ;;  %v2457_v30 = vmax.f32 %v2299_v62, 0.0  ;;  %v2112_v14 = vadd.f32 %v2111_v58, %v7553_v41  ;;  %v5976_v1 = vld [vmem:[%s6476_s9 + $0x2a8] ss:$16 sps:$4 sm:$0xff]   ;;  %v2019_v58 = vadd.f32 %v8552_v27, %v1826_v20 }
 0x24e   : > { %v2113_v29 = vpop.f32.mrf.mxu0  ;;  %4112 = vmatprep.subr.bf16.mxu1 %v5969_v54  ;;  %v7630_v54 = vpack.c.bf16 %v2544_v42, %v2540_v19  ;;  %v2543_v42 = vmax.f32 %v2023_v56, 0.0  ;;  %v2552_v25 = vmax.f32 %v2035_v22, 0.0  ;;  %v1848_v20 = vadd.f32 %v7479_v12, %v7143_v3 }
 0x24f   : > { %v2306_v7 = vpop.f32.mrf.mxu1  ;;  %v2458_v13 = vmax.f32 %v2301_v39, 0.0  ;;  %v2114_v51 = vadd.f32 %v2113_v29, %v7546_v52  ;;  %v7628_v11 = vpack.c.bf16 %v2457_v30, %v2453_v33  ;;  %v2305_v36 = vadd.f32 %v2304_v46, %v2112_v14  ;;  %v8553_v14 = vld [vmem:[#allocation27_spill] sm:$0xff] }
 0x250   : > { %v2115_v47 = vpop.f32.mrf.mxu0  ;;  %v1840_v46 = vadd.f32 %v7450_v49, %v7168_v23  ;;  %v1852_v30 = vadd.f32 %v7498_v2, %v7143_v3 }
 0x251   : > { %v2308_v60 = vpop.f32.mrf.mxu1  ;;  %v2116_v37 = vadd.f32 %v2115_v47, %v7553_v41  ;;  %v7622_v55 = vpack.c.bf16 %v2458_v13, %v2454_v53  ;;  %4113 = vmatpush1.bf16.msra.mxu1 %v5967_v18  ;;  %v2307_v62 = vadd.f32 %v2306_v7, %v2114_v51  ;;  %v2031_v18 = vadd.f32 %v7443_v17, %v1838_v59 }
 0x252   : > { %v2117_v57 = vpop.f32.mrf.mxu0  ;;  %4114 = vmatprep.subr.bf16.mxu1 %v5978_v5  ;;  %v2539_v51 = vmax.f32 %v2019_v58, 0.0  ;;  %v2461_v19 = vmax.f32 %v2305_v36, 0.0  ;;  %v2029_v47 = vadd.f32 %v8553_v14, %v1836_v63  ;;  %v2045_v12 = vadd.f32 %v7500_v48, %v1852_v30  ;;  %v6009_v14 = vld [vmem:[%s6476_s9 + $0x228] ss:$16 sps:$4 sm:$0xff]  }
 0x253   : > { %v2310_v61 = vpop.f32.mrf.mxu1  ;;  %v2309_v43 = vadd.f32 %v2308_v60, %v2116_v37  ;;  %v2118_v8 = vadd.f32 %v2117_v57, %v7546_v52  ;;  %3766 = vmatprep.mubr.bf16.mxu1 %v7622_v55  ;;  %v2462_v17 = vmax.f32 %v2307_v62, 0.0  ;;  %v2548_v60 = vmax.f32 %v2031_v18, 0.0  ;;  %v8554_v57 = vld [vmem:[#allocation39_spill] sm:$0xff] }
 0x254   : > { %v2121_v4 = vpop.f32.mrf.mxu0  ;;  %3674 = vmatmul.mubr.bf16.gmra.mxu0 %v7625_v44  ;;  %3767 = vmatmul.mubr.bf16.gmra.mxu1 %v7628_v11  ;;  %v7658_v56 = vpack.c.bf16 %v2543_v42, %v2539_v51  ;;  %v6003_v42 = vld [vmem:[%s6476_s9 + $0x248] ss:$16 sps:$4 sm:$0xff]   ;;  %v1850_v30 = vadd.f32 %v7488_v45, %v7168_v23 }
 0x255   : > { %v2314_v39 = vpop.f32.mrf.mxu1  ;;  %v2311_v10 = vadd.f32 %v2310_v61, %v2118_v8  ;;  %3683 = vmatprep.mubr.bf16.mxu0 %v7630_v54  ;;  %4115 = vmatpush1.bf16.msra.mxu1 %v5976_v1  ;;  %v2465_v29 = vmax.f32 %v2309_v43, 0.0  ;;  %v2122_v49 = vadd.f32 %v2121_v4, %v7553_v41  ;;  %v5994_v1 = vld [vmem:[%s6476_s9 + $0x268] ss:$16 sps:$4 sm:$0xff]   ;;  %v2033_v61 = vadd.f32 %v8554_v57, %v1840_v46  ;;  %v6005_v43 = vld [vmem:[%s6476_s9 + $0x24c] ss:$16 sps:$4 sm:$0xff]  }
 0x256   : > { %v2123_v7 = vpop.f32.mrf.mxu0  ;;  %4116 = vmatprep.subr.bf16.mxu1 %v5987_v16  ;;  %v7667_v36 = vpack.c.bf16 %v2552_v25, %v2548_v60  ;;  %v2041_v4 = vadd.f32 %v7481_v35, %v1848_v20 }
 0x257   : > { %v2316_v5 = vpop.f32.mrf.mxu1  ;;  %v2466_v53 = vmax.f32 %v2311_v10, 0.0  ;;  %v2124_v13 = vadd.f32 %v2123_v7, %v7546_v52  ;;  %v7662_v16 = vpack.c.bf16 %v2465_v29, %v2461_v19  ;;  %v2315_v63 = vadd.f32 %v2314_v39, %v2122_v49 }
 0x258   : > { %v2125_v2 = vpop.f32.mrf.mxu0  ;;  %v2547_v10 = vmax.f32 %v2029_v47, 0.0  ;;  %v2551_v46 = vmax.f32 %v2033_v61, 0.0  ;;  %v2560_v29 = vmax.f32 %v2045_v12, 0.0  ;;  %v2556_v51 = vmax.f32 %v2041_v4, 0.0  ;;  %v6014_v61 = vld [vmem:[%s6476_s9 + $0x20c] ss:$16 sps:$4 sm:$0xff]  }
 0x259   : > { %v2318_v33 = vpop.f32.mrf.mxu1  ;;  %v2126_v59 = vadd.f32 %v2125_v2, %v7553_v41  ;;  %v7655_v37 = vpack.c.bf16 %v2466_v53, %v2462_v17  ;;  %4117 = vmatpush1.bf16.msra.mxu1 %v5985_v26  ;;  %v2317_v8 = vadd.f32 %v2316_v5, %v2124_v13  ;;  %v6011_v5 = vld [vmem:[%s6476_s9 + $0x22c] ss:$16 sps:$4 sm:$0xff]   ;;  %v1846_v13 = vadd.f32 %v7469_v40, %v7168_v23 }
 0x25a   : > { %v2127_v22 = vpop.f32.mrf.mxu0  ;;  %4118 = vmatprep.subr.bf16.mxu1 %v5996_v28  ;;  %v1862_v28 = vadd.f32 %v7537_v15, %v7143_v3  ;;  %v2469_v20 = vmax.f32 %v2315_v63, 0.0  ;;  %v1858_v2 = vadd.f32 %v7519_v6, %v7143_v3  ;;  %v7689_v47 = vpack.c.bf16 %v2551_v46, %v2547_v10  ;;  %v6017_v46 = vld [vmem:[%s6476_s9 + $0x3ec] ss:$16 sps:$4 sm:$0xff]  }
 0x25b   : > { %v2320_v62 = vpop.f32.mrf.mxu1  ;;  %v2319_v27 = vadd.f32 %v2318_v33, %v2126_v59  ;;  %v2128_v58 = vadd.f32 %v2127_v22, %v7546_v52  ;;  %3776 = vmatprep.mubr.bf16.mxu1 %v7655_v37  ;;  %v2470_v25 = vmax.f32 %v2317_v8, 0.0  ;;  %v2043_v40 = vadd.f32 %v7490_v34, %v1850_v30 }
 0x25c   : > { %v2131_v18 = vpop.f32.mrf.mxu0  ;;  %3684 = vmatmul.mubr.bf16.gmra.mxu0 %v7658_v56  ;;  %3777 = vmatmul.mubr.bf16.gmra.mxu1 %v7662_v16  ;;  %v7694_v57 = vpack.c.bf16 %v2560_v29, %v2556_v51  ;;  %v2055_v3 = vadd.f32 %v7539_v32, %v1862_v28  ;;  %v6012_v32 = vld [vmem:[%s6476_s9 + $0x208] ss:$16 sps:$4 sm:$0xff]  }
 0x25d   : > { %v2324_v48 = vpop.f32.mrf.mxu1  ;;  %v2321_v26 = vadd.f32 %v2320_v62, %v2128_v58  ;;  %3693 = vmatprep.mubr.bf16.mxu0 %v7667_v36  ;;  %4119 = vmatpush1.bf16.msra.mxu1 %v5994_v1  ;;  %v2473_v35 = vmax.f32 %v2319_v27, 0.0  ;;  %v2132_v45 = vadd.f32 %v2131_v18, %v7553_v41  ;;  %v8555_v62 = vld [vmem:[#allocation20_spill] sm:$0xff]  ;;  %v2051_v58 = vadd.f32 %v7521_v31, %v1858_v2 }
 0x25e   : > { %v2133_v39 = vpop.f32.mrf.mxu0  ;;  %4120 = vmatprep.subr.bf16.mxu1 %v6005_v43  ;;  %v2039_v43 = vadd.f32 %v8555_v62, %v1846_v13  ;;  %v2559_v63 = vmax.f32 %v2043_v40, 0.0  ;;  %v8556_v18 = vld [vmem:[#allocation44_spill] sm:$0xff]  ;;  %v2568_v30 = vmax.f32 %v2055_v3, 0.0 }
 0x25f   : > { %v2326_v7 = vpop.f32.mrf.mxu1  ;;  %v2474_v17 = vmax.f32 %v2321_v26, 0.0  ;;  %v2134_v53 = vadd.f32 %v2133_v39, %v7546_v52  ;;  %v7692_v60 = vpack.c.bf16 %v2473_v35, %v2469_v20  ;;  %v2325_v34 = vadd.f32 %v2324_v48, %v2132_v45  ;;  %v6015_v45 = vld [vmem:[%s6476_s9 + $0x3e8] ss:$16 sps:$4 sm:$0xff]   ;;  %v6020_v40 = vld [vmem:[%s6476_s9 + $0x3cc] ss:$16 sps:$4 sm:$0xff]  }
 0x260   : > { %v2135_v19 = vpop.f32.mrf.mxu0  ;;  %v1860_v10 = vadd.f32 %v8556_v18, %v7168_v23  ;;  %v2555_v39 = vmax.f32 %v2039_v43, 0.0  ;;  %v2564_v13 = vmax.f32 %v2051_v58, 0.0  ;;  %v6023_v18 = vld [vmem:[%s6476_s9 + $0x3ac] ss:$16 sps:$4 sm:$0xff]  }
 0x261   : > { %v2328_v49 = vpop.f32.mrf.mxu1  ;;  %v2136_v33 = vadd.f32 %v2135_v19, %v7553_v41  ;;  %v7686_v15 = vpack.c.bf16 %v2474_v17, %v2470_v25  ;;  %4121 = vmatpush1.bf16.msra.mxu1 %v6003_v42  ;;  %v2327_v6 = vadd.f32 %v2326_v7, %v2134_v53  ;;  %v8557_v7 = vld [vmem:[#allocation24_spill] sm:$0xff]  ;;  %v2477_v28 = vmax.f32 %v2325_v34, 0.0 }
 0x262   : > { %v2137_v59 = vpop.f32.mrf.mxu0  ;;  %4122 = vmatprep.subr.bf16.mxu1 %v6011_v5  ;;  %v1856_v5 = vadd.f32 %v8557_v7, %v7168_v23  ;;  %v7717_v19 = vpack.c.bf16 %v2559_v63, %v2555_v39  ;;  %v7725_v3 = vpack.c.bf16 %v2568_v30, %v2564_v13  ;;  %v6021_v39 = vld [vmem:[%s6476_s9 + $0x3a8] ss:$16 sps:$4 sm:$0xff]  }
 0x263   : > { %v2330_v1 = vpop.f32.mrf.mxu1  ;;  %v2329_v12 = vadd.f32 %v2328_v49, %v2136_v33  ;;  %v2138_v22 = vadd.f32 %v2137_v59, %v7546_v52  ;;  %3786 = vmatprep.mubr.bf16.mxu1 %v7686_v15  ;;  %v2478_v29 = vmax.f32 %v2327_v6, 0.0  ;;  %v8558_v49 = vld [vmem:[#allocation45_spill] sm:$0xff]  ;;  %v8559_v6 = vld [vmem:[#allocation43_spill] sm:$0xff] }
 0x264   : > { %v2141_v8 = vpop.f32.mrf.mxu0  ;;  %3694 = vmatmul.mubr.bf16.gmra.mxu0 %v7689_v47  ;;  %3787 = vmatmul.mubr.bf16.gmra.mxu1 %v7692_v60  ;;  %v2053_v2 = vadd.f32 %v8558_v49, %v1860_v10 }
 0x265   : > { %v2334_v27 = vpop.f32.mrf.mxu1  ;;  %v2331_v4 = vadd.f32 %v2330_v1, %v2138_v22  ;;  %3703 = vmatprep.mubr.bf16.mxu0 %v7694_v57  ;;  %4123 = vmatpush1.bf16.msra.mxu1 %v6009_v14  ;;  %v2481_v26 = vmax.f32 %v2329_v12, 0.0  ;;  %v2142_v25 = vadd.f32 %v2141_v8, %v7553_v41  ;;  %v2049_v12 = vadd.f32 %v8559_v6, %v1856_v5  ;;  %v6018_v8 = vld [vmem:[%s6476_s9 + $0x3c8] ss:$16 sps:$4 sm:$0xff]   ;;  %v6029_v6 = vld [vmem:[%s6476_s9 + $0x36c] ss:$16 sps:$4 sm:$0xff]  }
 0x266   : > { %v2143_v48 = vpop.f32.mrf.mxu0  ;;  %4124 = vmatprep.subr.bf16.mxu1 %v6014_v61  ;;  %v2567_v58 = vmax.f32 %v2053_v2, 0.0 }
 0x267   : > { %v2336_v42 = vpop.f32.mrf.mxu1  ;;  %v2482_v35 = vmax.f32 %v2331_v4, 0.0  ;;  %v2144_v31 = vadd.f32 %v2143_v48, %v7546_v52  ;;  %v7720_v33 = vpack.c.bf16 %v2481_v26, %v2477_v28  ;;  %v2335_v22 = vadd.f32 %v2334_v27, %v2142_v25 }
 0x268   : > { %v2145_v17 = vpop.f32.mrf.mxu0  ;;  %v2563_v48 = vmax.f32 %v2049_v12, 0.0 }
 0x269   : > { %v2338_v53 = vpop.f32.mrf.mxu1  ;;  %v2146_v51 = vadd.f32 %v2145_v17, %v7553_v41  ;;  %v7714_v20 = vpack.c.bf16 %v2482_v35, %v2478_v29  ;;  %4125 = vmatpush1.bf16.msra.mxu1 %v6012_v32  ;;  %v2337_v59 = vadd.f32 %v2336_v42, %v2144_v31  ;;  %v2485_v42 = vmax.f32 %v2335_v22, 0.0  ;;  %v6026_v17 = vld [vmem:[%s6476_s9 + $0x38c] ss:$16 sps:$4 sm:$0xff]  }
 0x26a   : > { %v2147_v23 = vpop.f32.mrf.mxu0  ;;  %4126 = vmatprep.subr.bf16.mxu1 %v6017_v46  ;;  %v7739_v7 = vpack.c.bf16 %v2567_v58, %v2563_v48 }
 0x26b   : > { %v2340_v14 = vpop.f32.mrf.mxu1  ;;  %v2339_v1 = vadd.f32 %v2338_v53, %v2146_v51  ;;  %v2148_v61 = vadd.f32 %v2147_v23, %v7546_v52  ;;  %3796 = vmatprep.mubr.bf16.mxu1 %v7714_v20  ;;  %v2486_v10 = vmax.f32 %v2337_v59, 0.0 }
 0x26c   : > { %v2151_v62 = vpop.f32.mrf.mxu0  ;;  %3704 = vmatmul.mubr.bf16.gmra.mxu0 %v7717_v19  ;;  %3797 = vmatmul.mubr.bf16.gmra.mxu1 %v7720_v33 }
 0x26d   : > { %v2344_v43 = vpop.f32.mrf.mxu1  ;;  %v2341_v34 = vadd.f32 %v2340_v14, %v2148_v61  ;;  %3713 = vmatprep.mubr.bf16.mxu0 %v7725_v3  ;;  %4127 = vmatpush2.bf16.msra.mxu1 %v6015_v45  ;;  %v2489_v4 = vmax.f32 %v2339_v1, 0.0  ;;  %v2152_v46 = vadd.f32 %v2151_v62, %v7553_v41  ;;  %v8560_v14 = vld [vmem:[#allocation19_spill] sm:$0xff] }
 0x26e   : > { %v2153_v32 = vpop.f32.mrf.mxu0  ;;  %4128 = vmatprep.subr.bf16.mxu1 %v6020_v40  ;;  %v6024_v40 = vld [vmem:[%s6476_s9 + $0x388] ss:$16 sps:$4 sm:$0xff]  }
 0x26f   : > { %v2346_v63 = vpop.f32.mrf.mxu1  ;;  %v2490_v27 = vmax.f32 %v2341_v34, 0.0  ;;  %v2154_v26 = vadd.f32 %v2153_v32, %v7546_v52  ;;  %v7741_v5 = vpack.c.bf16 %v2489_v4, %v2485_v42  ;;  %v2345_v45 = vadd.f32 %v2344_v43, %v2152_v46 }
 0x270   : > { %v2155_v30 = vpop.f32.mrf.mxu0 }
 0x271   : > { %v2348_v29 = vpop.f32.mrf.mxu1  ;;  %v2156_v35 = vadd.f32 %v2155_v30, %v7553_v41  ;;  %v7736_v31 = vpack.c.bf16 %v2490_v27, %v2486_v10  ;;  %4129 = vmatpush2.bf16.msra.mxu1 %v6018_v8  ;;  %v2347_v53 = vadd.f32 %v2346_v63, %v2154_v26  ;;  %v2493_v43 = vmax.f32 %v2345_v45, 0.0  ;;  %v6027_v63 = vld [vmem:[%s6476_s9 + $0x368] ss:$16 sps:$4 sm:$0xff]   ;;  %v6032_v26 = vld [vmem:[%s6476_s9 + $0x34c] ss:$16 sps:$4 sm:$0xff]  }
 0x272   : > { %v2157_v28 = vpop.f32.mrf.mxu0  ;;  %4130 = vmatprep.subr.bf16.mxu1 %v6023_v18  ;;  %v6035_v45 = vld [vmem:[%s6476_s9 + $0x32c] ss:$16 sps:$4 sm:$0xff]  }
 0x273   : > { %v2350_v25 = vpop.f32.mrf.mxu1  ;;  %v2349_v13 = vadd.f32 %v2348_v29, %v2156_v35  ;;  %v2158_v51 = vadd.f32 %v2157_v28, %v7546_v52  ;;  %3806 = vmatprep.mubr.bf16.mxu1 %v7736_v31  ;;  %v2494_v12 = vmax.f32 %v2347_v53, 0.0 }
 0x274   : > { %v2161_v49 = vpop.f32.mrf.mxu0  ;;  %3714 = vmatmul.mubr.bf16.gmra.mxu0 %v7739_v7  ;;  %3807 = vmatmul.mubr.bf16.gmra.mxu1 %v7741_v5 }
 0x275   : > { %v2354_v2 = vpop.f32.mrf.mxu1  ;;  %v2351_v23 = vadd.f32 %v2350_v25, %v2158_v51  ;;  %3949 = vmatprep.mubr.bf16.mxu0 %v8560_v14  ;;  %4131 = vmatpush2.bf16.msra.mxu1 %v6021_v39  ;;  %v2497_v59 = vmax.f32 %v2349_v13, 0.0  ;;  %v2162_v34 = vadd.f32 %v2161_v49, %v7553_v41  ;;  %v8561_v39 = vld [vmem:[#allocation22_spill] sm:$0xff]  ;;  %v8562_v25 = vld [vmem:[#allocation23_spill] sm:$0xff] }
 0x276   : > { %v2163_v1 = vpop.f32.mrf.mxu0  ;;  %4132 = vmatprep.subr.bf16.mxu1 %v6026_v17  ;;  %v6030_v17 = vld [vmem:[%s6476_s9 + $0x348] ss:$16 sps:$4 sm:$0xff]  }
 0x277   : > { %v2356_v61 = vpop.f32.mrf.mxu1  ;;  %v2498_v22 = vmax.f32 %v2351_v23, 0.0  ;;  %v2164_v62 = vadd.f32 %v2163_v1, %v7546_v52  ;;  %v7757_v18 = vpack.c.bf16 %v2497_v59, %v2493_v43  ;;  %v2355_v30 = vadd.f32 %v2354_v2, %v2162_v34  ;;  %v6038_v34 = vld [vmem:[%s6476_s9 + $0x30c] ss:$16 sps:$4 sm:$0xff]  }
 0x278   : > { %v2165_v8 = vpop.f32.mrf.mxu0 }
 0x279   : > { %v2358_v58 = vpop.f32.mrf.mxu1  ;;  %v2166_v4 = vadd.f32 %v2165_v8, %v7553_v41  ;;  %v7754_v32 = vpack.c.bf16 %v2498_v22, %v2494_v12  ;;  %4133 = vmatpush2.bf16.msra.mxu1 %v6024_v40  ;;  %v2357_v48 = vadd.f32 %v2356_v61, %v2164_v62  ;;  %v2501_v14 = vmax.f32 %v2355_v30, 0.0  ;;  %v6033_v12 = vld [vmem:[%s6476_s9 + $0x328] ss:$16 sps:$4 sm:$0xff]  }
 0x27a   : > { %v2167_v10 = vpop.f32.mrf.mxu0  ;;  %4134 = vmatprep.subr.bf16.mxu1 %v6029_v6 }
 0x27b   : > { %v2360_v27 = vpop.f32.mrf.mxu1  ;;  %v2359_v42 = vadd.f32 %v2358_v58, %v2166_v4  ;;  %v2168_v46 = vadd.f32 %v2167_v10, %v7546_v52  ;;  %3816 = vmatprep.mubr.bf16.mxu1 %v7754_v32  ;;  %v2502_v49 = vmax.f32 %v2357_v48, 0.0 }
 0x27c   : > { %v2171_v29 = vpop.f32.mrf.mxu0  ;;  %3817 = vmatmul.mubr.bf16.gmra.mxu1 %v7757_v18  ;;  %3950 = vmatmul.mubr.bf16.vlgmr.msra.gmra.mxu0 %v8561_v39 }
 0x27d   : > { %v2364_v35 = vpop.f32.mrf.mxu1  ;;  %v2361_v28 = vadd.f32 %v2360_v27, %v2168_v46  ;;  %3959 = vmatprep.mubr.bf16.mxu0 %v8562_v25  ;;  %4135 = vmatpush2.bf16.msra.mxu1 %v6027_v63  ;;  %v2505_v53 = vmax.f32 %v2359_v42, 0.0  ;;  %v2172_v40 = vadd.f32 %v2171_v29, %v7553_v41  ;;  %v8564_v42 = vld [vmem:[#allocation29_spill] sm:$0xff] }
 0x27e   : > { %v2173_v13 = vpop.f32.mrf.mxu0  ;;  %4136 = vmatprep.subr.bf16.mxu1 %v6032_v26  ;;  %v8563_v26 = vld [vmem:[#allocation28_spill] sm:$0xff]  ;;  %v6036_v46 = vld [vmem:[%s6476_s9 + $0x308] ss:$16 sps:$4 sm:$0xff]  }
 0x27f   : > { %v2366_v51 = vpop.f32.mrf.mxu1  ;;  %v2506_v2 = vmax.f32 %v2361_v28, 0.0  ;;  %v2174_v23 = vadd.f32 %v2173_v13, %v7546_v52  ;;  %v7773_v22 = vpack.c.bf16 %v2505_v53, %v2501_v14  ;;  %v2365_v63 = vadd.f32 %v2364_v35, %v2172_v40 }
 0x280   : > { %v2175_v59 = vpop.f32.mrf.mxu0 }
 0x281   : > { %v2368_v1 = vpop.f32.mrf.mxu1  ;;  %v2176_v61 = vadd.f32 %v2175_v59, %v7553_v41  ;;  %v7770_v6 = vpack.c.bf16 %v2506_v2, %v2502_v49  ;;  %4137 = vmatpush2.bf16.msra.mxu1 %v6030_v17  ;;  %v2367_v8 = vadd.f32 %v2366_v51, %v2174_v23  ;;  %v2509_v35 = vmax.f32 %v2365_v63, 0.0 }
 0x282   : > { %v2177_v62 = vpop.f32.mrf.mxu0  ;;  %4138 = vmatprep.subr.bf16.mxu1 %v6035_v45 }
 0x283   : > { %v2370_v43 = vpop.f32.mrf.mxu1  ;;  %v2369_v58 = vadd.f32 %v2368_v1, %v2176_v61  ;;  %v2178_v4 = vadd.f32 %v2177_v62, %v7546_v52  ;;  %3826 = vmatprep.mubr.bf16.mxu1 %v7770_v6  ;;  %v2510_v28 = vmax.f32 %v2367_v8, 0.0  ;;  %v8566_v8 = vld [vmem:[#allocation31_spill] sm:$0xff] }
 0x284   : > { %v2181_v10 = vpop.f32.mrf.mxu0  ;;  %3827 = vmatmul.mubr.bf16.gmra.mxu1 %v7773_v22  ;;  %3960 = vmatmul.mubr.bf16.gmra.mxu0 %v8563_v26 }
 0x285   : > { %v2374_v27 = vpop.f32.mrf.mxu1  ;;  %v2371_v48 = vadd.f32 %v2370_v43, %v2178_v4  ;;  %3969 = vmatprep.mubr.bf16.mxu0 %v8564_v42  ;;  %4139 = vmatpush2.bf16.msra.mxu1 %v6033_v12  ;;  %v2513_v30 = vmax.f32 %v2369_v58, 0.0  ;;  %v2182_v53 = vadd.f32 %v2181_v10, %v7553_v41  ;;  %v8565_v43 = vld [vmem:[#allocation30_spill] sm:$0xff] }
 0x286   : > { %v2183_v29 = vpop.f32.mrf.mxu0  ;;  %4140 = vmatprep.subr.bf16.mxu1 %v6038_v34 }
 0x287   : > { %v2376_v39 = vpop.f32.mrf.mxu1  ;;  %v2514_v25 = vmax.f32 %v2371_v48, 0.0  ;;  %v2184_v17 = vadd.f32 %v2183_v29, %v7546_v52  ;;  %v7787_v2 = vpack.c.bf16 %v2513_v30, %v2509_v35  ;;  %v2375_v61 = vadd.f32 %v2374_v27, %v2182_v53 }
 0x288   : > { %v2185_v13 = vpop.f32.mrf.mxu0 }
 0x289   : > { %v2378_v51 = vpop.f32.mrf.mxu1  ;;  %v2186_v45 = vadd.f32 %v2185_v13, %v7553_v41  ;;  %v7785_v49 = vpack.c.bf16 %v2514_v25, %v2510_v28  ;;  %4141 = vmatpush2.bf16.msra.mxu1 %v6036_v46  ;;  %v2377_v40 = vadd.f32 %v2376_v39, %v2184_v17  ;;  %v2517_v42 = vmax.f32 %v2375_v61, 0.0 }
 0x28a   : > { %v2187_v23 = vpop.f32.mrf.mxu0 }
 0x28b   : > { %v2380_v14 = vpop.f32.mrf.mxu1  ;;  %v2379_v59 = vadd.f32 %v2378_v51, %v2186_v45  ;;  %v2188_v1 = vadd.f32 %v2187_v23, %v7546_v52  ;;  %3836 = vmatprep.mubr.bf16.mxu1 %v7785_v49  ;;  %v2518_v10 = vmax.f32 %v2377_v40, 0.0 }
 0x28c   : > { %v2191_v12 = vpop.f32.mrf.mxu0  ;;  %3837 = vmatmul.mubr.bf16.gmra.mxu1 %v7787_v2  ;;  %3970 = vmatmul.mubr.bf16.gmra.mxu0 %v8565_v43 }
 0x28d   : > { %v2384_v62 = vpop.f32.mrf.mxu1  ;;  %v2381_v34 = vadd.f32 %v2380_v14, %v2188_v1  ;;  %3979 = vmatprep.mubr.bf16.mxu0 %v8566_v8  ;;  %v2521_v58 = vmax.f32 %v2379_v59, 0.0  ;;  %v2192_v46 = vadd.f32 %v2191_v12, %v7553_v41  ;;  %v8567_v14 = vld [vmem:[#allocation32_spill] sm:$0xff]  ;;  %v8568_v59 = vld [vmem:[#allocation33_spill] sm:$0xff] }
 0x28e   : > { %v2193_v4 = vpop.f32.mrf.mxu0 }
 0x28f   : > { %v2386_v63 = vpop.f32.mrf.mxu1  ;;  %v2522_v26 = vmax.f32 %v2381_v34, 0.0  ;;  %v2194_v48 = vadd.f32 %v2193_v4, %v7546_v52  ;;  %v7799_v28 = vpack.c.bf16 %v2521_v58, %v2517_v42  ;;  %v2385_v51 = vadd.f32 %v2384_v62, %v2192_v46 }
 0x290   : > { %v2195_v27 = vpop.f32.mrf.mxu0 }
 0x291   : > { %v2388_v30 = vpop.f32.mrf.mxu1  ;;  %v2196_v29 = vadd.f32 %v2195_v27, %v7553_v41  ;;  %v7797_v39 = vpack.c.bf16 %v2522_v26, %v2518_v10  ;;  %v2387_v35 = vadd.f32 %v2386_v63, %v2194_v48  ;;  %v2525_v58 = vmax.f32 %v2385_v51, 0.0  ;;  %v8570_v51 = vld [vmem:[#allocation35_spill] sm:$0xff] }
 0x292   : > { %v2197_v25 = vpop.f32.mrf.mxu0 }
 0x293   : > { %v2390_v17 = vpop.f32.mrf.mxu1  ;;  %v2389_v53 = vadd.f32 %v2388_v30, %v2196_v29  ;;  %v2198_v13 = vadd.f32 %v2197_v25, %v7546_v52  ;;  %3846 = vmatprep.mubr.bf16.mxu1 %v7797_v39  ;;  %v2526_v43 = vmax.f32 %v2387_v35, 0.0 }
 0x294   : > { %v2201_v45 = vpop.f32.mrf.mxu0  ;;  %3847 = vmatmul.mubr.bf16.gmra.mxu1 %v7799_v28  ;;  %3980 = vmatmul.mubr.bf16.gmra.mxu0 %v8567_v14 }
 0x295   : > { %v2394_v23 = vpop.f32.mrf.mxu1  ;;  %v2391_v40 = vadd.f32 %v2390_v17, %v2198_v13  ;;  %3989 = vmatprep.mubr.bf16.mxu0 %v8568_v59  ;;  %v2529_v1 = vmax.f32 %v2389_v53, 0.0  ;;  %v2202_v4 = vadd.f32 %v2201_v45, %v7553_v41  ;;  %v8569_v53 = vld [vmem:[#allocation34_spill] sm:$0xff] }
 0x296   : > { %v2203_v61 = vpop.f32.mrf.mxu0 }
 0x297   : > { %v2396_v12 = vpop.f32.mrf.mxu1  ;;  %v2530_v34 = vmax.f32 %v2391_v40, 0.0  ;;  %v2204_v8 = vadd.f32 %v2203_v61, %v7546_v52  ;;  %v7811_v48 = vpack.c.bf16 %v2529_v1, %v2525_v58  ;;  %v2395_v25 = vadd.f32 %v2394_v23, %v2202_v4 }
 0x298   : > { %v2205_v62 = vpop.f32.mrf.mxu0 }
 0x299   : > { %v2398_v63 = vpop.f32.mrf.mxu1  ;;  %v2206_v10 = vadd.f32 %v2205_v62, %v7553_v41  ;;  %v7809_v26 = vpack.c.bf16 %v2530_v34, %v2526_v43  ;;  %v2397_v27 = vadd.f32 %v2396_v12, %v2204_v8  ;;  %v2533_v12 = vmax.f32 %v2395_v25, 0.0  ;;  %v8571_v25 = vld [vmem:[#allocation37_spill] sm:$0xff] }
 0x29a   : > { %v2207_v42 = vpop.f32.mrf.mxu0 }
 0x29b   : > { %v2400_v46 = vpop.f32.mrf.mxu1  ;;  %v2399_v30 = vadd.f32 %v2398_v63, %v2206_v10  ;;  %v2208_v29 = vadd.f32 %v2207_v42, %v7546_v52  ;;  %3856 = vmatprep.mubr.bf16.mxu1 %v7809_v26  ;;  %v2534_v59 = vmax.f32 %v2397_v27, 0.0 }
 0x29c   : > { %v2211_v17 = vpop.f32.mrf.mxu0  ;;  %3857 = vmatmul.mubr.bf16.gmra.mxu1 %v7811_v48  ;;  %3990 = vmatmul.mubr.bf16.gmra.mxu0 %v8569_v53  ;;  %v8572_v53 = vld [vmem:[#allocation38_spill] sm:$0xff] }
 0x29d   : > { %v2404_v35 = vpop.f32.mrf.mxu1  ;;  %v2401_v13 = vadd.f32 %v2400_v46, %v2208_v29  ;;  %3999 = vmatprep.mubr.bf16.mxu0 %v8570_v51  ;;  %v2537_v45 = vmax.f32 %v2399_v30, 0.0  ;;  %v2212_v43 = vadd.f32 %v2211_v17, %v7553_v41 }
 0x29e   : > { %v2213_v14 = vpop.f32.mrf.mxu0 }
 0x29f   : > { %v2406_v40 = vpop.f32.mrf.mxu1  ;;  %v2538_v1 = vmax.f32 %v2401_v13, 0.0  ;;  %v2214_v61 = vadd.f32 %v2213_v14, %v7546_v52  ;;  %v7823_v4 = vpack.c.bf16 %v2537_v45, %v2533_v12  ;;  %v2405_v27 = vadd.f32 %v2404_v35, %v2212_v43 }
 0x2a0   : > { %v2215_v23 = vpop.f32.mrf.mxu0 }
 0x2a1   : > { %v2408_v34 = vpop.f32.mrf.mxu1  ;;  %v2216_v8 = vadd.f32 %v2215_v23, %v7553_v41  ;;  %v7821_v58 = vpack.c.bf16 %v2538_v1, %v2534_v59  ;;  %v2407_v10 = vadd.f32 %v2406_v40, %v2214_v61  ;;  %v2541_v1 = vmax.f32 %v2405_v27, 0.0 }
 0x2a2   : > { %v2217_v62 = vpop.f32.mrf.mxu0 }
 0x2a3   : > { %v2410_v63 = vpop.f32.mrf.mxu1  ;;  %v2409_v42 = vadd.f32 %v2408_v34, %v2216_v8  ;;  %v2218_v46 = vadd.f32 %v2217_v62, %v7546_v52  ;;  %3866 = vmatprep.mubr.bf16.mxu1 %v7821_v58  ;;  %v2542_v14 = vmax.f32 %v2407_v10, 0.0 }
 0x2a4   : > { %v2221_v30 = vpop.f32.mrf.mxu0  ;;  %3867 = vmatmul.mubr.bf16.gmra.mxu1 %v7823_v4  ;;  %4000 = vmatmul.mubr.bf16.gmra.mxu0 %v8571_v25 }
 0x2a5   : > { %v2414_v29 = vpop.f32.mrf.mxu1  ;;  %v2411_v17 = vadd.f32 %v2410_v63, %v2218_v46  ;;  %4009 = vmatprep.mubr.bf16.mxu0 %v8572_v53  ;;  %v2545_v13 = vmax.f32 %v2409_v42, 0.0  ;;  %v2222_v61 = vadd.f32 %v2221_v30, %v7553_v41  ;;  %v8573_v30 = vld [vmem:[#allocation40_spill] sm:$0xff]  ;;  %v8574_v53 = vld [vmem:[#allocation21_spill] sm:$0xff] }
 0x2a6   : > { %v2223_v51 = vpop.f32.mrf.mxu0 }
 0x2a7   : > { %v2416_v45 = vpop.f32.mrf.mxu1  ;;  %v2546_v40 = vmax.f32 %v2411_v17, 0.0  ;;  %v2224_v59 = vadd.f32 %v2223_v51, %v7546_v52  ;;  %v7835_v34 = vpack.c.bf16 %v2545_v13, %v2541_v1  ;;  %v2415_v46 = vadd.f32 %v2414_v29, %v2222_v61 }
 0x2a8   : > { %v2225_v35 = vpop.f32.mrf.mxu0 }
 0x2a9   : > { %v2418_v12 = vpop.f32.mrf.mxu1  ;;  %v2226_v43 = vadd.f32 %v2225_v35, %v7553_v41  ;;  %v7833_v23 = vpack.c.bf16 %v2546_v40, %v2542_v14  ;;  %v2417_v63 = vadd.f32 %v2416_v45, %v2224_v59  ;;  %v2549_v1 = vmax.f32 %v2415_v46, 0.0 }
 0x2aa   : > { %v2227_v8 = vpop.f32.mrf.mxu0 }
 0x2ab   : > { %v2420_v62 = vpop.f32.mrf.mxu1  ;;  %v2419_v42 = vadd.f32 %v2418_v12, %v2226_v43  ;;  %v2228_v10 = vadd.f32 %v2227_v8, %v7546_v52  ;;  %3876 = vmatprep.mubr.bf16.mxu1 %v7833_v23  ;;  %v2550_v40 = vmax.f32 %v2417_v63, 0.0 }
 0x2ac   : > { %v2231_v27 = vpop.f32.mrf.mxu0  ;;  %3877 = vmatmul.mubr.bf16.gmra.mxu1 %v7835_v34  ;;  %4010 = vmatmul.mubr.bf16.gmra.mxu0 %v8573_v30 }
 0x2ad   : > { %v2424_v25 = vpop.f32.mrf.mxu1  ;;  %v2421_v17 = vadd.f32 %v2420_v62, %v2228_v10  ;;  %4019 = vmatprep.mubr.bf16.mxu0 %v8574_v53  ;;  %v2553_v13 = vmax.f32 %v2419_v42, 0.0  ;;  %v2232_v35 = vadd.f32 %v2231_v27, %v7553_v41  ;;  %v8576_v27 = vld [vmem:[#allocation41_spill] sm:$0xff] }
 0x2ae   : > { %v2233_v51 = vpop.f32.mrf.mxu0 }
 0x2af   : > { %v2426_v14 = vpop.f32.mrf.mxu1  ;;  %v2554_v45 = vmax.f32 %v2421_v17, 0.0  ;;  %v2234_v59 = vadd.f32 %v2233_v51, %v7546_v52  ;;  %v7847_v8 = vpack.c.bf16 %v2553_v13, %v2549_v1  ;;  %v2425_v17 = vadd.f32 %v2424_v25, %v2232_v35 }
 0x2b0   : > { %v2235_v29 = vpop.f32.mrf.mxu0 }
 0x2b1   : > { %v2428_v61 = vpop.f32.mrf.mxu1  ;;  %v2236_v12 = vadd.f32 %v2235_v29, %v7553_v41  ;;  %v7845_v43 = vpack.c.bf16 %v2554_v45, %v2550_v40  ;;  %8575 = vst [vmem:[#allocation26_spill] sm:$0xff] %v7847_v8  ;;  %v2427_v42 = vadd.f32 %v2426_v14, %v2234_v59  ;;  %v8577_v40 = vld [vmem:[#allocation42_spill] sm:$0xff] }
 0x2b2   : > { %v2237_v62 = vpop.f32.mrf.mxu0 }
 0x2b3   : > { %v2430_v10 = vpop.f32.mrf.mxu1  ;;  %v2429_v30 = vadd.f32 %v2428_v61, %v2236_v12  ;;  %v2238_v63 = vadd.f32 %v2237_v62, %v7546_v52  ;;  %3886 = vmatprep.mubr.bf16.mxu1 %v7845_v43  ;;  %v2558_v29 = vmax.f32 %v2427_v42, 0.0  ;;  %v2557_v61 = vmax.f32 %v2425_v17, 0.0 }
 0x2b4   : > { %v2241_v46 = vpop.f32.mrf.mxu0  ;;  %3887 = vmatmul.mubr.bf16.gmra.mxu1 %v7847_v8  ;;  %4020 = vmatmul.mubr.bf16.gmra.mxu0 %v8576_v27 }
 0x2b5   : > { %v2434_v53 = vpop.f32.mrf.mxu1  ;;  %v2431_v51 = vadd.f32 %v2430_v10, %v2238_v63  ;;  %4029 = vmatprep.mubr.bf16.mxu0 %v8577_v40  ;;  %v2561_v13 = vmax.f32 %v2429_v30, 0.0  ;;  %v2242_v12 = vadd.f32 %v2241_v46, %v7553_v41  ;;  %v8578_v46 = vld [vmem:[#allocation46_spill] sm:$0xff] }
 0x2b6   : > { %v2243_v45 = vpop.f32.mrf.mxu0 }
 0x2b7   : > { %v2436_v1 = vpop.f32.mrf.mxu1  ;;  %v2562_v14 = vmax.f32 %v2431_v51, 0.0  ;;  %v2244_v59 = vadd.f32 %v2243_v45, %v7546_v52  ;;  %v7859_v27 = vpack.c.bf16 %v2561_v13, %v2557_v61  ;;  %v2435_v42 = vadd.f32 %v2434_v53, %v2242_v12  ;;  %v8579_v45 = vld [vmem:[#allocation47_spill] sm:$0xff] }
 0x2b8   : > { %v2245_v25 = vpop.f32.mrf.mxu0 }
 0x2b9   : > { %v2438_v35 = vpop.f32.mrf.mxu1  ;;  %v2246_v62 = vadd.f32 %v2245_v25, %v7553_v41  ;;  %v7857_v8 = vpack.c.bf16 %v2562_v14, %v2558_v29  ;;  %v2437_v63 = vadd.f32 %v2436_v1, %v2244_v59  ;;  %v2565_v59 = vmax.f32 %v2435_v42, 0.0 }
 0x2ba   : > { %v2247_v10 = vpop.f32.mrf.mxu0 }
 0x2bb   : > { %v2439_v30 = vadd.f32 %v2438_v35, %v2246_v62  ;;  %v2248_v40 = vadd.f32 %v2247_v10, %v7546_v52  ;;  %3896 = vmatprep.mubr.bf16.mxu1 %v7857_v8  ;;  %v2440_v51 = vpop.f32.mrf.mxu1  ;;  %v2566_v1 = vmax.f32 %v2437_v63, 0.0 }
 0x2bc   : > { %v7863_v17 = vpop.f32.mrf.mxu0  ;;  %3897 = vmatmul.mubr.bf16.gmra.mxu1 %v7859_v27  ;;  %4030 = vmatmul.mubr.bf16.gmra.mxu0 %v8578_v46 }
 0x2bd   : > { %v2441_v41 = vadd.f32 %v2440_v51, %v2248_v40  ;;  %4039 = vmatprep.mubr.bf16.mxu0 %v8579_v45  ;;  %v2569_v13 = vmax.f32 %v2439_v30, 0.0 }
 0x2be   : > { %v7868_v29 = vpop.f32.mrf.mxu0 }
 0x2bf   : > { %v2570_v14 = vmax.f32 %v2441_v41, 0.0  ;;  %v7874_v53 = vpack.c.bf16 %v2569_v13, %v2565_v59 }
 0x2c0   : > { %v7870_v52 = vpop.f32.mrf.mxu0 }
 0x2c1   : > { %v7872_v61 = vpack.c.bf16 %v2570_v14, %v2566_v1 }
 0x2c2   : > { %v7876_v12 = vpop.f32.mrf.mxu0 }
 0x2c3   : > { %3906 = vmatprep.mubr.bf16.mxu1 %v7872_v61 }
 0x2c4   : > { %v7879_v25 = vpop.f32.mrf.mxu0  ;;  %3907 = vmatmul.mubr.bf16.gmra.mxu1 %v7874_v53  ;;  %4040 = vmatmul.mubr.bf16.gmra.mxu0 %v7568_v21 }
 0x2c5   : > { %4049 = vmatprep.mubr.bf16.mxu0 %v7571_v38  ;;  %4142 = vmatprep.mubr.bf16.mxu1 %v7591_v50 }
 0x2c6   : > { %v7885_v35 = vpop.f32.mrf.mxu0 }
 0x2c8   : > { %v7887_v62 = vpop.f32.mrf.mxu0 }
 0x2ca   : > { %v7889_v10 = vpop.f32.mrf.mxu0 }
 0x2cc   : > { %v7891_v63 = vpop.f32.mrf.mxu0  ;;  %4050 = vmatmul.mubr.bf16.gmra.mxu0 %v7594_v9  ;;  %4143 = vmatmul.mubr.bf16.vlgmr.msra.gmra.mxu1 %v7598_v0 }
 0x2cd   : > { %4059 = vmatprep.mubr.bf16.mxu0 %v7603_v24  ;;  %4152 = vmatprep.mubr.bf16.mxu1 %v7622_v55 }
 0x2ce   : > { %v7897_v21 = vpop.f32.mrf.mxu0 }
 0x2d0   : > { %v7899_v38 = vpop.f32.mrf.mxu0 }
 0x2d2   : > { %v7901_v50 = vpop.f32.mrf.mxu0 }
 0x2d4   : > { %v7903_v30 = vpop.f32.mrf.mxu0  ;;  %4060 = vmatmul.mubr.bf16.gmra.mxu0 %v7625_v44  ;;  %4153 = vmatmul.mubr.bf16.gmra.mxu1 %v7628_v11 }
 0x2d5   : > { %4069 = vmatprep.mubr.bf16.mxu0 %v7630_v54  ;;  %4162 = vmatprep.mubr.bf16.mxu1 %v7655_v37 }
 0x2d6   : > { %v7909_v9 = vpop.f32.mrf.mxu0 }
 0x2d8   : > { %v7911_v0 = vpop.f32.mrf.mxu0 }
 0x2da   : > { %v7913_v24 = vpop.f32.mrf.mxu0 }
 0x2dc   : > { %v7915_v55 = vpop.f32.mrf.mxu0  ;;  %4070 = vmatmul.mubr.bf16.gmra.mxu0 %v7658_v56  ;;  %4163 = vmatmul.mubr.bf16.gmra.mxu1 %v7662_v16 }
 0x2dd   : > { %4079 = vmatprep.mubr.bf16.mxu0 %v7667_v36  ;;  %4172 = vmatprep.mubr.bf16.mxu1 %v7686_v15 }
 0x2de   : > { %v7921_v44 = vpop.f32.mrf.mxu0 }
 0x2e0   : > { %v7923_v11 = vpop.f32.mrf.mxu0 }
 0x2e2   : > { %v7925_v54 = vpop.f32.mrf.mxu0 }
 0x2e4   : > { %v7927_v37 = vpop.f32.mrf.mxu0  ;;  %4080 = vmatmul.mubr.bf16.gmra.mxu0 %v7689_v47  ;;  %4173 = vmatmul.mubr.bf16.gmra.mxu1 %v7692_v60 }
 0x2e5   : > { %4089 = vmatprep.mubr.bf16.mxu0 %v7694_v57  ;;  %4182 = vmatprep.mubr.bf16.mxu1 %v7714_v20 }
 0x2e6   : > { %v7933_v56 = vpop.f32.mrf.mxu0 }
 0x2e8   : > { %v7935_v16 = vpop.f32.mrf.mxu0 }
 0x2ea   : > { %v7937_v36 = vpop.f32.mrf.mxu0 }
 0x2ec   : > { %v7939_v15 = vpop.f32.mrf.mxu0  ;;  %4090 = vmatmul.mubr.bf16.gmra.mxu0 %v7717_v19  ;;  %4183 = vmatmul.mubr.bf16.gmra.mxu1 %v7720_v33 }
 0x2ed   : > { %4099 = vmatprep.mubr.bf16.mxu0 %v7725_v3  ;;  %4192 = vmatprep.mubr.bf16.mxu1 %v7736_v31 }
 0x2ee   : > { %v7945_v47 = vpop.f32.mrf.mxu0 }
 0x2f0   : > { %v7947_v60 = vpop.f32.mrf.mxu0 }
 0x2f2   : > { %v7949_v57 = vpop.f32.mrf.mxu0 }
 0x2f4   : > { %v7951_v20 = vpop.f32.mrf.mxu0  ;;  %4100 = vmatmul.mubr.bf16.gmra.mxu0 %v7739_v7  ;;  %4193 = vmatmul.mubr.bf16.gmra.mxu1 %v7741_v5 }
 0x2f5   : > { %4202 = vmatprep.mubr.bf16.mxu1 %v7754_v32 }
 0x2f6   : > { %v7956_v19 = vpop.f32.mrf.mxu0 }
 0x2f8   : > { %v7958_v33 = vpop.f32.mrf.mxu0 }
 0x2fa   : > { %v7960_v3 = vpop.f32.mrf.mxu0 }
 0x2fc   : > { %v7962_v31 = vpop.f32.mrf.mxu0  ;;  %4203 = vmatmul.mubr.bf16.gmra.mxu1 %v7757_v18 }
 0x2fd   : > { %4212 = vmatprep.mubr.bf16.mxu1 %v7770_v6  ;;  %v2571_v6 = vld [vmem:[#allocation2 + $0x2b0] sm:$0xff] }
 0x2fe   : > { %v7966_v40 = vpop.f32.mrf.mxu0 }
 0x300   : > { %v7968_v42 = vpop.f32.mrf.mxu0 }
 0x302   : > { %v7970_v7 = vpop.f32.mrf.mxu0 }
 0x304   : > { %v7972_v5 = vpop.f32.mrf.mxu0  ;;  %4213 = vmatmul.mubr.bf16.gmra.mxu1 %v7773_v22  ;;  %v2572_v22 = vld [vmem:[#allocation2 + $0x3b0] sm:$0xff] }
 0x305   : > { %8580 = vst [vmem:[#allocation36_spill] sm:$0xff] %v7972_v5  ;;  %4222 = vmatprep.mubr.bf16.mxu1 %v7785_v49 }
 0x306   : > { %v7976_v32 = vpop.f32.mrf.mxu0 }
 0x307   : > { %8581 = vst [vmem:[#allocation27_spill] sm:$0xff] %v7976_v32 }
 0x308   : > { %v7978_v51 = vpop.f32.mrf.mxu0 }
 0x309   : > { %8582 = vst [vmem:[#allocation39_spill] sm:$0xff] %v7978_v51 }
 0x30a   : > { %v7980_v46 = vpop.f32.mrf.mxu0 }
 0x30b   : > { %8583 = vst [vmem:[#allocation20_spill] sm:$0xff] %v7980_v46  ;;  %v2575_v46 = vld [vmem:[#allocation2 + $0x50] sm:$0xff] }
 0x30c   : > { %v7982_v18 = vpop.f32.mrf.mxu0  ;;  %v3758_v41 = vpop.f32.mrf.mxu1  ;;  %4223 = vmatmul.mubr.bf16.gmra.mxu1 %v7787_v2 }
 0x30d   : > { %8584 = vst [vmem:[#allocation44_spill] sm:$0xff] %v7982_v18  ;;  %v3759_v45 = vadd.f32 %v3758_v41, %v7863_v17  ;;  %4232 = vmatprep.mubr.bf16.mxu1 %v7797_v39  ;;  %v2576_v17 = vld [vmem:[#allocation2 + $0x368] sm:$0xff] }
 0x30e   : > { %v7987_v13 = vpop.f32.mrf.mxu0  ;;  %v3760_v49 = vpop.f32.mrf.mxu1 }
 0x30f   : > { %8585 = vst [vmem:[#allocation24_spill] sm:$0xff] %v7987_v13  ;;  %v4303_v1 = vadd.f32 %v3759_v45, %v2571_v6  ;;  %v3761_v14 = vadd.f32 %v3760_v49, %v7868_v29  ;;  %v2579_v6 = vld [vmem:[#allocation2 + $0x380] sm:$0xff] }
 0x310   : > { %v7990_v59 = vpop.f32.mrf.mxu0  ;;  %v3762_v51 = vpop.f32.mrf.mxu1 }
 0x311   : > { %4431 = vst [vmem:[#allocation2 + $0x2b0] sm:$0xff] %v4303_v1  ;;  %v4304_v18 = vadd.f32 %v3761_v14, %v2572_v22  ;;  %v3763_v32 = vadd.f32 %v3762_v51, %v7870_v52  ;;  %v2580_v51 = vld [vmem:[#allocation2 + $0x110] sm:$0xff] }
 0x312   : > { %v7993_v2 = vpop.f32.mrf.mxu0  ;;  %v3764_v41 = vpop.f32.mrf.mxu1 }
 0x313   : > { %4432 = vst [vmem:[#allocation2 + $0x3b0] sm:$0xff] %v4304_v18  ;;  %v4307_v39 = vadd.f32 %v3763_v32, %v2575_v46  ;;  %v3765_v13 = vadd.f32 %v3764_v41, %v7876_v12  ;;  %v2583_v18 = vld [vmem:[#allocation2 + $0x320] sm:$0xff] }
 0x314   : > { %v7996_v5 = vpop.f32.mrf.mxu0  ;;  %v3768_v29 = vpop.f32.mrf.mxu1  ;;  %4233 = vmatmul.mubr.bf16.gmra.mxu1 %v7799_v28 }
 0x315   : > { %4435 = vst [vmem:[#allocation2 + $0x50] sm:$0xff] %v4307_v39  ;;  %v4308_v45 = vadd.f32 %v3765_v13, %v2576_v17  ;;  %v3769_v22 = vadd.f32 %v3768_v29, %v7879_v25  ;;  %4242 = vmatprep.mubr.bf16.mxu1 %v7809_v26  ;;  %v2584_v25 = vld [vmem:[#allocation2 + $0x150] sm:$0xff] }
 0x316   : > { %v8001_v52 = vpop.f32.mrf.mxu0  ;;  %v3770_v49 = vpop.f32.mrf.mxu1 }
 0x317   : > { %4436 = vst [vmem:[#allocation2 + $0x368] sm:$0xff] %v4308_v45  ;;  %v4311_v32 = vadd.f32 %v3769_v22, %v2579_v6  ;;  %v3771_v12 = vadd.f32 %v3770_v49, %v7885_v35  ;;  %v2587_v6 = vld [vmem:[#allocation2 + $0x2e0] sm:$0xff]  ;;  %v2588_v22 = vld [vmem:[#allocation2 + $0x388] sm:$0xff] }
 0x318   : > { %v8004_v46 = vpop.f32.mrf.mxu0  ;;  %v3772_v1 = vpop.f32.mrf.mxu1 }
 0x319   : > { %4439 = vst [vmem:[#allocation2 + $0x380] sm:$0xff] %v4311_v32  ;;  %v4312_v28 = vadd.f32 %v3771_v12, %v2580_v51  ;;  %v3773_v13 = vadd.f32 %v3772_v1, %v7887_v62  ;;  %v2591_v12 = vld [vmem:[#allocation2 + $0x80] sm:$0xff] }
 0x31a   : > { %v8007_v14 = vpop.f32.mrf.mxu0  ;;  %v3774_v26 = vpop.f32.mrf.mxu1 }
 0x31b   : > { %4440 = vst [vmem:[#allocation2 + $0x110] sm:$0xff] %v4312_v28  ;;  %v4315_v17 = vadd.f32 %v3773_v13, %v2583_v18  ;;  %v3775_v41 = vadd.f32 %v3774_v26, %v7889_v10 }
 0x31c   : > { %v8010_v39 = vpop.f32.mrf.mxu0  ;;  %v3778_v35 = vpop.f32.mrf.mxu1  ;;  %4243 = vmatmul.mubr.bf16.gmra.mxu1 %v7811_v48 }
 0x31d   : > { %4443 = vst [vmem:[#allocation2 + $0x320] sm:$0xff] %v4315_v17  ;;  %v4316_v29 = vadd.f32 %v3775_v41, %v2584_v25  ;;  %v3779_v45 = vadd.f32 %v3778_v35, %v7891_v63  ;;  %4252 = vmatprep.mubr.bf16.mxu1 %v7821_v58  ;;  %v2592_v63 = vld [vmem:[#allocation2 + $0x1a8] sm:$0xff]  ;;  %v2596_v35 = vld [vmem:[#allocation2 + $0x2f8] sm:$0xff] }
 0x31e   : > { %v8015_v62 = vpop.f32.mrf.mxu0  ;;  %v3780_v51 = vpop.f32.mrf.mxu1  ;;  %v2595_v17 = vld [vmem:[#allocation2 + $0x3e8] sm:$0xff] }
 0x31f   : > { %4444 = vst [vmem:[#allocation2 + $0x150] sm:$0xff] %v4316_v29  ;;  %v4319_v49 = vadd.f32 %v3779_v45, %v2587_v6  ;;  %v3781_v10 = vadd.f32 %v3780_v51, %v7897_v21  ;;  %v2599_v51 = vld [vmem:[#allocation2 + $0x138] sm:$0xff] }
 0x320   : > { %v8018_v32 = vpop.f32.mrf.mxu0  ;;  %v3782_v18 = vpop.f32.mrf.mxu1 }
 0x321   : > { %4447 = vst [vmem:[#allocation2 + $0x2e0] sm:$0xff] %v4319_v49  ;;  %v4320_v48 = vadd.f32 %v3781_v10, %v2588_v22  ;;  %v3783_v1 = vadd.f32 %v3782_v18, %v7899_v38 }
 0x322   : > { %v8021_v28 = vpop.f32.mrf.mxu0  ;;  %v3784_v58 = vpop.f32.mrf.mxu1 }
 0x323   : > { %4448 = vst [vmem:[#allocation2 + $0x388] sm:$0xff] %v4320_v48  ;;  %v4323_v13 = vadd.f32 %v3783_v1, %v2591_v12  ;;  %v3785_v25 = vadd.f32 %v3784_v58, %v7901_v50 }
 0x324   : > { %v8024_v26 = vpop.f32.mrf.mxu0  ;;  %v3788_v21 = vpop.f32.mrf.mxu1  ;;  %4253 = vmatmul.mubr.bf16.gmra.mxu1 %v7823_v4 }
 0x325   : > { %4451 = vst [vmem:[#allocation2 + $0x80] sm:$0xff] %v4323_v13  ;;  %v4324_v41 = vadd.f32 %v3785_v25, %v2592_v63  ;;  %v3789_v6 = vadd.f32 %v3788_v21, %v7903_v30  ;;  %4262 = vmatprep.mubr.bf16.mxu1 %v7833_v23  ;;  %v2600_v30 = vld [vmem:[#allocation2 + $0xc0] sm:$0xff] }
 0x326   : > { %v8029_v38 = vpop.f32.mrf.mxu0  ;;  %v3790_v29 = vpop.f32.mrf.mxu1  ;;  %v2603_v63 = vld [vmem:[#allocation2 + $0x100] sm:$0xff] }
 0x327   : > { %4452 = vst [vmem:[#allocation2 + $0x1a8] sm:$0xff] %v4324_v41  ;;  %v4327_v45 = vadd.f32 %v3789_v6, %v2595_v17  ;;  %v3791_v50 = vadd.f32 %v3790_v29, %v7909_v9  ;;  %v2604_v25 = vld [vmem:[#allocation2 + $0x3c0] sm:$0xff]  ;;  %v2607_v6 = vld [vmem:[#allocation2 + $0x218] sm:$0xff] }
 0x328   : > { %v8032_v22 = vpop.f32.mrf.mxu0  ;;  %v3792_v49 = vpop.f32.mrf.mxu1 }
 0x329   : > { %4455 = vst [vmem:[#allocation2 + $0x3e8] sm:$0xff] %v4327_v45  ;;  %v4328_v4 = vadd.f32 %v3791_v50, %v2596_v35  ;;  %v3793_v10 = vadd.f32 %v3792_v49, %v7911_v0 }
 0x32a   : > { %v8035_v12 = vpop.f32.mrf.mxu0  ;;  %v3794_v23 = vpop.f32.mrf.mxu1 }
 0x32b   : > { %4456 = vst [vmem:[#allocation2 + $0x2f8] sm:$0xff] %v4328_v4  ;;  %v4331_v18 = vadd.f32 %v3793_v10, %v2599_v51  ;;  %v3795_v48 = vadd.f32 %v3794_v23, %v7913_v24  ;;  %v2611_v4 = vld [vmem:[#allocation2 + $0x2a0] sm:$0xff] }
 0x32c   : > { %v8038_v1 = vpop.f32.mrf.mxu0  ;;  %v3798_v9 = vpop.f32.mrf.mxu1  ;;  %4263 = vmatmul.mubr.bf16.gmra.mxu1 %v7835_v34  ;;  %v8586_v10 = vld [vmem:[#allocation26_spill] sm:$0xff] }
 0x32d   : > { %4459 = vst [vmem:[#allocation2 + $0x138] sm:$0xff] %v4331_v18  ;;  %v4332_v58 = vadd.f32 %v3795_v48, %v2600_v30  ;;  %v3799_v13 = vadd.f32 %v3798_v9, %v7915_v55  ;;  %4272 = vmatprep.mubr.bf16.mxu1 %v7845_v43  ;;  %v2608_v55 = vld [vmem:[#allocation2 + $0x3f8] sm:$0xff]  ;;  %v2612_v18 = vld [vmem:[#allocation2 + $0x3f0] sm:$0xff] }
 0x32e   : > { %v8043_v0 = vpop.f32.mrf.mxu0  ;;  %v3800_v17 = vpop.f32.mrf.mxu1 }
 0x32f   : > { %4460 = vst [vmem:[#allocation2 + $0xc0] sm:$0xff] %v4332_v58  ;;  %v4335_v21 = vadd.f32 %v3799_v13, %v2603_v63  ;;  %v3801_v24 = vadd.f32 %v3800_v17, %v7921_v44  ;;  %v2615_v58 = vld [vmem:[#allocation2 + $0xb0] sm:$0xff] }
 0x330   : > { %v8046_v41 = vpop.f32.mrf.mxu0  ;;  %v3802_v35 = vpop.f32.mrf.mxu1 }
 0x331   : > { %4463 = vst [vmem:[#allocation2 + $0x100] sm:$0xff] %v4335_v21  ;;  %v4336_v34 = vadd.f32 %v3801_v24, %v2604_v25  ;;  %v3803_v29 = vadd.f32 %v3802_v35, %v7923_v11  ;;  %v2619_v35 = vld [vmem:[#allocation2 + $0x230] sm:$0xff] }
 0x332   : > { %v8049_v45 = vpop.f32.mrf.mxu0  ;;  %v3804_v43 = vpop.f32.mrf.mxu1 }
 0x333   : > { %4464 = vst [vmem:[#allocation2 + $0x3c0] sm:$0xff] %v4336_v34  ;;  %v4339_v50 = vadd.f32 %v3803_v29, %v2607_v6  ;;  %v3805_v51 = vadd.f32 %v3804_v43, %v7925_v54 }
 0x334   : > { %v8052_v49 = vpop.f32.mrf.mxu0  ;;  %v3808_v44 = vpop.f32.mrf.mxu1  ;;  %4273 = vmatmul.mubr.bf16.gmra.mxu1 %v8586_v10 }
 0x335   : > { %4467 = vst [vmem:[#allocation2 + $0x218] sm:$0xff] %v4339_v50  ;;  %v4340_v30 = vadd.f32 %v3805_v51, %v2608_v55  ;;  %v3809_v23 = vadd.f32 %v3808_v44, %v7927_v37  ;;  %4282 = vmatprep.mubr.bf16.mxu1 %v7857_v8  ;;  %v2616_v37 = vld [vmem:[#allocation2 + $0x1e0] sm:$0xff] }
 0x336   : > { %v8057_v11 = vpop.f32.mrf.mxu0  ;;  %v3810_v48 = vpop.f32.mrf.mxu1 }
 0x337   : > { %4468 = vst [vmem:[#allocation2 + $0x3f8] sm:$0xff] %v4340_v30  ;;  %v4343_v63 = vadd.f32 %v3809_v23, %v2611_v4  ;;  %v3811_v54 = vadd.f32 %v3810_v48, %v7933_v56  ;;  %v2623_v4 = vld [vmem:[#allocation2 + $0x208] sm:$0xff]  ;;  %v2624_v23 = vld [vmem:[#allocation2 + $0xd0] sm:$0xff] }
 0x338   : > { %v8060_v9 = vpop.f32.mrf.mxu0  ;;  %v3812_v13 = vpop.f32.mrf.mxu1 }
 0x339   : > { %4471 = vst [vmem:[#allocation2 + $0x2a0] sm:$0xff] %v4343_v63  ;;  %v4344_v25 = vadd.f32 %v3811_v54, %v2612_v18  ;;  %v3813_v17 = vadd.f32 %v3812_v13, %v7935_v16  ;;  %v2620_v16 = vld [vmem:[#allocation2 + $0x240] sm:$0xff]  ;;  %v2627_v63 = vld [vmem:[#allocation2 + $0x358] sm:$0xff] }
 0x33a   : > { %v8063_v21 = vpop.f32.mrf.mxu0  ;;  %v3814_v8 = vpop.f32.mrf.mxu1 }
 0x33b   : > { %4472 = vst [vmem:[#allocation2 + $0x3f0] sm:$0xff] %v4344_v25  ;;  %v4347_v24 = vadd.f32 %v3813_v17, %v2615_v58  ;;  %v3815_v6 = vadd.f32 %v3814_v8, %v7937_v36  ;;  %v2628_v25 = vld [vmem:[#allocation2 + $0x268] sm:$0xff] }
 0x33c   : > { %v3818_v34 = vpop.f32.mrf.mxu1  ;;  %v8066_v29 = vpop.f32.mrf.mxu0  ;;  %4283 = vmatmul.mubr.bf16.gmra.mxu1 %v7859_v27 }
 0x33d   : > { %4475 = vst [vmem:[#allocation2 + $0xb0] sm:$0xff] %v4347_v24  ;;  %v4348_v56 = vadd.f32 %v3815_v6, %v2616_v37  ;;  %v3819_v55 = vadd.f32 %v3818_v34, %v7939_v15  ;;  %4292 = vmatprep.mubr.bf16.mxu1 %v7872_v61  ;;  %v2631_v24 = vld [vmem:[#allocation2 + $0x1d8] sm:$0xff]  ;;  %v2632_v34 = vld [vmem:[#allocation2 + $0x30] sm:$0xff] }
 0x33e   : > { %v3820_v43 = vpop.f32.mrf.mxu1  ;;  %v8071_v50 = vpop.f32.mrf.mxu0 }
 0x33f   : > { %4476 = vst [vmem:[#allocation2 + $0x1e0] sm:$0xff] %v4348_v56  ;;  %v4351_v51 = vadd.f32 %v3819_v55, %v2619_v35  ;;  %v3821_v36 = vadd.f32 %v3820_v43, %v7945_v47  ;;  %v2635_v43 = vld [vmem:[#allocation2 + $0x130] sm:$0xff] }
 0x340   : > { %v3822_v44 = vpop.f32.mrf.mxu1  ;;  %v8074_v10 = vpop.f32.mrf.mxu0 }
 0x341   : > { %4479 = vst [vmem:[#allocation2 + $0x230] sm:$0xff] %v4351_v51  ;;  %v4352_v27 = vadd.f32 %v3821_v36, %v2620_v16  ;;  %v3823_v30 = vadd.f32 %v3822_v44, %v7947_v60  ;;  %v2636_v44 = vld [vmem:[#allocation2 + $0x200] sm:$0xff] }
 0x342   : > { %v3824_v15 = vpop.f32.mrf.mxu1  ;;  %v8077_v18 = vpop.f32.mrf.mxu0 }
 0x343   : > { %4480 = vst [vmem:[#allocation2 + $0x240] sm:$0xff] %v4352_v27  ;;  %v4355_v61 = vadd.f32 %v3823_v30, %v2623_v4  ;;  %v3825_v48 = vadd.f32 %v3824_v15, %v7949_v57  ;;  %v2639_v15 = vld [vmem:[#allocation2 + $0x70] sm:$0xff] }
 0x344   : > { %v3828_v54 = vpop.f32.mrf.mxu1  ;;  %v8080_v58 = vpop.f32.mrf.mxu0  ;;  %4293 = vmatmul.mubr.bf16.gmra.mxu1 %v7874_v53 }
 0x345   : > { %4483 = vst [vmem:[#allocation2 + $0x208] sm:$0xff] %v4355_v61  ;;  %v4356_v47 = vadd.f32 %v3825_v48, %v2624_v23  ;;  %v3829_v13 = vadd.f32 %v3828_v54, %v7951_v20  ;;  %v2640_v54 = vld [vmem:[#allocation2 + $0x300] sm:$0xff] }
 0x346   : > { %v3830_v60 = vpop.f32.mrf.mxu1  ;;  %v8084_v17 = vpop.f32.mrf.mxu0 }
 0x347   : > { %4484 = vst [vmem:[#allocation2 + $0xd0] sm:$0xff] %v4356_v47  ;;  %v4359_v37 = vadd.f32 %v3829_v13, %v2627_v63  ;;  %v3831_v8 = vadd.f32 %v3830_v60, %v7956_v19  ;;  %v2643_v60 = vld [vmem:[#allocation2 + $0x328] sm:$0xff] }
 0x348   : > { %v3832_v57 = vpop.f32.mrf.mxu1  ;;  %v8087_v6 = vpop.f32.mrf.mxu0 }
 0x349   : > { %4487 = vst [vmem:[#allocation2 + $0x358] sm:$0xff] %v4359_v37  ;;  %v4360_v35 = vadd.f32 %v3831_v8, %v2628_v25  ;;  %v3833_v53 = vadd.f32 %v3832_v57, %v7958_v33 }
 0x34a   : > { %v3834_v56 = vpop.f32.mrf.mxu1  ;;  %v8090_v55 = vpop.f32.mrf.mxu0 }
 0x34b   : > { %4488 = vst [vmem:[#allocation2 + $0x268] sm:$0xff] %v4360_v35  ;;  %v4363_v20 = vadd.f32 %v3833_v53, %v2631_v24  ;;  %v3835_v16 = vadd.f32 %v3834_v56, %v7960_v3  ;;  %v8587_v24 = vld [vmem:[#allocation36_spill] sm:$0xff]  ;;  %v2644_v35 = vld [vmem:[#allocation2 + $0x260] sm:$0xff]  ;;  %v8588_v56 = vld [vmem:[#allocation27_spill] sm:$0xff] }
 0x34c   : > { %v3838_v51 = vpop.f32.mrf.mxu1  ;;  %v8093_v36 = vpop.f32.mrf.mxu0 }
 0x34d   : > { %4491 = vst [vmem:[#allocation2 + $0x1d8] sm:$0xff] %v4363_v20  ;;  %v4364_v19 = vadd.f32 %v3835_v16, %v2632_v34  ;;  %v3839_v4 = vadd.f32 %v3838_v51, %v7962_v31  ;;  %v2647_v16 = vld [vmem:[#allocation2 + $0x248] sm:$0xff] }
 0x34e   : > { %v3840_v27 = vpop.f32.mrf.mxu1  ;;  %v8096_v30 = vpop.f32.mrf.mxu0 }
 0x34f   : > { %4492 = vst [vmem:[#allocation2 + $0x30] sm:$0xff] %v4364_v19  ;;  %v4367_v33 = vadd.f32 %v3839_v4, %v2635_v43  ;;  %v3841_v23 = vadd.f32 %v3840_v27, %v7966_v40  ;;  %v8589_v19 = vld [vmem:[#allocation39_spill] sm:$0xff] }
 0x350   : > { %v3842_v61 = vpop.f32.mrf.mxu1  ;;  %v8099_v48 = vpop.f32.mrf.mxu0 }
 0x351   : > { %4495 = vst [vmem:[#allocation2 + $0x130] sm:$0xff] %v4367_v33  ;;  %v4368_v3 = vadd.f32 %v3841_v23, %v2636_v44  ;;  %v3843_v63 = vadd.f32 %v3842_v61, %v7968_v42  ;;  %v2648_v44 = vld [vmem:[#allocation2 + $0x40] sm:$0xff] }
 0x352   : > { %v3844_v47 = vpop.f32.mrf.mxu1  ;;  %v8102_v13 = vpop.f32.mrf.mxu0 }
 0x353   : > { %4496 = vst [vmem:[#allocation2 + $0x200] sm:$0xff] %v4368_v3  ;;  %v4371_v31 = vadd.f32 %v3843_v63, %v2639_v15  ;;  %v3845_v25 = vadd.f32 %v3844_v47, %v7970_v7  ;;  %v8590_v15 = vld [vmem:[#allocation20_spill] sm:$0xff]  ;;  %v2651_v3 = vld [vmem:[#allocation2 + $0x288] sm:$0xff] }
 0x354   : > { %v3848_v37 = vpop.f32.mrf.mxu1  ;;  %v8105_v8 = vpop.f32.mrf.mxu0 }
 0x355   : > { %4499 = vst [vmem:[#allocation2 + $0x70] sm:$0xff] %v4371_v31  ;;  %v4372_v40 = vadd.f32 %v3845_v25, %v2640_v54  ;;  %v3849_v57 = vadd.f32 %v3848_v37, %v8587_v24  ;;  %v8591_v31 = vld [vmem:[#allocation44_spill] sm:$0xff] }
 0x356   : > { %v3850_v53 = vpop.f32.mrf.mxu1  ;;  %v8108_v34 = vpop.f32.mrf.mxu0 }
 0x357   : > { %4500 = vst [vmem:[#allocation2 + $0x300] sm:$0xff] %v4372_v40  ;;  %v4375_v42 = vadd.f32 %v3849_v57, %v2643_v60  ;;  %v3851_v20 = vadd.f32 %v3850_v53, %v8588_v56  ;;  %v2652_v60 = vld [vmem:[#allocation2 + $0x3a8] sm:$0xff]  ;;  %v8592_v57 = vld [vmem:[#allocation24_spill] sm:$0xff] }
 0x358   : > { %v3852_v43 = vpop.f32.mrf.mxu1  ;;  %v8111_v51 = vpop.f32.mrf.mxu0  ;;  %v2655_v53 = vld [vmem:[#allocation2 + $0x2c8] sm:$0xff] }
 0x359   : > { %4503 = vst [vmem:[#allocation2 + $0x328] sm:$0xff] %v4375_v42  ;;  %v4376_v7 = vadd.f32 %v3851_v20, %v2644_v35  ;;  %v3853_v4 = vadd.f32 %v3852_v43, %v8589_v19  ;;  %v2656_v43 = vld [vmem:[#allocation2 + $0x210] sm:$0xff] }
 0x35a   : > { %v3854_v27 = vpop.f32.mrf.mxu1  ;;  %v8114_v33 = vpop.f32.mrf.mxu0 }
 0x35b   : > { %4504 = vst [vmem:[#allocation2 + $0x260] sm:$0xff] %v4376_v7  ;;  %v4379_v23 = vadd.f32 %v3853_v4, %v2647_v16  ;;  %v3855_v61 = vadd.f32 %v3854_v27, %v8590_v15  ;;  %v2659_v27 = vld [vmem:[#allocation2 + $0x1b0] sm:$0xff] }
 0x35c   : > { %v3858_v63 = vpop.f32.mrf.mxu1  ;;  %v8117_v54 = vpop.f32.mrf.mxu0 }
 0x35d   : > { %4507 = vst [vmem:[#allocation2 + $0x248] sm:$0xff] %v4379_v23  ;;  %v4380_v47 = vadd.f32 %v3855_v61, %v2648_v44  ;;  %v3859_v25 = vadd.f32 %v3858_v63, %v8591_v31  ;;  %v2660_v63 = vld [vmem:[#allocation2 + $0x1c8] sm:$0xff] }
 0x35e   : > { %v3860_v37 = vpop.f32.mrf.mxu1  ;;  %v8120_v40 = vpop.f32.mrf.mxu0 }
 0x35f   : > { %4508 = vst [vmem:[#allocation2 + $0x40] sm:$0xff] %v4380_v47  ;;  %v4383_v24 = vadd.f32 %v3859_v25, %v2651_v3  ;;  %v3861_v35 = vadd.f32 %v3860_v37, %v8592_v57 }
 0x360   : > { %v3862_v42 = vpop.f32.mrf.mxu1  ;;  %v8123_v56 = vpop.f32.mrf.mxu0 }
 0x361   : > { %4511 = vst [vmem:[#allocation2 + $0x288] sm:$0xff] %v4383_v24  ;;  %v4384_v20 = vadd.f32 %v3861_v35, %v2652_v60  ;;  %v3863_v16 = vadd.f32 %v3862_v42, %v7990_v59  ;;  %v2663_v60 = vld [vmem:[#allocation2 + $0x58] sm:$0xff]  ;;  %v2664_v35 = vld [vmem:[#allocation2 + $0x120] sm:$0xff] }
 0x362   : > { %v3864_v7 = vpop.f32.mrf.mxu1  ;;  %v8126_v19 = vpop.f32.mrf.mxu0 }
 0x363   : > { %4512 = vst [vmem:[#allocation2 + $0x3a8] sm:$0xff] %v4384_v20  ;;  %v4387_v4 = vadd.f32 %v3863_v16, %v2655_v53  ;;  %v3865_v44 = vadd.f32 %v3864_v7, %v7993_v2  ;;  %v2667_v16 = vld [vmem:[#allocation2 + $0x1f8] sm:$0xff] }
 0x364   : > { %v3868_v23 = vpop.f32.mrf.mxu1  ;;  %v8129_v15 = vpop.f32.mrf.mxu0 }
 0x365   : > { %4515 = vst [vmem:[#allocation2 + $0x2c8] sm:$0xff] %v4387_v4  ;;  %v4388_v61 = vadd.f32 %v3865_v44, %v2656_v43  ;;  %v3869_v3 = vadd.f32 %v3868_v23, %v7996_v5  ;;  %v2668_v44 = vld [vmem:[#allocation2 + $0x238] sm:$0xff] }
 0x366   : > { %v3870_v47 = vpop.f32.mrf.mxu1  ;;  %v8132_v31 = vpop.f32.mrf.mxu0 }
 0x367   : > { %4516 = vst [vmem:[#allocation2 + $0x210] sm:$0xff] %v4388_v61  ;;  %v4391_v59 = vadd.f32 %v3869_v3, %v2659_v27  ;;  %v3871_v25 = vadd.f32 %v3870_v47, %v8001_v52  ;;  %v2671_v61 = vld [vmem:[#allocation2 + $0x1a0] sm:$0xff] }
 0x368   : > { %v3872_v37 = vpop.f32.mrf.mxu1  ;;  %v8135_v24 = vpop.f32.mrf.mxu0 }
 0x369   : > { %4519 = vst [vmem:[#allocation2 + $0x1b0] sm:$0xff] %v4391_v59  ;;  %v4392_v2 = vadd.f32 %v3871_v25, %v2660_v63  ;;  %v3873_v57 = vadd.f32 %v3872_v37, %v8004_v46  ;;  %v2672_v59 = vld [vmem:[#allocation2 + $0xa8] sm:$0xff]  ;;  %v2675_v37 = vld [vmem:[#allocation2 + $0xf0] sm:$0xff] }
 0x36a   : > { %v3874_v53 = vpop.f32.mrf.mxu1  ;;  %v8138_v42 = vpop.f32.mrf.mxu0 }
 0x36b   : > { %4520 = vst [vmem:[#allocation2 + $0x1c8] sm:$0xff] %v4392_v2  ;;  %v4395_v5 = vadd.f32 %v3873_v57, %v2663_v60  ;;  %v3875_v20 = vadd.f32 %v3874_v53, %v8007_v14  ;;  %v2676_v53 = vld [vmem:[#allocation2 + $0x180] sm:$0xff] }
 0x36c   : > { %v3878_v43 = vpop.f32.mrf.mxu1  ;;  %v8142_v4 = vpop.f32.mrf.mxu0 }
 0x36d   : > { %4523 = vst [vmem:[#allocation2 + $0x58] sm:$0xff] %v4395_v5  ;;  %v4396_v52 = vadd.f32 %v3875_v20, %v2664_v35  ;;  %v3879_v7 = vadd.f32 %v3878_v43, %v8010_v39 }
 0x36e   : > { %v3880_v27 = vpop.f32.mrf.mxu1  ;;  %v8146_v47 = vpop.f32.mrf.mxu0 }
 0x36f   : > { %4524 = vst [vmem:[#allocation2 + $0x120] sm:$0xff] %v4396_v52  ;;  %v4399_v46 = vadd.f32 %v3879_v7, %v2667_v16  ;;  %v3881_v23 = vadd.f32 %v3880_v27, %v8015_v62  ;;  %v2679_v16 = vld [vmem:[#allocation2 + $0x250] sm:$0xff] }
 0x370   : > { %v3882_v3 = vpop.f32.mrf.mxu1  ;;  %v8150_v35 = vpop.f32.mrf.mxu0 }
 0x371   : > { %4527 = vst [vmem:[#allocation2 + $0x1f8] sm:$0xff] %v4399_v46  ;;  %v4400_v63 = vadd.f32 %v3881_v23, %v2668_v44  ;;  %v3883_v14 = vadd.f32 %v3882_v3, %v8018_v32  ;;  %v2680_v44 = vld [vmem:[#allocation2 + $0x378] sm:$0xff] }
 0x372   : > { %v3884_v25 = vpop.f32.mrf.mxu1  ;;  %v8154_v7 = vpop.f32.mrf.mxu0  ;;  %v2683_v23 = vld [vmem:[#allocation2 + $0x78] sm:$0xff] }
 0x373   : > { %4528 = vst [vmem:[#allocation2 + $0x238] sm:$0xff] %v4400_v63  ;;  %v4403_v39 = vadd.f32 %v3883_v14, %v2671_v61  ;;  %v3885_v60 = vadd.f32 %v3884_v25, %v8021_v28  ;;  %v2684_v14 = vld [vmem:[#allocation2 + $0x308] sm:$0xff] }
 0x374   : > { %v3888_v2 = vpop.f32.mrf.mxu1  ;;  %v8158_v63 = vpop.f32.mrf.mxu0 }
 0x375   : > { %4531 = vst [vmem:[#allocation2 + $0x1a0] sm:$0xff] %v4403_v39  ;;  %v4404_v57 = vadd.f32 %v3885_v60, %v2672_v59  ;;  %v3889_v62 = vadd.f32 %v3888_v2, %v8024_v26  ;;  %v2687_v39 = vld [vmem:[#allocation2 + $0x278] sm:$0xff] }
 0x376   : > { %v3890_v5 = vpop.f32.mrf.mxu1  ;;  %v8162_v2 = vpop.f32.mrf.mxu0 }
 0x377   : > { %4532 = vst [vmem:[#allocation2 + $0xa8] sm:$0xff] %v4404_v57  ;;  %v4407_v32 = vadd.f32 %v3889_v62, %v2675_v37  ;;  %v3891_v20 = vadd.f32 %v3890_v5, %v8029_v38  ;;  %v2688_v57 = vld [vmem:[#allocation2 + $0x360] sm:$0xff]  ;;  %v2691_v5 = vld [vmem:[#allocation2 + $0x148] sm:$0xff] }
 0x378   : > { %v3892_v43 = vpop.f32.mrf.mxu1 }
 0x379   : > { %4535 = vst [vmem:[#allocation2 + $0xf0] sm:$0xff] %v4407_v32  ;;  %v4408_v52 = vadd.f32 %v3891_v20, %v2676_v53  ;;  %v3893_v28 = vadd.f32 %v3892_v43, %v8032_v22  ;;  %v2692_v43 = vld [vmem:[#allocation2 + $0xf8] sm:$0xff] }
 0x37a   : > { %v3894_v27 = vpop.f32.mrf.mxu1 }
 0x37b   : > { %4536 = vst [vmem:[#allocation2 + $0x180] sm:$0xff] %v4408_v52  ;;  %v4411_v26 = vadd.f32 %v3893_v28, %v2679_v16  ;;  %v3895_v46 = vadd.f32 %v3894_v27, %v8035_v12  ;;  %v8166_v16 = vpop.f32.mrf.mxu0 }
 0x37c   : > { %v3898_v61 = vpop.f32.mrf.mxu1 }
 0x37d   : > { %4539 = vst [vmem:[#allocation2 + $0x250] sm:$0xff] %v4411_v26  ;;  %v4412_v3 = vadd.f32 %v3895_v46, %v2680_v44  ;;  %v3899_v38 = vadd.f32 %v3898_v61, %v8038_v1  ;;  %v2695_v44 = vld [vmem:[#allocation2 + $0x298] sm:$0xff]  ;;  %v8170_v46 = vpop.f32.mrf.mxu0 }
 0x37e   : > { %v3900_v59 = vpop.f32.mrf.mxu1 }
 0x37f   : > { %4540 = vst [vmem:[#allocation2 + $0x378] sm:$0xff] %v4412_v3  ;;  %v4415_v22 = vadd.f32 %v3899_v38, %v2683_v23  ;;  %v3901_v25 = vadd.f32 %v3900_v59, %v8043_v0  ;;  %v2696_v23 = vld [vmem:[#allocation2 + $0x270] sm:$0xff]  ;;  %v2573_v38 = vld [vmem:[#allocation2 + $0xd8] sm:$0xff] }
 0x380   : > { %v3902_v60 = vpop.f32.mrf.mxu1 }
 0x381   : > { %4543 = vst [vmem:[#allocation2 + $0x78] sm:$0xff] %v4415_v22  ;;  %v4416_v37 = vadd.f32 %v3901_v25, %v2684_v14  ;;  %v3903_v12 = vadd.f32 %v3902_v60, %v8046_v41  ;;  %v8174_v22 = vpop.f32.mrf.mxu0  ;;  %v2574_v25 = vld [vmem:[#allocation2 + $0x18] sm:$0xff] }
 0x382   : > { %v3904_v62 = vpop.f32.mrf.mxu1 }
 0x383   : > { %4544 = vst [vmem:[#allocation2 + $0x308] sm:$0xff] %v4416_v37  ;;  %v4419_v1 = vadd.f32 %v3903_v12, %v2687_v39  ;;  %v3905_v53 = vadd.f32 %v3904_v62, %v8049_v45  ;;  %v2577_v37 = vld [vmem:[#allocation2 + $0x330] sm:$0xff]  ;;  %v8178_v62 = vpop.f32.mrf.mxu0 }
 0x384   : > { %v3908_v32 = vpop.f32.mrf.mxu1 }
 0x385   : > { %4547 = vst [vmem:[#allocation2 + $0x278] sm:$0xff] %v4419_v1  ;;  %v4420_v20 = vadd.f32 %v3905_v53, %v2688_v57  ;;  %v3909_v0 = vadd.f32 %v3908_v32, %v8052_v49  ;;  %v2578_v1 = vld [vmem:[#allocation2 + $0x48] sm:$0xff]  ;;  %v2581_v32 = vld [vmem:[#allocation2 + $0x118] sm:$0xff] }
 0x386   : > { %v3910_v52 = vpop.f32.mrf.mxu1 }
 0x387   : > { %4548 = vst [vmem:[#allocation2 + $0x360] sm:$0xff] %v4420_v20  ;;  %v4423_v41 = vadd.f32 %v3909_v0, %v2691_v5  ;;  %v3911_v28 = vadd.f32 %v3910_v52, %v8057_v11  ;;  %v2582_v52 = vld [vmem:[#allocation2 + $0x98] sm:$0xff] }
 0x388   : > { %v3912_v27 = vpop.f32.mrf.mxu1 }
 0x389   : > { %4551 = vst [vmem:[#allocation2 + $0x148] sm:$0xff] %v4423_v41  ;;  %v4424_v26 = vadd.f32 %v3911_v28, %v2692_v43  ;;  %v3913_v45 = vadd.f32 %v3912_v27, %v8060_v9  ;;  %v8182_v43 = vpop.f32.mrf.mxu0 }
 0x38a   : > { %v3914_v61 = vpop.f32.mrf.mxu1 }
 0x38b   : > { %4552 = vst [vmem:[#allocation2 + $0xf8] sm:$0xff] %v4424_v26  ;;  %v4427_v49 = vadd.f32 %v3913_v45, %v2695_v44  ;;  %v3915_v3 = vadd.f32 %v3914_v61, %v8063_v21  ;;  %v2585_v44 = vld [vmem:[#allocation2 + $0x108] sm:$0xff]  ;;  %v8186_v45 = vpop.f32.mrf.mxu0 }
 0x38c   : > { %v4144_v14 = vpop.f32.mrf.mxu1 }
 0x38d   : > { %4555 = vst [vmem:[#allocation2 + $0x298] sm:$0xff] %v4427_v49  ;;  %v4428_v59 = vadd.f32 %v3915_v3, %v2696_v23  ;;  %v4145_v11 = vadd.f32 %v4144_v14, %v8066_v29  ;;  %v2586_v23 = vld [vmem:[#allocation2 + $0x60] sm:$0xff]  ;;  %v2589_v3 = vld [vmem:[#allocation2 + $0x338] sm:$0xff] }
 0x38e   : > { %v4146_v39 = vpop.f32.mrf.mxu1 }
 0x38f   : > { %4556 = vst [vmem:[#allocation2 + $0x270] sm:$0xff] %v4428_v59  ;;  %v4305_v9 = vadd.f32 %v4145_v11, %v2573_v38  ;;  %v4147_v60 = vadd.f32 %v4146_v39, %v8071_v50  ;;  %v8190_v59 = vpop.f32.mrf.mxu0  ;;  %v2590_v11 = vld [vmem:[#allocation2 + $0x340] sm:$0xff] }
 0x390   : > { %v4148_v12 = vpop.f32.mrf.mxu1 }
 0x391   : > { %4433 = vst [vmem:[#allocation2 + $0xd8] sm:$0xff] %v4305_v9  ;;  %v4306_v57 = vadd.f32 %v4147_v60, %v2574_v25  ;;  %v4149_v21 = vadd.f32 %v4148_v12, %v8074_v10  ;;  %v2593_v9 = vld [vmem:[#allocation2 + $0x1b8] sm:$0xff]  ;;  %v8194_v12 = vpop.f32.mrf.mxu0 }
 0x392   : > { %v4150_v53 = vpop.f32.mrf.mxu1 }
 0x393   : > { %4434 = vst [vmem:[#allocation2 + $0x18] sm:$0xff] %v4306_v57  ;;  %v4309_v29 = vadd.f32 %v4149_v21, %v2577_v37  ;;  %v4151_v5 = vadd.f32 %v4150_v53, %v8077_v18  ;;  %v2594_v57 = vld [vmem:[#allocation2 + $0x168] sm:$0xff]  ;;  %v2597_v53 = vld [vmem:[#allocation2 + $0x290] sm:$0xff] }
 0x394   : > { %v4154_v20 = vpop.f32.mrf.mxu1 }
 0x395   : > { %4437 = vst [vmem:[#allocation2 + $0x330] sm:$0xff] %v4309_v29  ;;  %v4310_v0 = vadd.f32 %v4151_v5, %v2578_v1  ;;  %v4155_v50 = vadd.f32 %v4154_v20, %v8080_v58  ;;  %v2598_v20 = vld [vmem:[#allocation2 + $0x28] sm:$0xff] }
 0x396   : > { %v4156_v41 = vpop.f32.mrf.mxu1 }
 0x397   : > { %4438 = vst [vmem:[#allocation2 + $0x48] sm:$0xff] %v4310_v0  ;;  %v4313_v10 = vadd.f32 %v4155_v50, %v2581_v32  ;;  %v4157_v28 = vadd.f32 %v4156_v41, %v8084_v17  ;;  %v8198_v32 = vpop.f32.mrf.mxu0 }
 0x398   : > { %v4158_v27 = vpop.f32.mrf.mxu1 }
 0x399   : > { %4441 = vst [vmem:[#allocation2 + $0x118] sm:$0xff] %v4313_v10  ;;  %v4314_v26 = vadd.f32 %v4157_v28, %v2582_v52  ;;  %v4159_v18 = vadd.f32 %v4158_v27, %v8087_v6  ;;  %v2601_v52 = vld [vmem:[#allocation2 + $0x1c0] sm:$0xff]  ;;  %v8202_v28 = vpop.f32.mrf.mxu0 }
 0x39a   : > { %v4160_v61 = vpop.f32.mrf.mxu1 }
 0x39b   : > { %4442 = vst [vmem:[#allocation2 + $0x98] sm:$0xff] %v4314_v26  ;;  %v4317_v58 = vadd.f32 %v4159_v18, %v2585_v44  ;;  %v4161_v49 = vadd.f32 %v4160_v61, %v8090_v55  ;;  %v2602_v44 = vld [vmem:[#allocation2 + $0x280] sm:$0xff]  ;;  %v2605_v18 = vld [vmem:[#allocation2 + $0x158] sm:$0xff] }
 0x39c   : > { %v4164_v38 = vpop.f32.mrf.mxu1 }
 0x39d   : > { %4445 = vst [vmem:[#allocation2 + $0x108] sm:$0xff] %v4317_v58  ;;  %v4318_v14 = vadd.f32 %v4161_v49, %v2586_v23  ;;  %v4165_v17 = vadd.f32 %v4164_v38, %v8093_v36  ;;  %v8206_v58 = vpop.f32.mrf.mxu0  ;;  %v2606_v49 = vld [vmem:[#allocation2 + $0x3e0] sm:$0xff] }
 0x39e   : > { %v4166_v25 = vpop.f32.mrf.mxu1 }
 0x39f   : > { %4446 = vst [vmem:[#allocation2 + $0x60] sm:$0xff] %v4318_v14  ;;  %v4321_v6 = vadd.f32 %v4165_v17, %v2589_v3  ;;  %v4167_v39 = vadd.f32 %v4166_v25, %v8096_v30  ;;  %v2609_v14 = vld [vmem:[#allocation2 + $0x8] sm:$0xff]  ;;  %v8210_v25 = vpop.f32.mrf.mxu0 }
 0x3a0   : > { %v4168_v60 = vpop.f32.mrf.mxu1 }
 0x3a1   : > { %4449 = vst [vmem:[#allocation2 + $0x338] sm:$0xff] %v4321_v6  ;;  %v4322_v37 = vadd.f32 %v4167_v39, %v2590_v11  ;;  %v4169_v55 = vadd.f32 %v4168_v60, %v8099_v48  ;;  %v2610_v6 = vld [vmem:[#allocation2 + $0x128] sm:$0xff]  ;;  %v2613_v60 = vld [vmem:[#allocation2 + $0xa0] sm:$0xff] }
 0x3a2   : > { %v4170_v21 = vpop.f32.mrf.mxu1 }
 0x3a3   : > { %4450 = vst [vmem:[#allocation2 + $0x340] sm:$0xff] %v4322_v37  ;;  %v4325_v36 = vadd.f32 %v4169_v55, %v2593_v9  ;;  %v4171_v1 = vadd.f32 %v4170_v21, %v8102_v13  ;;  %v2614_v21 = vld [vmem:[#allocation2 + $0x2c0] sm:$0xff] }
 0x3a4   : > { %v4174_v29 = vpop.f32.mrf.mxu1 }
 0x3a5   : > { %4453 = vst [vmem:[#allocation2 + $0x1b8] sm:$0xff] %v4325_v36  ;;  %v4326_v5 = vadd.f32 %v4171_v1, %v2594_v57  ;;  %v4175_v30 = vadd.f32 %v4174_v29, %v8105_v8  ;;  %v8214_v57 = vpop.f32.mrf.mxu0 }
 0x3a6   : > { %v4176_v0 = vpop.f32.mrf.mxu1 }
 0x3a7   : > { %4454 = vst [vmem:[#allocation2 + $0x168] sm:$0xff] %v4326_v5  ;;  %v4329_v48 = vadd.f32 %v4175_v30, %v2597_v53  ;;  %v4177_v50 = vadd.f32 %v4176_v0, %v8108_v34  ;;  %v2617_v53 = vld [vmem:[#allocation2 + $0x1f0] sm:$0xff]  ;;  %v8218_v30 = vpop.f32.mrf.mxu0 }
 0x3a8   : > { %v4178_v41 = vpop.f32.mrf.mxu1 }
 0x3a9   : > { %4457 = vst [vmem:[#allocation2 + $0x290] sm:$0xff] %v4329_v48  ;;  %v4330_v10 = vadd.f32 %v4177_v50, %v2598_v20  ;;  %v4179_v13 = vadd.f32 %v4178_v41, %v8111_v51  ;;  %v2618_v20 = vld [vmem:[#allocation2 + $0x10] sm:$0xff] }
 0x3aa   : > { %v4180_v27 = vpop.f32.mrf.mxu1  ;;  %v2621_v50 = vld [vmem:[#allocation2 + $0x90] sm:$0xff] }
 0x3ab   : > { %4458 = vst [vmem:[#allocation2 + $0x28] sm:$0xff] %v4330_v10  ;;  %v4333_v8 = vadd.f32 %v4179_v13, %v2601_v52  ;;  %v4181_v26 = vadd.f32 %v4180_v27, %v8114_v33  ;;  %v8222_v10 = vpop.f32.mrf.mxu0  ;;  %v2622_v13 = vld [vmem:[#allocation2 + $0x3a0] sm:$0xff] }
 0x3ac   : > { %v4184_v23 = vpop.f32.mrf.mxu1 }
 0x3ad   : > { %4461 = vst [vmem:[#allocation2 + $0x1c0] sm:$0xff] %v4333_v8  ;;  %v4334_v61 = vadd.f32 %v4181_v26, %v2602_v44  ;;  %v4185_v34 = vadd.f32 %v4184_v23, %v8117_v54  ;;  %v2625_v8 = vld [vmem:[#allocation2 + $0x88] sm:$0xff]  ;;  %v8226_v23 = vpop.f32.mrf.mxu0 }
 0x3ae   : > { %v4186_v3 = vpop.f32.mrf.mxu1 }
 0x3af   : > { %4462 = vst [vmem:[#allocation2 + $0x280] sm:$0xff] %v4334_v61  ;;  %v4337_v51 = vadd.f32 %v4185_v34, %v2605_v18  ;;  %v4187_v38 = vadd.f32 %v4186_v3, %v8120_v40  ;;  %v2626_v61 = vld [vmem:[#allocation2 + $0x2f0] sm:$0xff] }
 0x3b0   : > { %v4188_v17 = vpop.f32.mrf.mxu1  ;;  %v2629_v3 = vld [vmem:[#allocation2 + $0x350] sm:$0xff] }
 0x3b1   : > { %4465 = vst [vmem:[#allocation2 + $0x158] sm:$0xff] %v4337_v51  ;;  %v4338_v11 = vadd.f32 %v4187_v38, %v2606_v49  ;;  %v4189_v33 = vadd.f32 %v4188_v17, %v8123_v56  ;;  %v2630_v17 = vld [vmem:[#allocation2 + $0x188] sm:$0xff] }
 0x3b2   : > { %v4190_v39 = vpop.f32.mrf.mxu1 }
 0x3b3   : > { %4466 = vst [vmem:[#allocation2 + $0x3e0] sm:$0xff] %v4338_v11  ;;  %v4341_v54 = vadd.f32 %v4189_v33, %v2609_v14  ;;  %v4191_v9 = vadd.f32 %v4190_v39, %v8126_v19  ;;  %v8230_v14 = vpop.f32.mrf.mxu0 }
 0x3b4   : > { %v4194_v37 = vpop.f32.mrf.mxu1 }
 0x3b5   : > { %4469 = vst [vmem:[#allocation2 + $0x8] sm:$0xff] %v4341_v54  ;;  %v4342_v55 = vadd.f32 %v4191_v9, %v2610_v6  ;;  %v4195_v40 = vadd.f32 %v4194_v37, %v8129_v15  ;;  %v2633_v6 = vld [vmem:[#allocation2 + $0x140] sm:$0xff]  ;;  %v8234_v9 = vpop.f32.mrf.mxu0 }
 0x3b6   : > { %v4196_v36 = vpop.f32.mrf.mxu1 }
 0x3b7   : > { %4470 = vst [vmem:[#allocation2 + $0x128] sm:$0xff] %v4342_v55  ;;  %v4345_v56 = vadd.f32 %v4195_v40, %v2613_v60  ;;  %v4197_v1 = vadd.f32 %v4196_v36, %v8132_v31  ;;  %v2634_v60 = vld [vmem:[#allocation2 + $0x2a8] sm:$0xff]  ;;  %v2637_v40 = vld [vmem:[#allocation2 + $0x318] sm:$0xff] }
 0x3b8   : > { %v4198_v29 = vpop.f32.mrf.mxu1 }
 0x3b9   : > { %4473 = vst [vmem:[#allocation2 + $0xa0] sm:$0xff] %v4345_v56  ;;  %v4346_v5 = vadd.f32 %v4197_v1, %v2614_v21  ;;  %v4199_v19 = vadd.f32 %v4198_v29, %v8135_v24  ;;  %v8238_v56 = vpop.f32.mrf.mxu0  ;;  %v2638_v1 = vld [vmem:[#allocation2 + $0x220] sm:$0xff] }
 0x3ba   : > { %v4200_v0 = vpop.f32.mrf.mxu1 }
 0x3bb   : > { %4474 = vst [vmem:[#allocation2 + $0x2c0] sm:$0xff] %v4346_v5  ;;  %v4349_v15 = vadd.f32 %v4199_v19, %v2617_v53  ;;  %v4201_v48 = vadd.f32 %v4200_v0, %v8138_v42  ;;  %v2641_v5 = vld [vmem:[#allocation2 + $0xe0] sm:$0xff]  ;;  %v8242_v0 = vpop.f32.mrf.mxu0 }
 0x3bc   : > { %v4204_v52 = vpop.f32.mrf.mxu1 }
 0x3bd   : > { %4477 = vst [vmem:[#allocation2 + $0x1f0] sm:$0xff] %v4349_v15  ;;  %v4350_v41 = vadd.f32 %v4201_v48, %v2618_v20  ;;  %v4205_v31 = vadd.f32 %v4204_v52, %v8142_v4  ;;  %v2642_v15 = vld [vmem:[#allocation2 + $0x178] sm:$0xff] }
 0x3be   : > { %v4206_v44 = vpop.f32.mrf.mxu1  ;;  %v2645_v52 = vld [vmem:[#allocation2 + $0x3b8] sm:$0xff] }
 0x3bf   : > { %4478 = vst [vmem:[#allocation2 + $0x10] sm:$0xff] %v4350_v41  ;;  %v4353_v24 = vadd.f32 %v4205_v31, %v2621_v50  ;;  %v4207_v27 = vadd.f32 %v4206_v44, %v8146_v47  ;;  %v2646_v44 = vld [vmem:[#allocation2 + $0x2b8] sm:$0xff] }
 0x3c0   : > { %v4208_v26 = vpop.f32.mrf.mxu1 }
 0x3c1   : > { %4481 = vst [vmem:[#allocation2 + $0x90] sm:$0xff] %v4353_v24  ;;  %v4354_v18 = vadd.f32 %v4207_v27, %v2622_v13  ;;  %v4209_v42 = vadd.f32 %v4208_v26, %v8150_v35  ;;  %v8246_v13 = vpop.f32.mrf.mxu0 }
 0x3c2   : > { %v4210_v34 = vpop.f32.mrf.mxu1 }
 0x3c3   : > { %4482 = vst [vmem:[#allocation2 + $0x3a0] sm:$0xff] %v4354_v18  ;;  %v4357_v4 = vadd.f32 %v4209_v42, %v2625_v8  ;;  %v4211_v49 = vadd.f32 %v4210_v34, %v8154_v7  ;;  %v2649_v8 = vld [vmem:[#allocation2 + $0x20] sm:$0xff]  ;;  %v8250_v42 = vpop.f32.mrf.mxu0 }
 0x3c4   : > { %v4214_v51 = vpop.f32.mrf.mxu1 }
 0x3c5   : > { %4485 = vst [vmem:[#allocation2 + $0x88] sm:$0xff] %v4357_v4  ;;  %v4358_v38 = vadd.f32 %v4211_v49, %v2626_v61  ;;  %v4215_v47 = vadd.f32 %v4214_v51, %v8158_v63  ;;  %v2650_v61 = vld [vmem:[#allocation2 + $0xe8] sm:$0xff] }
 0x3c6   : > { %v4216_v11 = vpop.f32.mrf.mxu1  ;;  %v2653_v49 = vld [vmem:[#allocation2 + $0x3c8] sm:$0xff] }
 0x3c7   : > { %4486 = vst [vmem:[#allocation2 + $0x2f0] sm:$0xff] %v4358_v38  ;;  %v4361_v35 = vadd.f32 %v4215_v47, %v2629_v3  ;;  %v4217_v33 = vadd.f32 %v4216_v11, %v8162_v2  ;;  %v8254_v38 = vpop.f32.mrf.mxu0  ;;  %v2654_v47 = vld [vmem:[#allocation2 + $0x160] sm:$0xff] }
 0x3c8   : > { %v4218_v39 = vpop.f32.mrf.mxu1 }
 0x3c9   : > { %4489 = vst [vmem:[#allocation2 + $0x350] sm:$0xff] %v4361_v35  ;;  %v4362_v54 = vadd.f32 %v4217_v33, %v2630_v17  ;;  %v4219_v7 = vadd.f32 %v4218_v39, %v8166_v16  ;;  %v2657_v35 = vld [vmem:[#allocation2 + $0x3d8] sm:$0xff]  ;;  %v4083_v39 = vpop.f32.mrf.mxu0 }
 0x3ca   : > { %v4220_v37 = vpop.f32.mrf.mxu1 }
 0x3cb   : > { %4490 = vst [vmem:[#allocation2 + $0x188] sm:$0xff] %v4362_v54  ;;  %v4365_v63 = vadd.f32 %v4219_v7, %v2633_v6  ;;  %v4221_v55 = vadd.f32 %v4220_v37, %v8170_v46  ;;  %v2658_v54 = vld [vmem:[#allocation2 + $0x1e8] sm:$0xff]  ;;  %v2661_v37 = vld [vmem:[#allocation2 + $0x2d0] sm:$0xff] }
 0x3cc   : > { %v4224_v21 = vpop.f32.mrf.mxu1 }
 0x3cd   : > { %4493 = vst [vmem:[#allocation2 + $0x140] sm:$0xff] %v4365_v63  ;;  %v4366_v36 = vadd.f32 %v4221_v55, %v2634_v60  ;;  %v4225_v2 = vadd.f32 %v4224_v21, %v8174_v22  ;;  %v2662_v21 = vld [vmem:[#allocation2 + $0x1d0] sm:$0xff] }
 0x3ce   : > { %v4226_v53 = vpop.f32.mrf.mxu1 }
 0x3cf   : > { %4494 = vst [vmem:[#allocation2 + $0x2a8] sm:$0xff] %v4366_v36  ;;  %v4369_v16 = vadd.f32 %v4225_v2, %v2637_v40  ;;  %v4227_v29 = vadd.f32 %v4226_v53, %v8178_v62 }
 0x3d0   : > { %v4228_v19 = vpop.f32.mrf.mxu1 }
 0x3d1   : > { %4497 = vst [vmem:[#allocation2 + $0x318] sm:$0xff] %v4369_v16  ;;  %v4370_v20 = vadd.f32 %v4227_v29, %v2638_v1  ;;  %v4229_v46 = vadd.f32 %v4228_v19, %v8182_v43  ;;  %v2665_v1 = vld [vmem:[#allocation2 + $0x198] sm:$0xff] }
 0x3d2   : > { %v4230_v48 = vpop.f32.mrf.mxu1 }
 0x3d3   : > { %4498 = vst [vmem:[#allocation2 + $0x220] sm:$0xff] %v4370_v20  ;;  %v4373_v22 = vadd.f32 %v4229_v46, %v2641_v5  ;;  %v4231_v50 = vadd.f32 %v4230_v48, %v8186_v45  ;;  %v2666_v5 = vld [vmem:[#allocation2 + $0x2e8] sm:$0xff]  ;;  %v2669_v46 = vld [vmem:[#allocation2 + $0x398] sm:$0xff] }
 0x3d4   : > { %v4234_v41 = vpop.f32.mrf.mxu1 }
 0x3d5   : > { %4501 = vst [vmem:[#allocation2 + $0xe0] sm:$0xff] %v4373_v22  ;;  %v4374_v31 = vadd.f32 %v4231_v50, %v2642_v15  ;;  %v4235_v62 = vadd.f32 %v4234_v41, %v8190_v59  ;;  %v2670_v50 = vld [vmem:[#allocation2 + $0x390] sm:$0xff] }
 0x3d6   : > { %v4236_v24 = vpop.f32.mrf.mxu1 }
 0x3d7   : > { %4502 = vst [vmem:[#allocation2 + $0x178] sm:$0xff] %v4374_v31  ;;  %v4377_v43 = vadd.f32 %v4235_v62, %v2645_v52  ;;  %v4237_v27 = vadd.f32 %v4236_v24, %v8194_v12  ;;  %v2673_v31 = vld [vmem:[#allocation2 + $0x258] sm:$0xff] }
 0x3d8   : > { %v4238_v26 = vpop.f32.mrf.mxu1 }
 0x3d9   : > { %4505 = vst [vmem:[#allocation2 + $0x3b8] sm:$0xff] %v4377_v43  ;;  %v4378_v18 = vadd.f32 %v4237_v27, %v2646_v44  ;;  %v4239_v45 = vadd.f32 %v4238_v26, %v8198_v32  ;;  %v2674_v43 = vld [vmem:[#allocation2 + $0x2d8] sm:$0xff]  ;;  %v2677_v26 = vld [vmem:[#allocation2 + $0x170] sm:$0xff] }
 0x3da   : > { %v4240_v34 = vpop.f32.mrf.mxu1 }
 0x3db   : > { %4506 = vst [vmem:[#allocation2 + $0x2b8] sm:$0xff] %v4378_v18  ;;  %v4381_v59 = vadd.f32 %v4239_v45, %v2649_v8  ;;  %v4241_v4 = vadd.f32 %v4240_v34, %v8202_v28  ;;  %v2678_v34 = vld [vmem:[#allocation2 + $0x3d0] sm:$0xff] }
 0x3dc   : > { %v4244_v3 = vpop.f32.mrf.mxu1 }
 0x3dd   : > { %4509 = vst [vmem:[#allocation2 + $0x20] sm:$0xff] %v4381_v59  ;;  %v4382_v51 = vadd.f32 %v4241_v4, %v2650_v61  ;;  %v4245_v12 = vadd.f32 %v4244_v3, %v8206_v58 }
 0x3de   : > { %v4246_v17 = vpop.f32.mrf.mxu1 }
 0x3df   : > { %4510 = vst [vmem:[#allocation2 + $0xe8] sm:$0xff] %v4382_v51  ;;  %v4385_v32 = vadd.f32 %v4245_v12, %v2653_v49  ;;  %v4247_v11 = vadd.f32 %v4246_v17, %v8210_v25  ;;  %v4085_v25 = vpop.f32.mrf.mxu0  ;;  %v2682_v17 = vld [vmem:[#allocation2 + $0x38] sm:$0xff] }
 0x3e0   : > { %v4248_v33 = vpop.f32.mrf.mxu1 }
 0x3e1   : > { %4513 = vst [vmem:[#allocation2 + $0x3c8] sm:$0xff] %v4385_v32  ;;  %v4386_v6 = vadd.f32 %v4247_v11, %v2654_v47  ;;  %v4249_v28 = vadd.f32 %v4248_v33, %v8214_v57 }
 0x3e2   : > { %v4250_v7 = vpop.f32.mrf.mxu1 }
 0x3e3   : > { %4514 = vst [vmem:[#allocation2 + $0x160] sm:$0xff] %v4386_v6  ;;  %v4389_v60 = vadd.f32 %v4249_v28, %v2657_v35  ;;  %v4251_v58 = vadd.f32 %v4250_v7, %v8218_v30  ;;  %v4087_v30 = vpop.f32.mrf.mxu0  ;;  %v2685_v35 = vld [vmem:[#allocation2 + $0x370] sm:$0xff] }
 0x3e4   : > { %v4254_v63 = vpop.f32.mrf.mxu1 }
 0x3e5   : > { %4517 = vst [vmem:[#allocation2 + $0x3d8] sm:$0xff] %v4389_v60  ;;  %v4390_v55 = vadd.f32 %v4251_v58, %v2658_v54  ;;  %v4255_v40 = vadd.f32 %v4254_v63, %v8222_v10  ;;  %v2686_v54 = vld [vmem:[#allocation2 + $0xc8] sm:$0xff] }
 0x3e6   : > { %v4256_v36 = vpop.f32.mrf.mxu1  ;;  %v2689_v58 = vld [vmem:[#allocation2 + $0x228] sm:$0xff] }
 0x3e7   : > { %4518 = vst [vmem:[#allocation2 + $0x1e8] sm:$0xff] %v4390_v55  ;;  %v4393_v2 = vadd.f32 %v4255_v40, %v2661_v37  ;;  %v4257_v57 = vadd.f32 %v4256_v36, %v8226_v23  ;;  %v4091_v23 = vpop.f32.mrf.mxu0 }
 0x3e8   : > { %v4258_v53 = vpop.f32.mrf.mxu1 }
 0x3e9   : > { %4521 = vst [vmem:[#allocation2 + $0x2d0] sm:$0xff] %v4393_v2  ;;  %v4394_v16 = vadd.f32 %v4257_v57, %v2662_v21  ;;  %v4259_v29 = vadd.f32 %v4258_v53, %v8230_v14  ;;  %v2693_v57 = vld [vmem:[#allocation2 + $0x68] sm:$0xff] }
 0x3ea   : > { %v4260_v19 = vpop.f32.mrf.mxu1 }
 0x3eb   : > { %4522 = vst [vmem:[#allocation2 + $0x1d0] sm:$0xff] %v4394_v16  ;;  %v4397_v20 = vadd.f32 %v4259_v29, %v2665_v1  ;;  %v4261_v10 = vadd.f32 %v4260_v19, %v8234_v9  ;;  %v4093_v9 = vpop.f32.mrf.mxu0 }
 0x3ec   : > { %v4264_v15 = vpop.f32.mrf.mxu1 }
 0x3ed   : > { %4525 = vst [vmem:[#allocation2 + $0x198] sm:$0xff] %v4397_v20  ;;  %v4398_v48 = vadd.f32 %v4261_v10, %v2666_v5  ;;  %v4265_v22 = vadd.f32 %v4264_v15, %v8238_v56  ;;  %v2697_v10 = vld [vmem:[#allocation2 + $0x310] sm:$0xff] }
 0x3ee   : > { %v4266_v52 = vpop.f32.mrf.mxu1 }
 0x3ef   : > { %4526 = vst [vmem:[#allocation2 + $0x2e8] sm:$0xff] %v4398_v48  ;;  %v4401_v41 = vadd.f32 %v4265_v22, %v2669_v46  ;;  %v4267_v14 = vadd.f32 %v4266_v52, %v8242_v0  ;;  %v4095_v0 = vpop.f32.mrf.mxu0 }
 0x3f0   : > { %v4268_v62 = vpop.f32.mrf.mxu1 }
 0x3f1   : > { %4529 = vst [vmem:[#allocation2 + $0x398] sm:$0xff] %v4401_v41  ;;  %v4402_v44 = vadd.f32 %v4267_v14, %v2670_v50  ;;  %v4269_v24 = vadd.f32 %v4268_v62, %v8246_v13  ;;  %v2681_v13 = vld [vmem:[#allocation2 + $0xb8] sm:$0xff]  ;;  %v4097_v47 = vpop.f32.mrf.mxu0 }
 0x3f2   : > { %v4270_v27 = vpop.f32.mrf.mxu1 }
 0x3f3   : > { %4530 = vst [vmem:[#allocation2 + $0x390] sm:$0xff] %v4402_v44  ;;  %v4405_v8 = vadd.f32 %v4269_v24, %v2673_v31  ;;  %v4271_v56 = vadd.f32 %v4270_v27, %v8250_v42  ;;  %v4101_v28 = vpop.f32.mrf.mxu0 }
 0x3f4   : > { %v4274_v18 = vpop.f32.mrf.mxu1 }
 0x3f5   : > { %4533 = vst [vmem:[#allocation2 + $0x258] sm:$0xff] %v4405_v8  ;;  %v4406_v45 = vadd.f32 %v4271_v56, %v2674_v43  ;;  %v4275_v61 = vadd.f32 %v4274_v18, %v8254_v38  ;;  %v4103_v40 = vpop.f32.mrf.mxu0 }
 0x3f6   : > { %v4276_v59 = vpop.f32.mrf.mxu1 }
 0x3f7   : > { %4534 = vst [vmem:[#allocation2 + $0x2d8] sm:$0xff] %v4406_v45  ;;  %v4409_v4 = vadd.f32 %v4275_v61, %v2677_v26  ;;  %v4277_v49 = vadd.f32 %v4276_v59, %v4083_v39  ;;  %v4105_v29 = vpop.f32.mrf.mxu0 }
 0x3f8   : > { %v4278_v3 = vpop.f32.mrf.mxu1 }
 0x3f9   : > { %4537 = vst [vmem:[#allocation2 + $0x170] sm:$0xff] %v4409_v4  ;;  %v4410_v51 = vadd.f32 %v4277_v49, %v2678_v34  ;;  %v4279_v12 = vadd.f32 %v4278_v3, %v4085_v25  ;;  %v2690_v25 = vld [vmem:[#allocation2 + $0x348] sm:$0xff]  ;;  %v4107_v22 = vpop.f32.mrf.mxu0 }
 0x3fa   : > { %v4280_v42 = vpop.f32.mrf.mxu1 }
 0x3fb   : > { %4538 = vst [vmem:[#allocation2 + $0x3d0] sm:$0xff] %v4410_v51  ;;  %v4413_v32 = vadd.f32 %v4279_v12, %v2681_v13  ;;  %v4281_v11 = vadd.f32 %v4280_v42, %v4087_v30  ;;  %v2694_v30 = vld [vmem:[#allocation2] sm:$0xff] }
 0x3fc   : > { %v4284_v33 = vpop.f32.mrf.mxu1 }
 0x3fd   : > { %4541 = vst [vmem:[#allocation2 + $0xb8] sm:$0xff] %v4413_v32  ;;  %v4414_v38 = vadd.f32 %v4281_v11, %v2682_v17  ;;  %v4285_v6 = vadd.f32 %v4284_v33, %v4091_v23  ;;  %v2698_v23 = vld [vmem:[#allocation2 + $0x190] sm:$0xff] }
 0x3fe   : > { %v4286_v7 = vpop.f32.mrf.mxu1 }
 0x3ff   : > { %4542 = vst [vmem:[#allocation2 + $0x38] sm:$0xff] %v4414_v38  ;;  %v4417_v39 = vadd.f32 %v4285_v6, %v2685_v35  ;;  %v4287_v60 = vadd.f32 %v4286_v7, %v4093_v9 }
 0x400   : > { %v4288_v37 = vpop.f32.mrf.mxu1 }
 0x401   : > { %4545 = vst [vmem:[#allocation2 + $0x370] sm:$0xff] %v4417_v39  ;;  %v4418_v63 = vadd.f32 %v4287_v60, %v2686_v54  ;;  %v4289_v55 = vadd.f32 %v4288_v37, %v4095_v0 }
 0x402   : > { %v4290_v21 = vpop.f32.mrf.mxu1 }
 0x403   : > { %4546 = vst [vmem:[#allocation2 + $0xc8] sm:$0xff] %v4418_v63  ;;  %v4421_v36 = vadd.f32 %v4289_v55, %v2689_v58  ;;  %v4291_v2 = vadd.f32 %v4290_v21, %v4097_v47 }
 0x404   : > { %v4294_v1 = vpop.f32.mrf.mxu1 }
 0x405   : > { %4549 = vst [vmem:[#allocation2 + $0x228] sm:$0xff] %v4421_v36  ;;  %v4422_v53 = vadd.f32 %v4291_v2, %v2690_v25  ;;  %v4295_v16 = vadd.f32 %v4294_v1, %v4101_v28 }
 0x406   : > { %v4296_v5 = vpop.f32.mrf.mxu1 }
 0x407   : > { %4550 = vst [vmem:[#allocation2 + $0x348] sm:$0xff] %v4422_v53  ;;  %v4425_v19 = vadd.f32 %v4295_v16, %v2693_v57  ;;  %v4297_v20 = vadd.f32 %v4296_v5, %v4103_v40 }
 0x408   : > { %v4298_v46 = vpop.f32.mrf.mxu1 }
 0x409   : > { %4553 = vst [vmem:[#allocation2 + $0x68] sm:$0xff] %v4425_v19  ;;  %v4426_v15 = vadd.f32 %v4297_v20, %v2694_v30  ;;  %v4299_v48 = vadd.f32 %v4298_v46, %v4105_v29 }
 0x40a   : > { %v4300_v50 = vpop.f32.mrf.mxu1 }
 0x40b   : > { %4554 = vst [vmem:[#allocation2] sm:$0xff] %v4426_v15  ;;  %v4429_v52 = vadd.f32 %v4299_v48, %v2697_v10  ;;  %v4301_v41 = vadd.f32 %v4300_v50, %v4107_v22  ;;  %4562 = sbr.rel (%p5451_p6) target bundleno = 1111 (0x457), region = 68 }
 0x40d   : > { %4557 = vst [vmem:[#allocation2 + $0x310] sm:$0xff] %v4429_v52  ;;  %v4430_v14 = vadd.f32 %v4301_v41, %v2698_v23 }
 0x40f   : > { %4558 = vst [vmem:[#allocation2 + $0x190] sm:$0xff] %v4430_v14 }
 0x410   : > { %v4563_v31 = vld [vmem:[#allocation2 + $0x2b0] sm:$0xff]  ;;  %v4691_v62 = vld [vmem:[#allocation11] sm:$0xf]  ;;  %v8593_v24 = vld [vmem:[#allocation25_spill] sm:$0xff] }
 0x411   : > { %v4564_v44 = vld [vmem:[#allocation2 + $0x3b0] sm:$0xff]  ;;  %v8594_v9 = vsub.s32 0, %v8593_v24  ;;  %v8595_v27 = vsub.s32 1, %v8593_v24  ;;  %v4565_v56 = vld [vmem:[#allocation2 + $0xd8] sm:$0xff]  ;;  %v8596_v26 = vsub.s32 2, %v8593_v24  ;;  %v8597_v61 = vsub.s32 3, %v8593_v24 }
 0x412   : > { %v4566_v45 = vld [vmem:[#allocation2 + $0x18] sm:$0xff]  ;;  %v4567_v34 = vld [vmem:[#allocation2 + $0x50] sm:$0xff]  ;;  %v4568_v59 = vld [vmem:[#allocation2 + $0x368] sm:$0xff] }
 0x413   : > { %v8271_v43 = vrot.slane %v4691_v62, %v8594_v9  ;;  %v8275_v8 = vrot.slane %v4691_v62, %v8595_v27  ;;  %v8279_v18 = vrot.slane %v4691_v62, %v8596_v26  ;;  %v8283_v0 = vrot.slane %v4691_v62, %v8597_v61  ;;  %v4569_v4 = vld [vmem:[#allocation2 + $0x330] sm:$0xff]  ;;  %v4570_v49 = vld [vmem:[#allocation2 + $0x48] sm:$0xff]  ;;  %v4571_v47 = vld [vmem:[#allocation2 + $0x380] sm:$0xff] }
 0x414   : > { %v4572_v17 = vld [vmem:[#allocation2 + $0x110] sm:$0xff]  ;;  %v4573_v42 = vld [vmem:[#allocation2 + $0x118] sm:$0xff]  ;;  %v4575_v6 = vld [vmem:[#allocation2 + $0x320] sm:$0xff] }
 0x415   : > { %v4713_v13 = vadd.f32 %v8271_v43, %v4563_v31  ;;  %v4714_v3 = vadd.f32 %v8275_v8, %v4564_v44  ;;  %v4715_v51 = vadd.f32 %v8279_v18, %v4565_v56  ;;  %v4716_v12 = vadd.f32 %v8283_v0, %v4566_v45  ;;  %v4574_v38 = vld [vmem:[#allocation2 + $0x98] sm:$0xff]  ;;  %v4576_v28 = vld [vmem:[#allocation2 + $0x150] sm:$0xff]  ;;  %v4577_v58 = vld [vmem:[#allocation2 + $0x108] sm:$0xff] }
 0x416   : > { %v4717_v32 = vadd.f32 %v8271_v43, %v4567_v34  ;;  %v4718_v11 = vadd.f32 %v8275_v8, %v4568_v59  ;;  %v4719_v35 = vadd.f32 %v8279_v18, %v4569_v4  ;;  %v4720_v33 = vadd.f32 %v8283_v0, %v4570_v49  ;;  %v4578_v37 = vld [vmem:[#allocation2 + $0x60] sm:$0xff]  ;;  %v4580_v36 = vld [vmem:[#allocation2 + $0x388] sm:$0xff]  ;;  %v4581_v2 = vld [vmem:[#allocation2 + $0x338] sm:$0xff] }
 0x417   : > { %4841 = vst [vmem:[#allocation12] sm:$0xff] %v4713_v13  ;;  %4842 = vst [vmem:[#allocation12 + $0x8] sm:$0xff] %v4714_v3  ;;  %v4721_v54 = vadd.f32 %v8271_v43, %v4571_v47  ;;  %v4722_v7 = vadd.f32 %v8275_v8, %v4572_v17  ;;  %v4723_v39 = vadd.f32 %v8279_v18, %v4573_v42  ;;  %v4579_v63 = vld [vmem:[#allocation2 + $0x2e0] sm:$0xff]  ;;  %v4584_v5 = vld [vmem:[#allocation2 + $0x1a8] sm:$0xff] }
 0x418   : > { %4843 = vst [vmem:[#allocation12 + $0x10] sm:$0xff] %v4715_v51  ;;  %4844 = vst [vmem:[#allocation12 + $0x18] sm:$0xff] %v4716_v12  ;;  %v4724_v60 = vadd.f32 %v8283_v0, %v4574_v38  ;;  %v4725_v55 = vadd.f32 %v8271_v43, %v4575_v6  ;;  %v4726_v40 = vadd.f32 %v8275_v8, %v4576_v28  ;;  %v4582_v57 = vld [vmem:[#allocation2 + $0x340] sm:$0xff]  ;;  %v4585_v19 = vld [vmem:[#allocation2 + $0x1b8] sm:$0xff] }
 0x419   : > { %4845 = vst [vmem:[#allocation12 + $0x20] sm:$0xff] %v4717_v32  ;;  %4846 = vst [vmem:[#allocation12 + $0x28] sm:$0xff] %v4718_v11  ;;  %v4727_v25 = vadd.f32 %v8279_v18, %v4577_v58  ;;  %v4728_v21 = vadd.f32 %v8283_v0, %v4578_v37  ;;  %v4729_v1 = vadd.f32 %v8271_v43, %v4579_v63  ;;  %v4583_v30 = vld [vmem:[#allocation2 + $0x80] sm:$0xff]  ;;  %v4586_v15 = vld [vmem:[#allocation2 + $0x168] sm:$0xff] }
 0x41a   : > { %4847 = vst [vmem:[#allocation12 + $0x30] sm:$0xff] %v4719_v35  ;;  %4848 = vst [vmem:[#allocation12 + $0x38] sm:$0xff] %v4720_v33  ;;  %v4730_v53 = vadd.f32 %v8275_v8, %v4580_v36  ;;  %v4731_v16 = vadd.f32 %v8279_v18, %v4581_v2  ;;  %v4732_v29 = vadd.f32 %v8283_v0, %v4582_v57  ;;  %v4587_v48 = vld [vmem:[#allocation2 + $0x3e8] sm:$0xff]  ;;  %v4588_v22 = vld [vmem:[#allocation2 + $0x2f8] sm:$0xff] }
 0x41b   : > { %4849 = vst [vmem:[#allocation12 + $0x40] sm:$0xff] %v4721_v54  ;;  %4850 = vst [vmem:[#allocation12 + $0x48] sm:$0xff] %v4722_v7  ;;  %v4733_v20 = vadd.f32 %v8271_v43, %v4583_v30  ;;  %v4734_v10 = vadd.f32 %v8275_v8, %v4584_v5  ;;  %v4735_v46 = vadd.f32 %v8279_v18, %v4585_v19  ;;  %v4589_v41 = vld [vmem:[#allocation2 + $0x290] sm:$0xff]  ;;  %v4590_v14 = vld [vmem:[#allocation2 + $0x28] sm:$0xff] }
 0x41c   : > { %4851 = vst [vmem:[#allocation12 + $0x50] sm:$0xff] %v4723_v39  ;;  %4852 = vst [vmem:[#allocation12 + $0x58] sm:$0xff] %v4724_v60  ;;  %v4736_v23 = vadd.f32 %v8283_v0, %v4586_v15  ;;  %v4737_v50 = vadd.f32 %v8271_v43, %v4587_v48  ;;  %v4738_v52 = vadd.f32 %v8275_v8, %v4588_v22  ;;  %v4591_v31 = vld [vmem:[#allocation2 + $0x138] sm:$0xff]  ;;  %v4592_v9 = vld [vmem:[#allocation2 + $0xc0] sm:$0xff] }
 0x41d   : > { %4853 = vst [vmem:[#allocation12 + $0x60] sm:$0xff] %v4725_v55  ;;  %4854 = vst [vmem:[#allocation12 + $0x68] sm:$0xff] %v4726_v40  ;;  %v4739_v62 = vadd.f32 %v8279_v18, %v4589_v41  ;;  %v4740_v44 = vadd.f32 %v8283_v0, %v4590_v14  ;;  %v4741_v24 = vadd.f32 %v8271_v43, %v4591_v31  ;;  %v4593_v27 = vld [vmem:[#allocation2 + $0x1c0] sm:$0xff]  ;;  %v4597_v4 = vld [vmem:[#allocation2 + $0x158] sm:$0xff] }
 0x41e   : > { %4855 = vst [vmem:[#allocation12 + $0x70] sm:$0xff] %v4727_v25  ;;  %4856 = vst [vmem:[#allocation12 + $0x78] sm:$0xff] %v4728_v21  ;;  %v4594_v56 = vld [vmem:[#allocation2 + $0x280] sm:$0xff]  ;;  %v4742_v26 = vadd.f32 %v8275_v8, %v4592_v9  ;;  %v4743_v45 = vadd.f32 %v8279_v18, %v4593_v27  ;;  %v4747_v3 = vadd.f32 %v8279_v18, %v4597_v4  ;;  %v4599_v12 = vld [vmem:[#allocation2 + $0x218] sm:$0xff] }
 0x41f   : > { %4857 = vst [vmem:[#allocation12 + $0x80] sm:$0xff] %v4729_v1  ;;  %4858 = vst [vmem:[#allocation12 + $0x88] sm:$0xff] %v4730_v53  ;;  %v4744_v61 = vadd.f32 %v8283_v0, %v4594_v56  ;;  %v4595_v34 = vld [vmem:[#allocation2 + $0x100] sm:$0xff]  ;;  %v4600_v47 = vld [vmem:[#allocation2 + $0x3f8] sm:$0xff]  ;;  %v4749_v42 = vadd.f32 %v8271_v43, %v4599_v12 }
 0x420   : > { %4859 = vst [vmem:[#allocation12 + $0x90] sm:$0xff] %v4731_v16  ;;  %4860 = vst [vmem:[#allocation12 + $0x98] sm:$0xff] %v4732_v29  ;;  %v4596_v59 = vld [vmem:[#allocation2 + $0x3c0] sm:$0xff]  ;;  %v4745_v49 = vadd.f32 %v8271_v43, %v4595_v34  ;;  %v4750_v32 = vadd.f32 %v8275_v8, %v4600_v47  ;;  %v4601_v11 = vld [vmem:[#allocation2 + $0x8] sm:$0xff] }
 0x421   : > { %4861 = vst [vmem:[#allocation12 + $0xa0] sm:$0xff] %v4733_v20  ;;  %4862 = vst [vmem:[#allocation12 + $0xa8] sm:$0xff] %v4734_v10  ;;  %v4746_v13 = vadd.f32 %v8275_v8, %v4596_v59  ;;  %v4598_v51 = vld [vmem:[#allocation2 + $0x3e0] sm:$0xff]  ;;  %v4602_v35 = vld [vmem:[#allocation2 + $0x128] sm:$0xff]  ;;  %v4751_v38 = vadd.f32 %v8279_v18, %v4601_v11 }
 0x422   : > { %4863 = vst [vmem:[#allocation12 + $0xb0] sm:$0xff] %v4735_v46  ;;  %4864 = vst [vmem:[#allocation12 + $0xb8] sm:$0xff] %v4736_v23  ;;  %v4748_v17 = vadd.f32 %v8283_v0, %v4598_v51  ;;  %v4603_v33 = vld [vmem:[#allocation2 + $0x2a0] sm:$0xff]  ;;  %v4752_v6 = vadd.f32 %v8283_v0, %v4602_v35  ;;  %v4604_v54 = vld [vmem:[#allocation2 + $0x3f0] sm:$0xff] }
 0x423   : > { %4865 = vst [vmem:[#allocation12 + $0xc0] sm:$0xff] %v4737_v50  ;;  %4866 = vst [vmem:[#allocation12 + $0xc8] sm:$0xff] %v4738_v52  ;;  %v4753_v28 = vadd.f32 %v8271_v43, %v4603_v33  ;;  %v4605_v7 = vld [vmem:[#allocation2 + $0xa0] sm:$0xff]  ;;  %v4754_v60 = vadd.f32 %v8275_v8, %v4604_v54  ;;  %v4607_v63 = vld [vmem:[#allocation2 + $0xb0] sm:$0xff] }
 0x424   : > { %4867 = vst [vmem:[#allocation12 + $0xd0] sm:$0xff] %v4739_v62  ;;  %4868 = vst [vmem:[#allocation12 + $0xd8] sm:$0xff] %v4740_v44  ;;  %v4606_v39 = vld [vmem:[#allocation2 + $0x2c0] sm:$0xff]  ;;  %v4755_v58 = vadd.f32 %v8279_v18, %v4605_v7  ;;  %v4609_v40 = vld [vmem:[#allocation2 + $0x1f0] sm:$0xff]  ;;  %v4757_v25 = vadd.f32 %v8271_v43, %v4607_v63 }
 0x425   : > { %4869 = vst [vmem:[#allocation12 + $0xe0] sm:$0xff] %v4741_v24  ;;  %4870 = vst [vmem:[#allocation12 + $0xe8] sm:$0xff] %v4742_v26  ;;  %v4756_v37 = vadd.f32 %v8283_v0, %v4606_v39  ;;  %v4608_v55 = vld [vmem:[#allocation2 + $0x1e0] sm:$0xff]  ;;  %v4759_v36 = vadd.f32 %v8279_v18, %v4609_v40  ;;  %v4610_v2 = vld [vmem:[#allocation2 + $0x10] sm:$0xff] }
 0x426   : > { %4871 = vst [vmem:[#allocation12 + $0xf0] sm:$0xff] %v4743_v45  ;;  %4872 = vst [vmem:[#allocation12 + $0xf8] sm:$0xff] %v4744_v61  ;;  %v4758_v21 = vadd.f32 %v8275_v8, %v4608_v55  ;;  %v4611_v57 = vld [vmem:[#allocation2 + $0x230] sm:$0xff]  ;;  %v4612_v1 = vld [vmem:[#allocation2 + $0x240] sm:$0xff]  ;;  %v4760_v53 = vadd.f32 %v8283_v0, %v4610_v2 }
 0x427   : > { %4873 = vst [vmem:[#allocation12 + $0x100] sm:$0xff] %v4745_v49  ;;  %4874 = vst [vmem:[#allocation12 + $0x108] sm:$0xff] %v4746_v13  ;;  %v4761_v16 = vadd.f32 %v8271_v43, %v4611_v57  ;;  %v4762_v29 = vadd.f32 %v8275_v8, %v4612_v1  ;;  %v4613_v30 = vld [vmem:[#allocation2 + $0x90] sm:$0xff]  ;;  %v4614_v5 = vld [vmem:[#allocation2 + $0x3a0] sm:$0xff] }
 0x428   : > { %4875 = vst [vmem:[#allocation12 + $0x110] sm:$0xff] %v4747_v3  ;;  %4876 = vst [vmem:[#allocation12 + $0x118] sm:$0xff] %v4748_v17  ;;  %v4615_v19 = vld [vmem:[#allocation2 + $0x208] sm:$0xff]  ;;  %v4763_v20 = vadd.f32 %v8279_v18, %v4613_v30  ;;  %v4764_v10 = vadd.f32 %v8283_v0, %v4614_v5  ;;  %v4616_v15 = vld [vmem:[#allocation2 + $0xd0] sm:$0xff] }
 0x429   : > { %4877 = vst [vmem:[#allocation12 + $0x120] sm:$0xff] %v4749_v42  ;;  %4878 = vst [vmem:[#allocation12 + $0x128] sm:$0xff] %v4750_v32  ;;  %v4765_v46 = vadd.f32 %v8271_v43, %v4615_v19  ;;  %v4617_v48 = vld [vmem:[#allocation2 + $0x88] sm:$0xff]  ;;  %v4618_v22 = vld [vmem:[#allocation2 + $0x2f0] sm:$0xff]  ;;  %v4766_v23 = vadd.f32 %v8275_v8, %v4616_v15 }
 0x42a   : > { %4879 = vst [vmem:[#allocation12 + $0x130] sm:$0xff] %v4751_v38  ;;  %4880 = vst [vmem:[#allocation12 + $0x138] sm:$0xff] %v4752_v6  ;;  %v4767_v50 = vadd.f32 %v8279_v18, %v4617_v48  ;;  %v4768_v52 = vadd.f32 %v8283_v0, %v4618_v22  ;;  %v4619_v41 = vld [vmem:[#allocation2 + $0x358] sm:$0xff]  ;;  %v4620_v14 = vld [vmem:[#allocation2 + $0x268] sm:$0xff] }
 0x42b   : > { %4881 = vst [vmem:[#allocation12 + $0x140] sm:$0xff] %v4753_v28  ;;  %4882 = vst [vmem:[#allocation12 + $0x148] sm:$0xff] %v4754_v60  ;;  %v4621_v31 = vld [vmem:[#allocation2 + $0x350] sm:$0xff]  ;;  %v4769_v62 = vadd.f32 %v8271_v43, %v4619_v41  ;;  %v4770_v44 = vadd.f32 %v8275_v8, %v4620_v14  ;;  %v4622_v9 = vld [vmem:[#allocation2 + $0x188] sm:$0xff] }
 0x42c   : > { %4883 = vst [vmem:[#allocation12 + $0x150] sm:$0xff] %v4755_v58  ;;  %4884 = vst [vmem:[#allocation12 + $0x158] sm:$0xff] %v4756_v37  ;;  %v4771_v24 = vadd.f32 %v8279_v18, %v4621_v31  ;;  %v4623_v27 = vld [vmem:[#allocation2 + $0x1d8] sm:$0xff]  ;;  %v4624_v56 = vld [vmem:[#allocation2 + $0x30] sm:$0xff]  ;;  %v4772_v26 = vadd.f32 %v8283_v0, %v4622_v9 }
 0x42d   : > { %4885 = vst [vmem:[#allocation12 + $0x160] sm:$0xff] %v4757_v25  ;;  %4886 = vst [vmem:[#allocation12 + $0x168] sm:$0xff] %v4758_v21  ;;  %v4773_v45 = vadd.f32 %v8271_v43, %v4623_v27  ;;  %v4774_v61 = vadd.f32 %v8275_v8, %v4624_v56  ;;  %v4625_v34 = vld [vmem:[#allocation2 + $0x140] sm:$0xff]  ;;  %v4626_v59 = vld [vmem:[#allocation2 + $0x2a8] sm:$0xff] }
 0x42e   : > { %4887 = vst [vmem:[#allocation12 + $0x170] sm:$0xff] %v4759_v36  ;;  %4888 = vst [vmem:[#allocation12 + $0x178] sm:$0xff] %v4760_v53  ;;  %v4627_v4 = vld [vmem:[#allocation2 + $0x130] sm:$0xff]  ;;  %v4775_v49 = vadd.f32 %v8279_v18, %v4625_v34  ;;  %v4776_v13 = vadd.f32 %v8283_v0, %v4626_v59  ;;  %v4628_v51 = vld [vmem:[#allocation2 + $0x200] sm:$0xff] }
 0x42f   : > { %4889 = vst [vmem:[#allocation12 + $0x180] sm:$0xff] %v4761_v16  ;;  %4890 = vst [vmem:[#allocation12 + $0x188] sm:$0xff] %v4762_v29  ;;  %v4777_v3 = vadd.f32 %v8271_v43, %v4627_v4  ;;  %v4629_v12 = vld [vmem:[#allocation2 + $0x318] sm:$0xff]  ;;  %v4630_v47 = vld [vmem:[#allocation2 + $0x220] sm:$0xff]  ;;  %v4778_v17 = vadd.f32 %v8275_v8, %v4628_v51 }
 0x430   : > { %4891 = vst [vmem:[#allocation12 + $0x190] sm:$0xff] %v4763_v20  ;;  %4892 = vst [vmem:[#allocation12 + $0x198] sm:$0xff] %v4764_v10  ;;  %v4779_v42 = vadd.f32 %v8279_v18, %v4629_v12  ;;  %v4780_v32 = vadd.f32 %v8283_v0, %v4630_v47  ;;  %v4631_v11 = vld [vmem:[#allocation2 + $0x70] sm:$0xff]  ;;  %v4632_v35 = vld [vmem:[#allocation2 + $0x300] sm:$0xff] }
 0x431   : > { %4893 = vst [vmem:[#allocation12 + $0x1a0] sm:$0xff] %v4765_v46  ;;  %4894 = vst [vmem:[#allocation12 + $0x1a8] sm:$0xff] %v4766_v23  ;;  %v4633_v33 = vld [vmem:[#allocation2 + $0xe0] sm:$0xff]  ;;  %v4781_v38 = vadd.f32 %v8271_v43, %v4631_v11  ;;  %v4782_v6 = vadd.f32 %v8275_v8, %v4632_v35  ;;  %v4634_v54 = vld [vmem:[#allocation2 + $0x178] sm:$0xff] }
 0x432   : > { %4895 = vst [vmem:[#allocation12 + $0x1b0] sm:$0xff] %v4767_v50  ;;  %4896 = vst [vmem:[#allocation12 + $0x1b8] sm:$0xff] %v4768_v52  ;;  %v4783_v28 = vadd.f32 %v8279_v18, %v4633_v33  ;;  %v4635_v7 = vld [vmem:[#allocation2 + $0x328] sm:$0xff]  ;;  %v4636_v39 = vld [vmem:[#allocation2 + $0x260] sm:$0xff]  ;;  %v4784_v60 = vadd.f32 %v8283_v0, %v4634_v54 }
 0x433   : > { %4897 = vst [vmem:[#allocation12 + $0x1c0] sm:$0xff] %v4769_v62  ;;  %4898 = vst [vmem:[#allocation12 + $0x1c8] sm:$0xff] %v4770_v44  ;;  %v4785_v58 = vadd.f32 %v8271_v43, %v4635_v7  ;;  %v4786_v37 = vadd.f32 %v8275_v8, %v4636_v39  ;;  %v4637_v63 = vld [vmem:[#allocation2 + $0x3b8] sm:$0xff]  ;;  %v4639_v40 = vld [vmem:[#allocation2 + $0x248] sm:$0xff] }
 0x434   : > { %4899 = vst [vmem:[#allocation12 + $0x1d0] sm:$0xff] %v4771_v24  ;;  %4900 = vst [vmem:[#allocation12 + $0x1d8] sm:$0xff] %v4772_v26  ;;  %v4638_v55 = vld [vmem:[#allocation2 + $0x2b8] sm:$0xff]  ;;  %v4787_v25 = vadd.f32 %v8279_v18, %v4637_v63  ;;  %v4789_v36 = vadd.f32 %v8271_v43, %v4639_v40  ;;  %v4640_v2 = vld [vmem:[#allocation2 + $0x40] sm:$0xff] }
 0x435   : > { %4901 = vst [vmem:[#allocation12 + $0x1e0] sm:$0xff] %v4773_v45  ;;  %4902 = vst [vmem:[#allocation12 + $0x1e8] sm:$0xff] %v4774_v61  ;;  %v4788_v21 = vadd.f32 %v8283_v0, %v4638_v55  ;;  %v4641_v57 = vld [vmem:[#allocation2 + $0x20] sm:$0xff]  ;;  %v4642_v1 = vld [vmem:[#allocation2 + $0xe8] sm:$0xff]  ;;  %v4790_v53 = vadd.f32 %v8275_v8, %v4640_v2 }
 0x436   : > { %4903 = vst [vmem:[#allocation12 + $0x1f0] sm:$0xff] %v4775_v49  ;;  %4904 = vst [vmem:[#allocation12 + $0x1f8] sm:$0xff] %v4776_v13  ;;  %v4791_v16 = vadd.f32 %v8279_v18, %v4641_v57  ;;  %v4792_v29 = vadd.f32 %v8283_v0, %v4642_v1  ;;  %v4643_v30 = vld [vmem:[#allocation2 + $0x288] sm:$0xff]  ;;  %v4646_v15 = vld [vmem:[#allocation2 + $0x160] sm:$0xff] }
 0x437   : > { %4905 = vst [vmem:[#allocation12 + $0x200] sm:$0xff] %v4777_v3  ;;  %4906 = vst [vmem:[#allocation12 + $0x208] sm:$0xff] %v4778_v17  ;;  %v4644_v5 = vld [vmem:[#allocation2 + $0x3a8] sm:$0xff]  ;;  %v4793_v20 = vadd.f32 %v8271_v43, %v4643_v30  ;;  %v4648_v22 = vld [vmem:[#allocation2 + $0x210] sm:$0xff]  ;;  %v4796_v23 = vadd.f32 %v8283_v0, %v4646_v15 }
 0x438   : > { %4907 = vst [vmem:[#allocation12 + $0x210] sm:$0xff] %v4779_v42  ;;  %4908 = vst [vmem:[#allocation12 + $0x218] sm:$0xff] %v4780_v32  ;;  %v4645_v19 = vld [vmem:[#allocation2 + $0x3c8] sm:$0xff]  ;;  %v4794_v10 = vadd.f32 %v8275_v8, %v4644_v5  ;;  %v4798_v52 = vadd.f32 %v8275_v8, %v4648_v22  ;;  %v4649_v41 = vld [vmem:[#allocation2 + $0x3d8] sm:$0xff] }
 0x439   : > { %4909 = vst [vmem:[#allocation12 + $0x220] sm:$0xff] %v4781_v38  ;;  %4910 = vst [vmem:[#allocation12 + $0x228] sm:$0xff] %v4782_v6  ;;  %v4795_v46 = vadd.f32 %v8279_v18, %v4645_v19  ;;  %v4647_v48 = vld [vmem:[#allocation2 + $0x2c8] sm:$0xff]  ;;  %v4651_v31 = vld [vmem:[#allocation2 + $0x1b0] sm:$0xff]  ;;  %v4799_v62 = vadd.f32 %v8279_v18, %v4649_v41 }
 0x43a   : > { %4911 = vst [vmem:[#allocation12 + $0x230] sm:$0xff] %v4783_v28  ;;  %4912 = vst [vmem:[#allocation12 + $0x238] sm:$0xff] %v4784_v60  ;;  %v4797_v50 = vadd.f32 %v8271_v43, %v4647_v48  ;;  %v4650_v14 = vld [vmem:[#allocation2 + $0x1e8] sm:$0xff]  ;;  %v4801_v24 = vadd.f32 %v8271_v43, %v4651_v31  ;;  %v4653_v27 = vld [vmem:[#allocation2 + $0x2d0] sm:$0xff] }
 0x43b   : > { %4913 = vst [vmem:[#allocation12 + $0x240] sm:$0xff] %v4785_v58  ;;  %4914 = vst [vmem:[#allocation12 + $0x248] sm:$0xff] %v4786_v37  ;;  %v4800_v44 = vadd.f32 %v8283_v0, %v4650_v14  ;;  %v4652_v9 = vld [vmem:[#allocation2 + $0x1c8] sm:$0xff]  ;;  %v4654_v56 = vld [vmem:[#allocation2 + $0x1d0] sm:$0xff]  ;;  %v4803_v45 = vadd.f32 %v8279_v18, %v4653_v27 }
 0x43c   : > { %4915 = vst [vmem:[#allocation12 + $0x250] sm:$0xff] %v4787_v25  ;;  %4916 = vst [vmem:[#allocation12 + $0x258] sm:$0xff] %v4788_v21  ;;  %v4802_v26 = vadd.f32 %v8275_v8, %v4652_v9  ;;  %v4804_v61 = vadd.f32 %v8283_v0, %v4654_v56  ;;  %v4655_v34 = vld [vmem:[#allocation2 + $0x58] sm:$0xff]  ;;  %v4656_v59 = vld [vmem:[#allocation2 + $0x120] sm:$0xff] }
 0x43d   : > { %4917 = vst [vmem:[#allocation12 + $0x260] sm:$0xff] %v4789_v36  ;;  %4918 = vst [vmem:[#allocation12 + $0x268] sm:$0xff] %v4790_v53  ;;  %v4657_v4 = vld [vmem:[#allocation2 + $0x198] sm:$0xff]  ;;  %v4805_v49 = vadd.f32 %v8271_v43, %v4655_v34  ;;  %v4806_v13 = vadd.f32 %v8275_v8, %v4656_v59  ;;  %v4658_v51 = vld [vmem:[#allocation2 + $0x2e8] sm:$0xff] }
 0x43e   : > { %4919 = vst [vmem:[#allocation12 + $0x270] sm:$0xff] %v4791_v16  ;;  %4920 = vst [vmem:[#allocation12 + $0x278] sm:$0xff] %v4792_v29  ;;  %v4807_v3 = vadd.f32 %v8279_v18, %v4657_v4  ;;  %v4659_v12 = vld [vmem:[#allocation2 + $0x1f8] sm:$0xff]  ;;  %v4808_v17 = vadd.f32 %v8283_v0, %v4658_v51  ;;  %v4662_v35 = vld [vmem:[#allocation2 + $0x390] sm:$0xff] }
 0x43f   : > { %4921 = vst [vmem:[#allocation12 + $0x280] sm:$0xff] %v4793_v20  ;;  %4922 = vst [vmem:[#allocation12 + $0x288] sm:$0xff] %v4794_v10  ;;  %v4660_v47 = vld [vmem:[#allocation2 + $0x238] sm:$0xff]  ;;  %v4809_v42 = vadd.f32 %v8271_v43, %v4659_v12  ;;  %v4663_v33 = vld [vmem:[#allocation2 + $0x1a0] sm:$0xff]  ;;  %v4812_v6 = vadd.f32 %v8283_v0, %v4662_v35 }
 0x440   : > { %4923 = vst [vmem:[#allocation12 + $0x290] sm:$0xff] %v4795_v46  ;;  %4924 = vst [vmem:[#allocation12 + $0x298] sm:$0xff] %v4796_v23  ;;  %v4810_v32 = vadd.f32 %v8275_v8, %v4660_v47  ;;  %v4661_v11 = vld [vmem:[#allocation2 + $0x398] sm:$0xff]  ;;  %v4813_v28 = vadd.f32 %v8271_v43, %v4663_v33  ;;  %v4664_v54 = vld [vmem:[#allocation2 + $0xa8] sm:$0xff] }
 0x441   : > { %4925 = vst [vmem:[#allocation12 + $0x2a0] sm:$0xff] %v4797_v50  ;;  %4926 = vst [vmem:[#allocation12 + $0x2a8] sm:$0xff] %v4798_v52  ;;  %v4811_v38 = vadd.f32 %v8279_v18, %v4661_v11  ;;  %v4665_v7 = vld [vmem:[#allocation2 + $0x258] sm:$0xff]  ;;  %v4814_v60 = vadd.f32 %v8275_v8, %v4664_v54  ;;  %v4667_v63 = vld [vmem:[#allocation2 + $0xf0] sm:$0xff] }
 0x442   : > { %4927 = vst [vmem:[#allocation12 + $0x2b0] sm:$0xff] %v4799_v62  ;;  %4928 = vst [vmem:[#allocation12 + $0x2b8] sm:$0xff] %v4800_v44  ;;  %v4666_v39 = vld [vmem:[#allocation2 + $0x2d8] sm:$0xff]  ;;  %v4815_v58 = vadd.f32 %v8279_v18, %v4665_v7  ;;  %v4668_v55 = vld [vmem:[#allocation2 + $0x180] sm:$0xff]  ;;  %v4817_v25 = vadd.f32 %v8271_v43, %v4667_v63 }
 0x443   : > { %4929 = vst [vmem:[#allocation12 + $0x2c0] sm:$0xff] %v4801_v24  ;;  %4930 = vst [vmem:[#allocation12 + $0x2c8] sm:$0xff] %v4802_v26  ;;  %v4816_v37 = vadd.f32 %v8283_v0, %v4666_v39  ;;  %v4669_v40 = vld [vmem:[#allocation2 + $0x170] sm:$0xff]  ;;  %v4818_v21 = vadd.f32 %v8275_v8, %v4668_v55  ;;  %v4672_v1 = vld [vmem:[#allocation2 + $0x378] sm:$0xff] }
 0x444   : > { %4931 = vst [vmem:[#allocation12 + $0x2d0] sm:$0xff] %v4803_v45  ;;  %4932 = vst [vmem:[#allocation12 + $0x2d8] sm:$0xff] %v4804_v61  ;;  %v4819_v36 = vadd.f32 %v8279_v18, %v4669_v40  ;;  %v4670_v2 = vld [vmem:[#allocation2 + $0x3d0] sm:$0xff]  ;;  %v4822_v29 = vadd.f32 %v8275_v8, %v4672_v1  ;;  %v4673_v30 = vld [vmem:[#allocation2 + $0xb8] sm:$0xff] }
 0x445   : > { %4933 = vst [vmem:[#allocation12 + $0x2e0] sm:$0xff] %v4805_v49  ;;  %4934 = vst [vmem:[#allocation12 + $0x2e8] sm:$0xff] %v4806_v13  ;;  %v4671_v57 = vld [vmem:[#allocation2 + $0x250] sm:$0xff]  ;;  %v4820_v53 = vadd.f32 %v8283_v0, %v4670_v2  ;;  %v4674_v5 = vld [vmem:[#allocation2 + $0x38] sm:$0xff]  ;;  %v4823_v20 = vadd.f32 %v8279_v18, %v4673_v30 }
 0x446   : > { %4935 = vst [vmem:[#allocation12 + $0x2f0] sm:$0xff] %v4807_v3  ;;  %4936 = vst [vmem:[#allocation12 + $0x2f8] sm:$0xff] %v4808_v17  ;;  %v4821_v16 = vadd.f32 %v8271_v43, %v4671_v57  ;;  %v4675_v19 = vld [vmem:[#allocation2 + $0x78] sm:$0xff]  ;;  %v4824_v10 = vadd.f32 %v8283_v0, %v4674_v5  ;;  %v4676_v15 = vld [vmem:[#allocation2 + $0x308] sm:$0xff] }
 0x447   : > { %4937 = vst [vmem:[#allocation12 + $0x300] sm:$0xff] %v4809_v42  ;;  %4938 = vst [vmem:[#allocation12 + $0x308] sm:$0xff] %v4810_v32  ;;  %v4825_v46 = vadd.f32 %v8271_v43, %v4675_v19  ;;  %v4677_v48 = vld [vmem:[#allocation2 + $0x370] sm:$0xff]  ;;  %v4678_v22 = vld [vmem:[#allocation2 + $0xc8] sm:$0xff]  ;;  %v4826_v23 = vadd.f32 %v8275_v8, %v4676_v15 }
 0x448   : > { %4939 = vst [vmem:[#allocation12 + $0x310] sm:$0xff] %v4811_v38  ;;  %4940 = vst [vmem:[#allocation12 + $0x318] sm:$0xff] %v4812_v6  ;;  %v4827_v50 = vadd.f32 %v8279_v18, %v4677_v48  ;;  %v4828_v52 = vadd.f32 %v8283_v0, %v4678_v22  ;;  %v4679_v41 = vld [vmem:[#allocation2 + $0x278] sm:$0xff]  ;;  %v4680_v14 = vld [vmem:[#allocation2 + $0x360] sm:$0xff] }
 0x449   : > { %4941 = vst [vmem:[#allocation12 + $0x320] sm:$0xff] %v4813_v28  ;;  %4942 = vst [vmem:[#allocation12 + $0x328] sm:$0xff] %v4814_v60  ;;  %v4681_v31 = vld [vmem:[#allocation2 + $0x228] sm:$0xff]  ;;  %v4829_v62 = vadd.f32 %v8271_v43, %v4679_v41  ;;  %v4830_v44 = vadd.f32 %v8275_v8, %v4680_v14  ;;  %v4684_v56 = vld [vmem:[#allocation2 + $0xf8] sm:$0xff] }
 0x44a   : > { %4943 = vst [vmem:[#allocation12 + $0x330] sm:$0xff] %v4815_v58  ;;  %4944 = vst [vmem:[#allocation12 + $0x338] sm:$0xff] %v4816_v37  ;;  %v4831_v24 = vadd.f32 %v8279_v18, %v4681_v31  ;;  %v4682_v9 = vld [vmem:[#allocation2 + $0x348] sm:$0xff]  ;;  %v4834_v61 = vadd.f32 %v8275_v8, %v4684_v56  ;;  %v4686_v59 = vld [vmem:[#allocation2] sm:$0xff] }
 0x44b   : > { %4945 = vst [vmem:[#allocation12 + $0x340] sm:$0xff] %v4817_v25  ;;  %4946 = vst [vmem:[#allocation12 + $0x348] sm:$0xff] %v4818_v21  ;;  %v4683_v27 = vld [vmem:[#allocation2 + $0x148] sm:$0xff]  ;;  %v4832_v26 = vadd.f32 %v8283_v0, %v4682_v9  ;;  %v4687_v4 = vld [vmem:[#allocation2 + $0x298] sm:$0xff]  ;;  %v4836_v13 = vadd.f32 %v8283_v0, %v4686_v59 }
 0x44c   : > { %4947 = vst [vmem:[#allocation12 + $0x350] sm:$0xff] %v4819_v36  ;;  %4948 = vst [vmem:[#allocation12 + $0x358] sm:$0xff] %v4820_v53  ;;  %v4833_v45 = vadd.f32 %v8271_v43, %v4683_v27  ;;  %v4685_v34 = vld [vmem:[#allocation2 + $0x68] sm:$0xff]  ;;  %v4837_v3 = vadd.f32 %v8271_v43, %v4687_v4  ;;  %v4688_v51 = vld [vmem:[#allocation2 + $0x270] sm:$0xff] }
 0x44d   : > { %4949 = vst [vmem:[#allocation12 + $0x360] sm:$0xff] %v4821_v16  ;;  %4950 = vst [vmem:[#allocation12 + $0x368] sm:$0xff] %v4822_v29  ;;  %v4835_v49 = vadd.f32 %v8279_v18, %v4685_v34  ;;  %v4689_v12 = vld [vmem:[#allocation2 + $0x310] sm:$0xff]  ;;  %v4838_v17 = vadd.f32 %v8275_v8, %v4688_v51 }
 0x44e   : > { %4951 = vst [vmem:[#allocation12 + $0x370] sm:$0xff] %v4823_v20  ;;  %4952 = vst [vmem:[#allocation12 + $0x378] sm:$0xff] %v4824_v10  ;;  %v4690_v47 = vld [vmem:[#allocation2 + $0x190] sm:$0xff]  ;;  %v4839_v42 = vadd.f32 %v8279_v18, %v4689_v12 }
 0x44f   : > { %4953 = vst [vmem:[#allocation12 + $0x380] sm:$0xff] %v4825_v46  ;;  %4954 = vst [vmem:[#allocation12 + $0x388] sm:$0xff] %v4826_v23  ;;  %v4840_v32 = vadd.f32 %v8283_v0, %v4690_v47 }
 0x450   : > { %4955 = vst [vmem:[#allocation12 + $0x390] sm:$0xff] %v4827_v50  ;;  %4956 = vst [vmem:[#allocation12 + $0x398] sm:$0xff] %v4828_v52 }
 0x451   : > { %4957 = vst [vmem:[#allocation12 + $0x3a0] sm:$0xff] %v4829_v62  ;;  %4958 = vst [vmem:[#allocation12 + $0x3a8] sm:$0xff] %v4830_v44 }
 0x452   : > { %4959 = vst [vmem:[#allocation12 + $0x3b0] sm:$0xff] %v4831_v24  ;;  %4960 = vst [vmem:[#allocation12 + $0x3b8] sm:$0xff] %v4832_v26 }
 0x453   : > { %4961 = vst [vmem:[#allocation12 + $0x3c0] sm:$0xff] %v4833_v45  ;;  %4962 = vst [vmem:[#allocation12 + $0x3c8] sm:$0xff] %v4834_v61 }
 0x454   : > { %4963 = vst [vmem:[#allocation12 + $0x3d0] sm:$0xff] %v4835_v49  ;;  %4964 = vst [vmem:[#allocation12 + $0x3d8] sm:$0xff] %v4836_v13 }
 0x455   : > { %4965 = vst [vmem:[#allocation12 + $0x3e0] sm:$0xff] %v4837_v3  ;;  %4966 = vst [vmem:[#allocation12 + $0x3e8] sm:$0xff] %v4838_v17 }
 0x456   : > { %4967 = vst [vmem:[#allocation12 + $0x3f0] sm:$0xff] %v4839_v42  ;;  %4968 = vst [vmem:[#allocation12 + $0x3f8] sm:$0xff] %v4840_v32 }
 0x457 PF: > { %p5500_p2 = scmp.eq.s32.totalorder %s6340_s24, 3  ;;  %s6278_s21 = smov [#allocation12]  }
 0x458   : > { %s4979_s26 = sshll.u32 %s6278_s21, 4  ;;  %s4980_s26 = int_to_ptr.vmem [resolvable:$true] %s4979_s26 }
 0x459   : > { %s6177_s29 = scalar_lea.vmem %s4980_s26, 16384  ;;  %p6184_p13 = scmp.lt.s32.totalorder %s4980_s26, %s4980_s26 }
 0x45a   : > { %p6178_p5 = scmp.ne.s32.totalorder %s4980_s26, %s6177_s29  ;;  %p6185_p4 = scmp.lt.s32.totalorder %s6177_s29, %s6177_s29 }
 0x45c   : > { %p6179_p7 = pnand %p6178_p5, %p5500_p2  ;;  %p6186_p3 = por %p6185_p4, %p6184_p13 }
 0x45e   : > { %p6180_p9 = pneg %p6179_p7 }
 0x460   : > { %p6187_p0 = pnand %p6186_p3, %p6180_p9 }
 0x462   : > { %6190 = shalt.err (!%p6187_p0)
}
 0x463   : > { %s6279_s12 = smov 512   ;;  %s6280_s16 = smov 32  }
 0x464   : > { %5475 = dma.vmem_to_hbm [thread:$0]  (%p5500_p2), %s4980_s26, 16384, %s8448_s5, [#allocation5], %s6279_s12, %s6279_s12, %s6280_s16  }
 0x465   : > { %6242 = dma.done.wait (%p5500_p2), [#allocation5], 16384  }
 0x466   : > { %6244 = vsyncadd (%p5500_p2), [#allocation5], 4294950912 }
 0x467 PF: > { %s23_s23 = sadd.s32 1, %s6267_s23   ;;  %s8598_s10 = sld [smem:[#allocation18_spill]] }
 0x468   : > { %p20_p10 = scmp.ge.s32.totalorder %s23_s23, 6   ;;  %s8599_s18 = smov %s6251_s19 }
 0x469   : > { %s8600_s19 = smov %s6255_s20  ;;  %s8601_s20 = smov %s6404_s7 }
 0x46a   : > { %s8602_s21 = smov %s6263_s22  ;;  %22 = sbr.rel (!%p20_p10) target bundleno = 11 (0xb), region = 120 }
 0x46d   : > { %s8603_s22 = smov %s8598_s10 }
 0x46f   :  { %4995 = vsyncpa [#allocation4], 1 }
 0x470   :  { %4997 = vsyncpa [#allocation4 + $0x1], 1 }
 0x471   :  { %4998 = vsyncpa [#allocation7], 1 }
 0x472   :  { %5000 = vsyncpa [#allocation7 + $0x1], 1 }
 0x473   :  { %5001 = vsyncpa [#allocation10], 1 }
 0x474   :  { %5003 = vsyncpa [#allocation10 + $0x1], 1 }
 0x475   :  { %5004 = vsyncpa [#allocation5], 1 }
 0x476   :  { %5006 = vsyncpa [#allocation5 + $0x1], 1 }

</bundles_post_ra>
